<compile_context>
chip_gen: v5e
topology: v5e:2x2
jax: 0.10.0
libtpu: 0.0.40
codegen_flags: <defaults>
</compile_context>

<pallas_src>
import functools
import math

import jax
import jax.numpy as jnp
from jax import lax
from jax.experimental import pallas as pl
from jax.experimental.pallas import tpu as pltpu

# ---- small synthetic BERT config ----
VOCAB = 100
MAX_POS = 16
TYPE_VOCAB = 2
HIDDEN = 128                # stands in for BERT_HIDDEN_SIZE = 768
NUM_HEADS = 4
HEAD_DIM = HIDDEN // NUM_HEADS
INTERMEDIATE = 256
NUM_LAYERS = 2
N_SENTIMENT_CLASSES = 5
CLS_PAD = 128               # lane-dense padded classifier width
LN_EPS = 1e-12


def _layernorm(x, gamma, beta, eps=LN_EPS):
    mu = jnp.mean(x, axis=-1, keepdims=True)
    var = jnp.mean(jnp.square(x - mu), axis=-1, keepdims=True)
    return (x - mu) * lax.rsqrt(var + eps) * gamma + beta


# -------------------- fused Pallas kernel --------------------

def sentiment_bert_kernel(
        we_ref, pe_ref, te_ref, bias_ref,
        emb_g_ref, emb_b_ref,
        wqkv_ref, bqkv_ref, wo_ref, bo_ref,
        ln1_g_ref, ln1_b_ref,
        w1_ref, b1_ref, w2_ref, b2_ref,
        ln2_g_ref, ln2_b_ref,
        cls_w_ref, cls_b_ref,
        cls_out_ref, logits_ref,
        *, num_layers, num_heads, head_dim, batch, seq):
    B, S = batch, seq
    H = num_heads * head_dim
    inv_sqrt_d = 1.0 / math.sqrt(head_dim)

    # ---- embeddings: word + position + token-type add, then LayerNorm (f32) ----
    # we: (B*S, H), pe: (B*S, H) (pre-tiled), te: (1, H)
    x = _layernorm(we_ref[...] + pe_ref[...] + te_ref[...],
                   emb_g_ref[...], emb_b_ref[...])            # (B*S, H)

    # Block-diagonal (cross-batch) + padding additive mask, read ONCE, reused in every
    # layer/head (already full (B*S, B*S) so no broadcast inside the loop).
    attn_bias = bias_ref[...]                                 # (B*S, B*S), 0 / -1e4

    def layer_body(l, x):
        xb = x.astype(jnp.bfloat16)
        # Fused QKV projection: one lane-dense (B*S, 3H) bf16 matmul on the MXU.
        qkv = jnp.dot(xb, wqkv_ref[l],
                      preferred_element_type=jnp.float32) + bqkv_ref[l]   # (B*S, 3H)
        qkv_b = qkv.astype(jnp.bfloat16)   # single wide cast, sliced per head below

        # Multi-head attention with the batch folded into the score matrix via the
        # block-diagonal mask: num_heads small matmuls, contexts kept in registers.
        ctx_heads = []
        for hd_i in range(num_heads):
            c0 = hd_i * head_dim
            qh = qkv_b[:, c0:c0 + head_dim]                   # (B*S, hd) bf16
            kh = qkv_b[:, H + c0:H + c0 + head_dim]
            vh = qkv_b[:, 2 * H + c0:2 * H + c0 + head_dim]
            # q @ k^T without an explicit transpose (contract last dims).
            s = lax.dot_general(qh, kh, (((1,), (1,)), ((), ())),
                                preferred_element_type=jnp.float32)       # (B*S, B*S)
            s = s * inv_sqrt_d + attn_bias
            s = s - jnp.max(s, axis=-1, keepdims=True)
            p = jnp.exp(s)
            p = p * pl.reciprocal(jnp.sum(p, axis=-1, keepdims=True),
                                  approx=True)
            ctx_heads.append(jnp.dot(p.astype(jnp.bfloat16), vh,
                                     preferred_element_type=jnp.float32))  # (B*S, hd)
        # Register-resident lane concat -> feed output projection directly (no VMEM slab).
        ctx = jnp.concatenate(ctx_heads, axis=-1).astype(jnp.bfloat16)     # (B*S, H)

        attn = jnp.dot(ctx, wo_ref[l],
                       preferred_element_type=jnp.float32) + bo_ref[l]
        h1 = _layernorm(x + attn, ln1_g_ref[l], ln1_b_ref[l])

        # Feed-forward (bf16 matmuls, f32 accumulation / elementwise).
        ff = jnp.dot(h1.astype(jnp.bfloat16), w1_ref[l],
                     preferred_element_type=jnp.float32) + b1_ref[l]
        # TODO(synk): PyTorch BERT uses exact erf GELU; tanh approximation is used here.
        ff = jax.nn.gelu(ff, approximate=True)
        ff = jnp.dot(ff.astype(jnp.bfloat16), w2_ref[l],
                     preferred_element_type=jnp.float32) + b2_ref[l]
        return _layernorm(h1 + ff, ln2_g_ref[l], ln2_b_ref[l])

    x = lax.fori_loop(0, num_layers, layer_body, x, unroll=True)

    # ---- classifier tail on the [CLS] rows (row b*S of each batch element) ----
    cls = jnp.concatenate([x[b * S:b * S + 1, :] for b in range(B)], axis=0)   # (B, H)
    # TODO(synk): nn.Dropout is identity at inference; no dropout mask is applied here.
    cls_out_ref[...] = cls
    # cls_w / cls_b are padded to 128 lanes -> full-width unmasked store; wrapper slices [:, :5].
    logits_ref[...] = (jnp.dot(cls, cls_w_ref[...],
                               preferred_element_type=jnp.float32) + cls_b_ref[...])


# -------------------- parameters --------------------

def init_params(key):
    keys = jax.random.split(key, 64)
    it = iter(keys)

    def nrm(shape):
        return (0.02 * jax.random.normal(next(it), shape)).astype(jnp.float32)

    params = dict(
        word_emb=nrm((VOCAB, HIDDEN)),
        pos_emb=nrm((MAX_POS, HIDDEN)),
        type_emb=nrm((TYPE_VOCAB, HIDDEN)),
        emb_ln_g=jnp.ones((1, HIDDEN), jnp.float32),
        emb_ln_b=jnp.zeros((1, HIDDEN), jnp.float32),
        cls_w=nrm((HIDDEN, N_SENTIMENT_CLASSES)),
        cls_b=jnp.zeros((1, N_SENTIMENT_CLASSES), jnp.float32),
        layers=[],
    )
    for _ in range(NUM_LAYERS):
        params['layers'].append(dict(
            wq=nrm((HIDDEN, HIDDEN)), bq=jnp.zeros((1, HIDDEN), jnp.float32),
            wk=nrm((HIDDEN, HIDDEN)), bk=jnp.zeros((1, HIDDEN), jnp.float32),
            wv=nrm((HIDDEN, HIDDEN)), bv=jnp.zeros((1, HIDDEN), jnp.float32),
            wo=nrm((HIDDEN, HIDDEN)), bo=jnp.zeros((1, HIDDEN), jnp.float32),
            ln1_g=jnp.ones((1, HIDDEN), jnp.float32),
            ln1_b=jnp.zeros((1, HIDDEN), jnp.float32),
            w1=nrm((HIDDEN, INTERMEDIATE)),
            b1=jnp.zeros((1, INTERMEDIATE), jnp.float32),
            w2=nrm((INTERMEDIATE, HIDDEN)),
            b2=jnp.zeros((1, HIDDEN), jnp.float32),
            ln2_g=jnp.ones((1, HIDDEN), jnp.float32),
            ln2_b=jnp.zeros((1, HIDDEN), jnp.float32),
        ))
    return params


def pack_params(params):
    """Stack per-layer weights into [NUM_LAYERS, ...] slabs; bf16 for MXU weights.
    Classifier weight/bias are padded to a lane-dense 128-wide output."""
    L = params['layers']

    def stack(name, dtype=jnp.float32):
        return jnp.stack([lp[name] for lp in L], axis=0).astype(dtype)

    wqkv = jnp.stack(
        [jnp.concatenate([lp['wq'], lp['wk'], lp['wv']], axis=1) for lp in L],
        axis=0).astype(jnp.bfloat16)                               # (L, H, 3H)
    bqkv = jnp.stack(
        [jnp.concatenate([lp['bq'], lp['bk'], lp['bv']], axis=1) for lp in L],
        axis=0)                                                    # (L, 1, 3H)

    cls_w_pad = jnp.zeros((HIDDEN, CLS_PAD), jnp.float32
                          ).at[:, :N_SENTIMENT_CLASSES].set(params['cls_w'])
    cls_b_pad = jnp.zeros((1, CLS_PAD), jnp.float32
                          ).at[:, :N_SENTIMENT_CLASSES].set(params['cls_b'])

    return dict(
        word_emb=params['word_emb'], pos_emb=params['pos_emb'],
        type_emb=params['type_emb'],
        emb_ln_g=params['emb_ln_g'], emb_ln_b=params['emb_ln_b'],
        wqkv=wqkv, bqkv=bqkv,
        wo=stack('wo', jnp.bfloat16), bo=stack('bo'),
        ln1_g=stack('ln1_g'), ln1_b=stack('ln1_b'),
        w1=stack('w1', jnp.bfloat16), b1=stack('b1'),
        w2=stack('w2', jnp.bfloat16), b2=stack('b2'),
        ln2_g=stack('ln2_g'), ln2_b=stack('ln2_b'),
        cls_w=cls_w_pad, cls_b=cls_b_pad,
    )


# -------------------- forward (SentimentBERT.forward / predict_sentiment) --------------------

@jax.jit
def sentiment_bert_predict(packed, input_ids, attention_mask):
    B, S = input_ids.shape
    # Embedding gathers are JAX glue; the add + LayerNorm happen inside the kernel.
    we = jnp.take(packed['word_emb'], input_ids, axis=0).reshape(B * S, HIDDEN)
    pe = jnp.tile(packed['pos_emb'][:S], (B, 1))                   # (B*S, H)
    # TODO(synk): token_type_ids are assumed all-zero (row 0 of the type-embedding table).
    te = packed['type_emb'][0:1, :]                                # (1, H)

    # Block-diagonal + padding additive mask, built ONCE for the whole forward pass:
    # 0 where (same batch element AND key is valid), -10000 elsewhere (cross-batch or padding).
    key_valid = attention_mask.astype(jnp.float32).reshape(1, B * S)      # (1, B*S)
    row_b = jnp.arange(B * S, dtype=jnp.int32)[:, None] // S
    col_b = jnp.arange(B * S, dtype=jnp.int32)[None, :] // S
    same_batch = (row_b == col_b).astype(jnp.float32)                     # (B*S, B*S)
    attn_bias = (same_batch * key_valid - 1.0) * 10000.0                  # (B*S, B*S)

    kernel = functools.partial(
        sentiment_bert_kernel, num_layers=NUM_LAYERS, num_heads=NUM_HEADS,
        head_dim=HEAD_DIM, batch=B, seq=S)

    vmem_spec = pl.BlockSpec(memory_space=pltpu.MemorySpace.VMEM)
    num_inputs = 20

    cls_emb, logits_pad = pl.pallas_call(
        kernel,
        out_shape=(jax.ShapeDtypeStruct((B, HIDDEN), jnp.float32),
                   jax.ShapeDtypeStruct((B, CLS_PAD), jnp.float32)),
        in_specs=[vmem_spec] * num_inputs,
        out_specs=(vmem_spec, vmem_spec),
        compiler_params=pltpu.CompilerParams(vmem_limit_bytes=32 * 1024 * 1024),
    )(we, pe, te, attn_bias,
      packed['emb_ln_g'], packed['emb_ln_b'],
      packed['wqkv'], packed['bqkv'], packed['wo'], packed['bo'],
      packed['ln1_g'], packed['ln1_b'],
      packed['w1'], packed['b1'], packed['w2'], packed['b2'],
      packed['ln2_g'], packed['ln2_b'],
      packed['cls_w'], packed['cls_b'])
    logits = logits_pad[:, :N_SENTIMENT_CLASSES]
    return cls_emb, logits


if __name__ == "__main__":
    key = jax.random.PRNGKey(0)
    pkey, ikey = jax.random.split(key)
    params = init_params(pkey)
    packed = pack_params(params)

    B, S = 2, 8
    input_ids = jax.random.randint(ikey, (B, S), 0, VOCAB, dtype=jnp.int32)
    attention_mask = jnp.array([[1] * S, [1] * 6 + [0] * 2], dtype=jnp.int32)

    cls_embedding, logits = sentiment_bert_predict(packed, input_ids, attention_mask)
    jax.block_until_ready((cls_embedding, logits))
    assert cls_embedding.shape == (B, HIDDEN)
    assert logits.shape == (B, N_SENTIMENT_CLASSES)
    print("KERNEL_OK")
</pallas_src>

<mosaic_0001>
module attributes {stable_mosaic.version = 11 : i64} {
  func.func @sentiment_bert_kernel(%arg0: memref<16x128xf32, #tpu.memory_space<vmem>>, %arg1: memref<16x128xf32, #tpu.memory_space<vmem>>, %arg2: memref<1x128xf32, #tpu.memory_space<vmem>>, %arg3: memref<16x16xf32, #tpu.memory_space<vmem>>, %arg4: memref<1x128xf32, #tpu.memory_space<vmem>>, %arg5: memref<1x128xf32, #tpu.memory_space<vmem>>, %arg6: memref<2x128x384xbf16, #tpu.memory_space<vmem>>, %arg7: memref<2x1x384xf32, #tpu.memory_space<vmem>>, %arg8: memref<2x128x128xbf16, #tpu.memory_space<vmem>>, %arg9: memref<2x1x128xf32, #tpu.memory_space<vmem>>, %arg10: memref<2x1x128xf32, #tpu.memory_space<vmem>>, %arg11: memref<2x1x128xf32, #tpu.memory_space<vmem>>, %arg12: memref<2x128x256xbf16, #tpu.memory_space<vmem>>, %arg13: memref<2x1x256xf32, #tpu.memory_space<vmem>>, %arg14: memref<2x256x128xbf16, #tpu.memory_space<vmem>>, %arg15: memref<2x1x128xf32, #tpu.memory_space<vmem>>, %arg16: memref<2x1x128xf32, #tpu.memory_space<vmem>>, %arg17: memref<2x1x128xf32, #tpu.memory_space<vmem>>, %arg18: memref<128x128xf32, #tpu.memory_space<vmem>>, %arg19: memref<1x128xf32, #tpu.memory_space<vmem>>, %arg20: memref<2x128xf32, #tpu.memory_space<vmem>>, %arg21: memref<2x128xf32, #tpu.memory_space<vmem>>) attributes {dimension_semantics = [], scalar_prefetch = 0 : i64, scratch_operands = 0 : i64, tpu.core_type = #tpu.core_type<tc>} {
    %c0 = arith.constant 0 : index
    %c0_0 = arith.constant 0 : index
    %0 = vector.load %arg0[%c0, %c0_0] : memref<16x128xf32, #tpu.memory_space<vmem>>, vector<16x128xf32>
    %c0_1 = arith.constant 0 : index
    %c0_2 = arith.constant 0 : index
    %1 = vector.load %arg1[%c0_1, %c0_2] : memref<16x128xf32, #tpu.memory_space<vmem>>, vector<16x128xf32>
    %2 = arith.addf %0, %1 : vector<16x128xf32>
    %c0_3 = arith.constant 0 : index
    %c0_4 = arith.constant 0 : index
    %3 = vector.load %arg2[%c0_3, %c0_4] : memref<1x128xf32, #tpu.memory_space<vmem>>, vector<1x128xf32>
    %4 = vector.broadcast %3 : vector<1x128xf32> to vector<16x128xf32>
    %5 = arith.addf %2, %4 : vector<16x128xf32>
    %c0_5 = arith.constant 0 : index
    %c0_6 = arith.constant 0 : index
    %6 = vector.load %arg4[%c0_5, %c0_6] : memref<1x128xf32, #tpu.memory_space<vmem>>, vector<1x128xf32>
    %c0_7 = arith.constant 0 : index
    %c0_8 = arith.constant 0 : index
    %7 = vector.load %arg5[%c0_7, %c0_8] : memref<1x128xf32, #tpu.memory_space<vmem>>, vector<1x128xf32>
    %cst = arith.constant dense<0.000000e+00> : vector<16xf32>
    %8 = vector.multi_reduction <add>, %5, %cst [1] : vector<16x128xf32> to vector<16xf32>
    %9 = vector.shape_cast %8 : vector<16xf32> to vector<16x1xf32>
    %cst_9 = arith.constant 1.280000e+02 : f32
    %10 = vector.broadcast %cst_9 : f32 to vector<16x1xf32>
    %11 = arith.divf %9, %10 : vector<16x1xf32>
    %12 = vector.broadcast %11 : vector<16x1xf32> to vector<16x128xf32>
    %13 = arith.subf %5, %12 : vector<16x128xf32>
    %14 = arith.mulf %13, %13 : vector<16x128xf32>
    %cst_10 = arith.constant dense<0.000000e+00> : vector<16xf32>
    %15 = vector.multi_reduction <add>, %14, %cst_10 [1] : vector<16x128xf32> to vector<16xf32>
    %16 = vector.shape_cast %15 : vector<16xf32> to vector<16x1xf32>
    %cst_11 = arith.constant 1.280000e+02 : f32
    %17 = vector.broadcast %cst_11 : f32 to vector<16x1xf32>
    %18 = arith.divf %16, %17 : vector<16x1xf32>
    %19 = vector.broadcast %11 : vector<16x1xf32> to vector<16x128xf32>
    %20 = arith.subf %5, %19 : vector<16x128xf32>
    %cst_12 = arith.constant 9.99999996E-13 : f32
    %21 = vector.broadcast %cst_12 : f32 to vector<16x1xf32>
    %22 = arith.addf %18, %21 : vector<16x1xf32>
    %23 = math.rsqrt %22 : vector<16x1xf32>
    %24 = vector.broadcast %23 : vector<16x1xf32> to vector<16x128xf32>
    %25 = arith.mulf %20, %24 : vector<16x128xf32>
    %26 = vector.broadcast %6 : vector<1x128xf32> to vector<16x128xf32>
    %27 = arith.mulf %25, %26 : vector<16x128xf32>
    %28 = vector.broadcast %7 : vector<1x128xf32> to vector<16x128xf32>
    %29 = arith.addf %27, %28 : vector<16x128xf32>
    %c0_13 = arith.constant 0 : index
    %c0_14 = arith.constant 0 : index
    %30 = vector.load %arg3[%c0_13, %c0_14] : memref<16x16xf32, #tpu.memory_space<vmem>>, vector<16x16xf32>
    %c0_i32 = arith.constant 0 : i32
    %31 = arith.truncf %29 : vector<16x128xf32> to vector<16x128xbf16>
    %32 = arith.index_cast %c0_i32 : i32 to index
    %c0_15 = arith.constant 0 : index
    %c0_16 = arith.constant 0 : index
    %33 = vector.load %arg6[%32, %c0_15, %c0_16] : memref<2x128x384xbf16, #tpu.memory_space<vmem>>, vector<1x128x384xbf16>
    %34 = vector.shape_cast %33 : vector<1x128x384xbf16> to vector<128x384xbf16>
    %cst_17 = arith.constant dense<0.000000e+00> : vector<16x384xf32>
    %35 = tpu.matmul %31, %34, %cst_17 {dimension_numbers = #tpu.dot_dimension_numbers<[1], [0], [0], [1], [0, 0, 1, 1], [], []>} : vector<16x128xbf16>, vector<128x384xbf16>, vector<16x384xf32> -> vector<16x384xf32>
    %36 = arith.index_cast %c0_i32 : i32 to index
    %c0_18 = arith.constant 0 : index
    %c0_19 = arith.constant 0 : index
    %37 = vector.load %arg7[%36, %c0_18, %c0_19] : memref<2x1x384xf32, #tpu.memory_space<vmem>>, vector<1x1x384xf32>
    %38 = vector.shape_cast %37 : vector<1x1x384xf32> to vector<1x384xf32>
    %39 = vector.broadcast %38 : vector<1x384xf32> to vector<16x384xf32>
    %40 = arith.addf %35, %39 : vector<16x384xf32>
    %41 = arith.truncf %40 : vector<16x384xf32> to vector<16x384xbf16>
    %42 = vector.extract_strided_slice %41 {offsets = [0, 0], sizes = [16, 32], strides = [1, 1]} : vector<16x384xbf16> to vector<16x32xbf16>
    %43 = vector.extract_strided_slice %41 {offsets = [0, 128], sizes = [16, 32], strides = [1, 1]} : vector<16x384xbf16> to vector<16x32xbf16>
    %44 = vector.extract_strided_slice %41 {offsets = [0, 256], sizes = [16, 32], strides = [1, 1]} : vector<16x384xbf16> to vector<16x32xbf16>
    %cst_20 = arith.constant dense<0.000000e+00> : vector<16x16xf32>
    %45 = tpu.matmul %42, %43, %cst_20 {dimension_numbers = #tpu.dot_dimension_numbers<[1], [1], [0], [0], [0, 0, 1, 0], [], []>} : vector<16x32xbf16>, vector<16x32xbf16>, vector<16x16xf32> -> vector<16x16xf32>
    %cst_21 = arith.constant 0.176776692 : f32
    %46 = vector.broadcast %cst_21 : f32 to vector<16x16xf32>
    %47 = arith.mulf %45, %46 : vector<16x16xf32>
    %48 = arith.addf %47, %30 : vector<16x16xf32>
    %cst_22 = arith.constant dense<0xFF800000> : vector<16xf32>
    %49 = vector.multi_reduction <maximumf>, %48, %cst_22 [1] : vector<16x16xf32> to vector<16xf32>
    %50 = vector.shape_cast %49 : vector<16xf32> to vector<16x1xf32>
    %51 = vector.broadcast %50 : vector<16x1xf32> to vector<16x16xf32>
    %52 = arith.subf %48, %51 : vector<16x16xf32>
    %53 = math.exp %52 : vector<16x16xf32>
    %cst_23 = arith.constant dense<0.000000e+00> : vector<16xf32>
    %54 = vector.multi_reduction <add>, %53, %cst_23 [1] : vector<16x16xf32> to vector<16xf32>
    %55 = vector.shape_cast %54 : vector<16xf32> to vector<16x1xf32>
    %56 = tpu.reciprocal %55 {approx = true} : vector<16x1xf32> -> vector<16x1xf32>
    %57 = vector.broadcast %56 : vector<16x1xf32> to vector<16x16xf32>
    %58 = arith.mulf %53, %57 : vector<16x16xf32>
    %59 = arith.truncf %58 : vector<16x16xf32> to vector<16x16xbf16>
    %cst_24 = arith.constant dense<0.000000e+00> : vector<16x32xf32>
    %60 = tpu.matmul %59, %44, %cst_24 {dimension_numbers = #tpu.dot_dimension_numbers<[1], [0], [0], [1], [0, 0, 1, 1], [], []>} : vector<16x16xbf16>, vector<16x32xbf16>, vector<16x32xf32> -> vector<16x32xf32>
    %61 = vector.extract_strided_slice %41 {offsets = [0, 32], sizes = [16, 32], strides = [1, 1]} : vector<16x384xbf16> to vector<16x32xbf16>
    %62 = vector.extract_strided_slice %41 {offsets = [0, 160], sizes = [16, 32], strides = [1, 1]} : vector<16x384xbf16> to vector<16x32xbf16>
    %63 = vector.extract_strided_slice %41 {offsets = [0, 288], sizes = [16, 32], strides = [1, 1]} : vector<16x384xbf16> to vector<16x32xbf16>
    %cst_25 = arith.constant dense<0.000000e+00> : vector<16x16xf32>
    %64 = tpu.matmul %61, %62, %cst_25 {dimension_numbers = #tpu.dot_dimension_numbers<[1], [1], [0], [0], [0, 0, 1, 0], [], []>} : vector<16x32xbf16>, vector<16x32xbf16>, vector<16x16xf32> -> vector<16x16xf32>
    %cst_26 = arith.constant 0.176776692 : f32
    %65 = vector.broadcast %cst_26 : f32 to vector<16x16xf32>
    %66 = arith.mulf %64, %65 : vector<16x16xf32>
    %67 = arith.addf %66, %30 : vector<16x16xf32>
    %cst_27 = arith.constant dense<0xFF800000> : vector<16xf32>
    %68 = vector.multi_reduction <maximumf>, %67, %cst_27 [1] : vector<16x16xf32> to vector<16xf32>
    %69 = vector.shape_cast %68 : vector<16xf32> to vector<16x1xf32>
    %70 = vector.broadcast %69 : vector<16x1xf32> to vector<16x16xf32>
    %71 = arith.subf %67, %70 : vector<16x16xf32>
    %72 = math.exp %71 : vector<16x16xf32>
    %cst_28 = arith.constant dense<0.000000e+00> : vector<16xf32>
    %73 = vector.multi_reduction <add>, %72, %cst_28 [1] : vector<16x16xf32> to vector<16xf32>
    %74 = vector.shape_cast %73 : vector<16xf32> to vector<16x1xf32>
    %75 = tpu.reciprocal %74 {approx = true} : vector<16x1xf32> -> vector<16x1xf32>
    %76 = vector.broadcast %75 : vector<16x1xf32> to vector<16x16xf32>
    %77 = arith.mulf %72, %76 : vector<16x16xf32>
    %78 = arith.truncf %77 : vector<16x16xf32> to vector<16x16xbf16>
    %cst_29 = arith.constant dense<0.000000e+00> : vector<16x32xf32>
    %79 = tpu.matmul %78, %63, %cst_29 {dimension_numbers = #tpu.dot_dimension_numbers<[1], [0], [0], [1], [0, 0, 1, 1], [], []>} : vector<16x16xbf16>, vector<16x32xbf16>, vector<16x32xf32> -> vector<16x32xf32>
    %80 = vector.extract_strided_slice %41 {offsets = [0, 64], sizes = [16, 32], strides = [1, 1]} : vector<16x384xbf16> to vector<16x32xbf16>
    %81 = vector.extract_strided_slice %41 {offsets = [0, 192], sizes = [16, 32], strides = [1, 1]} : vector<16x384xbf16> to vector<16x32xbf16>
    %82 = vector.extract_strided_slice %41 {offsets = [0, 320], sizes = [16, 32], strides = [1, 1]} : vector<16x384xbf16> to vector<16x32xbf16>
    %cst_30 = arith.constant dense<0.000000e+00> : vector<16x16xf32>
    %83 = tpu.matmul %80, %81, %cst_30 {dimension_numbers = #tpu.dot_dimension_numbers<[1], [1], [0], [0], [0, 0, 1, 0], [], []>} : vector<16x32xbf16>, vector<16x32xbf16>, vector<16x16xf32> -> vector<16x16xf32>
    %cst_31 = arith.constant 0.176776692 : f32
    %84 = vector.broadcast %cst_31 : f32 to vector<16x16xf32>
    %85 = arith.mulf %83, %84 : vector<16x16xf32>
    %86 = arith.addf %85, %30 : vector<16x16xf32>
    %cst_32 = arith.constant dense<0xFF800000> : vector<16xf32>
    %87 = vector.multi_reduction <maximumf>, %86, %cst_32 [1] : vector<16x16xf32> to vector<16xf32>
    %88 = vector.shape_cast %87 : vector<16xf32> to vector<16x1xf32>
    %89 = vector.broadcast %88 : vector<16x1xf32> to vector<16x16xf32>
    %90 = arith.subf %86, %89 : vector<16x16xf32>
    %91 = math.exp %90 : vector<16x16xf32>
    %cst_33 = arith.constant dense<0.000000e+00> : vector<16xf32>
    %92 = vector.multi_reduction <add>, %91, %cst_33 [1] : vector<16x16xf32> to vector<16xf32>
    %93 = vector.shape_cast %92 : vector<16xf32> to vector<16x1xf32>
    %94 = tpu.reciprocal %93 {approx = true} : vector<16x1xf32> -> vector<16x1xf32>
    %95 = vector.broadcast %94 : vector<16x1xf32> to vector<16x16xf32>
    %96 = arith.mulf %91, %95 : vector<16x16xf32>
    %97 = arith.truncf %96 : vector<16x16xf32> to vector<16x16xbf16>
    %cst_34 = arith.constant dense<0.000000e+00> : vector<16x32xf32>
    %98 = tpu.matmul %97, %82, %cst_34 {dimension_numbers = #tpu.dot_dimension_numbers<[1], [0], [0], [1], [0, 0, 1, 1], [], []>} : vector<16x16xbf16>, vector<16x32xbf16>, vector<16x32xf32> -> vector<16x32xf32>
    %99 = vector.extract_strided_slice %41 {offsets = [0, 96], sizes = [16, 32], strides = [1, 1]} : vector<16x384xbf16> to vector<16x32xbf16>
    %100 = vector.extract_strided_slice %41 {offsets = [0, 224], sizes = [16, 32], strides = [1, 1]} : vector<16x384xbf16> to vector<16x32xbf16>
    %101 = vector.extract_strided_slice %41 {offsets = [0, 352], sizes = [16, 32], strides = [1, 1]} : vector<16x384xbf16> to vector<16x32xbf16>
    %cst_35 = arith.constant dense<0.000000e+00> : vector<16x16xf32>
    %102 = tpu.matmul %99, %100, %cst_35 {dimension_numbers = #tpu.dot_dimension_numbers<[1], [1], [0], [0], [0, 0, 1, 0], [], []>} : vector<16x32xbf16>, vector<16x32xbf16>, vector<16x16xf32> -> vector<16x16xf32>
    %cst_36 = arith.constant 0.176776692 : f32
    %103 = vector.broadcast %cst_36 : f32 to vector<16x16xf32>
    %104 = arith.mulf %102, %103 : vector<16x16xf32>
    %105 = arith.addf %104, %30 : vector<16x16xf32>
    %cst_37 = arith.constant dense<0xFF800000> : vector<16xf32>
    %106 = vector.multi_reduction <maximumf>, %105, %cst_37 [1] : vector<16x16xf32> to vector<16xf32>
    %107 = vector.shape_cast %106 : vector<16xf32> to vector<16x1xf32>
    %108 = vector.broadcast %107 : vector<16x1xf32> to vector<16x16xf32>
    %109 = arith.subf %105, %108 : vector<16x16xf32>
    %110 = math.exp %109 : vector<16x16xf32>
    %cst_38 = arith.constant dense<0.000000e+00> : vector<16xf32>
    %111 = vector.multi_reduction <add>, %110, %cst_38 [1] : vector<16x16xf32> to vector<16xf32>
    %112 = vector.shape_cast %111 : vector<16xf32> to vector<16x1xf32>
    %113 = tpu.reciprocal %112 {approx = true} : vector<16x1xf32> -> vector<16x1xf32>
    %114 = vector.broadcast %113 : vector<16x1xf32> to vector<16x16xf32>
    %115 = arith.mulf %110, %114 : vector<16x16xf32>
    %116 = arith.truncf %115 : vector<16x16xf32> to vector<16x16xbf16>
    %cst_39 = arith.constant dense<0.000000e+00> : vector<16x32xf32>
    %117 = tpu.matmul %116, %101, %cst_39 {dimension_numbers = #tpu.dot_dimension_numbers<[1], [0], [0], [1], [0, 0, 1, 1], [], []>} : vector<16x16xbf16>, vector<16x32xbf16>, vector<16x32xf32> -> vector<16x32xf32>
    %118 = tpu.concatenate %60, %79, %98, %117 in 1 : vector<16x32xf32>, vector<16x32xf32>, vector<16x32xf32>, vector<16x32xf32> -> vector<16x128xf32>
    %119 = arith.truncf %118 : vector<16x128xf32> to vector<16x128xbf16>
    %120 = arith.index_cast %c0_i32 : i32 to index
    %c0_40 = arith.constant 0 : index
    %c0_41 = arith.constant 0 : index
    %121 = vector.load %arg8[%120, %c0_40, %c0_41] : memref<2x128x128xbf16, #tpu.memory_space<vmem>>, vector<1x128x128xbf16>
    %122 = vector.shape_cast %121 : vector<1x128x128xbf16> to vector<128x128xbf16>
    %cst_42 = arith.constant dense<0.000000e+00> : vector<16x128xf32>
    %123 = tpu.matmul %119, %122, %cst_42 {dimension_numbers = #tpu.dot_dimension_numbers<[1], [0], [0], [1], [0, 0, 1, 1], [], []>} : vector<16x128xbf16>, vector<128x128xbf16>, vector<16x128xf32> -> vector<16x128xf32>
    %124 = arith.index_cast %c0_i32 : i32 to index
    %c0_43 = arith.constant 0 : index
    %c0_44 = arith.constant 0 : index
    %125 = vector.load %arg9[%124, %c0_43, %c0_44] : memref<2x1x128xf32, #tpu.memory_space<vmem>>, vector<1x1x128xf32>
    %126 = vector.shape_cast %125 : vector<1x1x128xf32> to vector<1x128xf32>
    %127 = vector.broadcast %126 : vector<1x128xf32> to vector<16x128xf32>
    %128 = arith.addf %123, %127 : vector<16x128xf32>
    %129 = arith.addf %29, %128 : vector<16x128xf32>
    %130 = arith.index_cast %c0_i32 : i32 to index
    %c0_45 = arith.constant 0 : index
    %c0_46 = arith.constant 0 : index
    %131 = vector.load %arg10[%130, %c0_45, %c0_46] : memref<2x1x128xf32, #tpu.memory_space<vmem>>, vector<1x1x128xf32>
    %132 = vector.shape_cast %131 : vector<1x1x128xf32> to vector<1x128xf32>
    %133 = arith.index_cast %c0_i32 : i32 to index
    %c0_47 = arith.constant 0 : index
    %c0_48 = arith.constant 0 : index
    %134 = vector.load %arg11[%133, %c0_47, %c0_48] : memref<2x1x128xf32, #tpu.memory_space<vmem>>, vector<1x1x128xf32>
    %135 = vector.shape_cast %134 : vector<1x1x128xf32> to vector<1x128xf32>
    %cst_49 = arith.constant dense<0.000000e+00> : vector<16xf32>
    %136 = vector.multi_reduction <add>, %129, %cst_49 [1] : vector<16x128xf32> to vector<16xf32>
    %137 = vector.shape_cast %136 : vector<16xf32> to vector<16x1xf32>
    %cst_50 = arith.constant 1.280000e+02 : f32
    %138 = vector.broadcast %cst_50 : f32 to vector<16x1xf32>
    %139 = arith.divf %137, %138 : vector<16x1xf32>
    %140 = vector.broadcast %139 : vector<16x1xf32> to vector<16x128xf32>
    %141 = arith.subf %129, %140 : vector<16x128xf32>
    %142 = arith.mulf %141, %141 : vector<16x128xf32>
    %cst_51 = arith.constant dense<0.000000e+00> : vector<16xf32>
    %143 = vector.multi_reduction <add>, %142, %cst_51 [1] : vector<16x128xf32> to vector<16xf32>
    %144 = vector.shape_cast %143 : vector<16xf32> to vector<16x1xf32>
    %cst_52 = arith.constant 1.280000e+02 : f32
    %145 = vector.broadcast %cst_52 : f32 to vector<16x1xf32>
    %146 = arith.divf %144, %145 : vector<16x1xf32>
    %147 = vector.broadcast %139 : vector<16x1xf32> to vector<16x128xf32>
    %148 = arith.subf %129, %147 : vector<16x128xf32>
    %cst_53 = arith.constant 9.99999996E-13 : f32
    %149 = vector.broadcast %cst_53 : f32 to vector<16x1xf32>
    %150 = arith.addf %146, %149 : vector<16x1xf32>
    %151 = math.rsqrt %150 : vector<16x1xf32>
    %152 = vector.broadcast %151 : vector<16x1xf32> to vector<16x128xf32>
    %153 = arith.mulf %148, %152 : vector<16x128xf32>
    %154 = vector.broadcast %132 : vector<1x128xf32> to vector<16x128xf32>
    %155 = arith.mulf %153, %154 : vector<16x128xf32>
    %156 = vector.broadcast %135 : vector<1x128xf32> to vector<16x128xf32>
    %157 = arith.addf %155, %156 : vector<16x128xf32>
    %158 = arith.truncf %157 : vector<16x128xf32> to vector<16x128xbf16>
    %159 = arith.index_cast %c0_i32 : i32 to index
    %c0_54 = arith.constant 0 : index
    %c0_55 = arith.constant 0 : index
    %160 = vector.load %arg12[%159, %c0_54, %c0_55] : memref<2x128x256xbf16, #tpu.memory_space<vmem>>, vector<1x128x256xbf16>
    %161 = vector.shape_cast %160 : vector<1x128x256xbf16> to vector<128x256xbf16>
    %cst_56 = arith.constant dense<0.000000e+00> : vector<16x256xf32>
    %162 = tpu.matmul %158, %161, %cst_56 {dimension_numbers = #tpu.dot_dimension_numbers<[1], [0], [0], [1], [0, 0, 1, 1], [], []>} : vector<16x128xbf16>, vector<128x256xbf16>, vector<16x256xf32> -> vector<16x256xf32>
    %163 = arith.index_cast %c0_i32 : i32 to index
    %c0_57 = arith.constant 0 : index
    %c0_58 = arith.constant 0 : index
    %164 = vector.load %arg13[%163, %c0_57, %c0_58] : memref<2x1x256xf32, #tpu.memory_space<vmem>>, vector<1x1x256xf32>
    %165 = vector.shape_cast %164 : vector<1x1x256xf32> to vector<1x256xf32>
    %166 = vector.broadcast %165 : vector<1x256xf32> to vector<16x256xf32>
    %167 = arith.addf %162, %166 : vector<16x256xf32>
    %168 = arith.mulf %167, %167 : vector<16x256xf32>
    %169 = arith.mulf %167, %168 : vector<16x256xf32>
    %cst_59 = arith.constant 4.471500e-02 : f32
    %170 = vector.broadcast %cst_59 : f32 to vector<16x256xf32>
    %171 = arith.mulf %170, %169 : vector<16x256xf32>
    %172 = arith.addf %167, %171 : vector<16x256xf32>
    %cst_60 = arith.constant 0.797884583 : f32
    %173 = vector.broadcast %cst_60 : f32 to vector<16x256xf32>
    %174 = arith.mulf %173, %172 : vector<16x256xf32>
    %175 = math.tanh %174 : vector<16x256xf32>
    %cst_61 = arith.constant 1.000000e+00 : f32
    %176 = vector.broadcast %cst_61 : f32 to vector<16x256xf32>
    %177 = arith.addf %176, %175 : vector<16x256xf32>
    %cst_62 = arith.constant 5.000000e-01 : f32
    %178 = vector.broadcast %cst_62 : f32 to vector<16x256xf32>
    %179 = arith.mulf %178, %177 : vector<16x256xf32>
    %180 = arith.mulf %167, %179 : vector<16x256xf32>
    %181 = arith.truncf %180 : vector<16x256xf32> to vector<16x256xbf16>
    %182 = arith.index_cast %c0_i32 : i32 to index
    %c0_63 = arith.constant 0 : index
    %c0_64 = arith.constant 0 : index
    %183 = vector.load %arg14[%182, %c0_63, %c0_64] : memref<2x256x128xbf16, #tpu.memory_space<vmem>>, vector<1x256x128xbf16>
    %184 = vector.shape_cast %183 : vector<1x256x128xbf16> to vector<256x128xbf16>
    %cst_65 = arith.constant dense<0.000000e+00> : vector<16x128xf32>
    %185 = tpu.matmul %181, %184, %cst_65 {dimension_numbers = #tpu.dot_dimension_numbers<[1], [0], [0], [1], [0, 0, 1, 1], [], []>} : vector<16x256xbf16>, vector<256x128xbf16>, vector<16x128xf32> -> vector<16x128xf32>
    %186 = arith.index_cast %c0_i32 : i32 to index
    %c0_66 = arith.constant 0 : index
    %c0_67 = arith.constant 0 : index
    %187 = vector.load %arg15[%186, %c0_66, %c0_67] : memref<2x1x128xf32, #tpu.memory_space<vmem>>, vector<1x1x128xf32>
    %188 = vector.shape_cast %187 : vector<1x1x128xf32> to vector<1x128xf32>
    %189 = vector.broadcast %188 : vector<1x128xf32> to vector<16x128xf32>
    %190 = arith.addf %185, %189 : vector<16x128xf32>
    %191 = arith.addf %157, %190 : vector<16x128xf32>
    %192 = arith.index_cast %c0_i32 : i32 to index
    %c0_68 = arith.constant 0 : index
    %c0_69 = arith.constant 0 : index
    %193 = vector.load %arg16[%192, %c0_68, %c0_69] : memref<2x1x128xf32, #tpu.memory_space<vmem>>, vector<1x1x128xf32>
    %194 = vector.shape_cast %193 : vector<1x1x128xf32> to vector<1x128xf32>
    %195 = arith.index_cast %c0_i32 : i32 to index
    %c0_70 = arith.constant 0 : index
    %c0_71 = arith.constant 0 : index
    %196 = vector.load %arg17[%195, %c0_70, %c0_71] : memref<2x1x128xf32, #tpu.memory_space<vmem>>, vector<1x1x128xf32>
    %197 = vector.shape_cast %196 : vector<1x1x128xf32> to vector<1x128xf32>
    %cst_72 = arith.constant dense<0.000000e+00> : vector<16xf32>
    %198 = vector.multi_reduction <add>, %191, %cst_72 [1] : vector<16x128xf32> to vector<16xf32>
    %199 = vector.shape_cast %198 : vector<16xf32> to vector<16x1xf32>
    %cst_73 = arith.constant 1.280000e+02 : f32
    %200 = vector.broadcast %cst_73 : f32 to vector<16x1xf32>
    %201 = arith.divf %199, %200 : vector<16x1xf32>
    %202 = vector.broadcast %201 : vector<16x1xf32> to vector<16x128xf32>
    %203 = arith.subf %191, %202 : vector<16x128xf32>
    %204 = arith.mulf %203, %203 : vector<16x128xf32>
    %cst_74 = arith.constant dense<0.000000e+00> : vector<16xf32>
    %205 = vector.multi_reduction <add>, %204, %cst_74 [1] : vector<16x128xf32> to vector<16xf32>
    %206 = vector.shape_cast %205 : vector<16xf32> to vector<16x1xf32>
    %cst_75 = arith.constant 1.280000e+02 : f32
    %207 = vector.broadcast %cst_75 : f32 to vector<16x1xf32>
    %208 = arith.divf %206, %207 : vector<16x1xf32>
    %209 = vector.broadcast %201 : vector<16x1xf32> to vector<16x128xf32>
    %210 = arith.subf %191, %209 : vector<16x128xf32>
    %cst_76 = arith.constant 9.99999996E-13 : f32
    %211 = vector.broadcast %cst_76 : f32 to vector<16x1xf32>
    %212 = arith.addf %208, %211 : vector<16x1xf32>
    %213 = math.rsqrt %212 : vector<16x1xf32>
    %214 = vector.broadcast %213 : vector<16x1xf32> to vector<16x128xf32>
    %215 = arith.mulf %210, %214 : vector<16x128xf32>
    %216 = vector.broadcast %194 : vector<1x128xf32> to vector<16x128xf32>
    %217 = arith.mulf %215, %216 : vector<16x128xf32>
    %218 = vector.broadcast %197 : vector<1x128xf32> to vector<16x128xf32>
    %219 = arith.addf %217, %218 : vector<16x128xf32>
    %c1_i32 = arith.constant 1 : i32
    %220 = arith.truncf %219 : vector<16x128xf32> to vector<16x128xbf16>
    %221 = arith.index_cast %c1_i32 : i32 to index
    %c0_77 = arith.constant 0 : index
    %c0_78 = arith.constant 0 : index
    %222 = vector.load %arg6[%221, %c0_77, %c0_78] : memref<2x128x384xbf16, #tpu.memory_space<vmem>>, vector<1x128x384xbf16>
    %223 = vector.shape_cast %222 : vector<1x128x384xbf16> to vector<128x384xbf16>
    %cst_79 = arith.constant dense<0.000000e+00> : vector<16x384xf32>
    %224 = tpu.matmul %220, %223, %cst_79 {dimension_numbers = #tpu.dot_dimension_numbers<[1], [0], [0], [1], [0, 0, 1, 1], [], []>} : vector<16x128xbf16>, vector<128x384xbf16>, vector<16x384xf32> -> vector<16x384xf32>
    %225 = arith.index_cast %c1_i32 : i32 to index
    %c0_80 = arith.constant 0 : index
    %c0_81 = arith.constant 0 : index
    %226 = vector.load %arg7[%225, %c0_80, %c0_81] : memref<2x1x384xf32, #tpu.memory_space<vmem>>, vector<1x1x384xf32>
    %227 = vector.shape_cast %226 : vector<1x1x384xf32> to vector<1x384xf32>
    %228 = vector.broadcast %227 : vector<1x384xf32> to vector<16x384xf32>
    %229 = arith.addf %224, %228 : vector<16x384xf32>
    %230 = arith.truncf %229 : vector<16x384xf32> to vector<16x384xbf16>
    %231 = vector.extract_strided_slice %230 {offsets = [0, 0], sizes = [16, 32], strides = [1, 1]} : vector<16x384xbf16> to vector<16x32xbf16>
    %232 = vector.extract_strided_slice %230 {offsets = [0, 128], sizes = [16, 32], strides = [1, 1]} : vector<16x384xbf16> to vector<16x32xbf16>
    %233 = vector.extract_strided_slice %230 {offsets = [0, 256], sizes = [16, 32], strides = [1, 1]} : vector<16x384xbf16> to vector<16x32xbf16>
    %cst_82 = arith.constant dense<0.000000e+00> : vector<16x16xf32>
    %234 = tpu.matmul %231, %232, %cst_82 {dimension_numbers = #tpu.dot_dimension_numbers<[1], [1], [0], [0], [0, 0, 1, 0], [], []>} : vector<16x32xbf16>, vector<16x32xbf16>, vector<16x16xf32> -> vector<16x16xf32>
    %cst_83 = arith.constant 0.176776692 : f32
    %235 = vector.broadcast %cst_83 : f32 to vector<16x16xf32>
    %236 = arith.mulf %234, %235 : vector<16x16xf32>
    %237 = arith.addf %236, %30 : vector<16x16xf32>
    %cst_84 = arith.constant dense<0xFF800000> : vector<16xf32>
    %238 = vector.multi_reduction <maximumf>, %237, %cst_84 [1] : vector<16x16xf32> to vector<16xf32>
    %239 = vector.shape_cast %238 : vector<16xf32> to vector<16x1xf32>
    %240 = vector.broadcast %239 : vector<16x1xf32> to vector<16x16xf32>
    %241 = arith.subf %237, %240 : vector<16x16xf32>
    %242 = math.exp %241 : vector<16x16xf32>
    %cst_85 = arith.constant dense<0.000000e+00> : vector<16xf32>
    %243 = vector.multi_reduction <add>, %242, %cst_85 [1] : vector<16x16xf32> to vector<16xf32>
    %244 = vector.shape_cast %243 : vector<16xf32> to vector<16x1xf32>
    %245 = tpu.reciprocal %244 {approx = true} : vector<16x1xf32> -> vector<16x1xf32>
    %246 = vector.broadcast %245 : vector<16x1xf32> to vector<16x16xf32>
    %247 = arith.mulf %242, %246 : vector<16x16xf32>
    %248 = arith.truncf %247 : vector<16x16xf32> to vector<16x16xbf16>
    %cst_86 = arith.constant dense<0.000000e+00> : vector<16x32xf32>
    %249 = tpu.matmul %248, %233, %cst_86 {dimension_numbers = #tpu.dot_dimension_numbers<[1], [0], [0], [1], [0, 0, 1, 1], [], []>} : vector<16x16xbf16>, vector<16x32xbf16>, vector<16x32xf32> -> vector<16x32xf32>
    %250 = vector.extract_strided_slice %230 {offsets = [0, 32], sizes = [16, 32], strides = [1, 1]} : vector<16x384xbf16> to vector<16x32xbf16>
    %251 = vector.extract_strided_slice %230 {offsets = [0, 160], sizes = [16, 32], strides = [1, 1]} : vector<16x384xbf16> to vector<16x32xbf16>
    %252 = vector.extract_strided_slice %230 {offsets = [0, 288], sizes = [16, 32], strides = [1, 1]} : vector<16x384xbf16> to vector<16x32xbf16>
    %cst_87 = arith.constant dense<0.000000e+00> : vector<16x16xf32>
    %253 = tpu.matmul %250, %251, %cst_87 {dimension_numbers = #tpu.dot_dimension_numbers<[1], [1], [0], [0], [0, 0, 1, 0], [], []>} : vector<16x32xbf16>, vector<16x32xbf16>, vector<16x16xf32> -> vector<16x16xf32>
    %cst_88 = arith.constant 0.176776692 : f32
    %254 = vector.broadcast %cst_88 : f32 to vector<16x16xf32>
    %255 = arith.mulf %253, %254 : vector<16x16xf32>
    %256 = arith.addf %255, %30 : vector<16x16xf32>
    %cst_89 = arith.constant dense<0xFF800000> : vector<16xf32>
    %257 = vector.multi_reduction <maximumf>, %256, %cst_89 [1] : vector<16x16xf32> to vector<16xf32>
    %258 = vector.shape_cast %257 : vector<16xf32> to vector<16x1xf32>
    %259 = vector.broadcast %258 : vector<16x1xf32> to vector<16x16xf32>
    %260 = arith.subf %256, %259 : vector<16x16xf32>
    %261 = math.exp %260 : vector<16x16xf32>
    %cst_90 = arith.constant dense<0.000000e+00> : vector<16xf32>
    %262 = vector.multi_reduction <add>, %261, %cst_90 [1] : vector<16x16xf32> to vector<16xf32>
    %263 = vector.shape_cast %262 : vector<16xf32> to vector<16x1xf32>
    %264 = tpu.reciprocal %263 {approx = true} : vector<16x1xf32> -> vector<16x1xf32>
    %265 = vector.broadcast %264 : vector<16x1xf32> to vector<16x16xf32>
    %266 = arith.mulf %261, %265 : vector<16x16xf32>
    %267 = arith.truncf %266 : vector<16x16xf32> to vector<16x16xbf16>
    %cst_91 = arith.constant dense<0.000000e+00> : vector<16x32xf32>
    %268 = tpu.matmul %267, %252, %cst_91 {dimension_numbers = #tpu.dot_dimension_numbers<[1], [0], [0], [1], [0, 0, 1, 1], [], []>} : vector<16x16xbf16>, vector<16x32xbf16>, vector<16x32xf32> -> vector<16x32xf32>
    %269 = vector.extract_strided_slice %230 {offsets = [0, 64], sizes = [16, 32], strides = [1, 1]} : vector<16x384xbf16> to vector<16x32xbf16>
    %270 = vector.extract_strided_slice %230 {offsets = [0, 192], sizes = [16, 32], strides = [1, 1]} : vector<16x384xbf16> to vector<16x32xbf16>
    %271 = vector.extract_strided_slice %230 {offsets = [0, 320], sizes = [16, 32], strides = [1, 1]} : vector<16x384xbf16> to vector<16x32xbf16>
    %cst_92 = arith.constant dense<0.000000e+00> : vector<16x16xf32>
    %272 = tpu.matmul %269, %270, %cst_92 {dimension_numbers = #tpu.dot_dimension_numbers<[1], [1], [0], [0], [0, 0, 1, 0], [], []>} : vector<16x32xbf16>, vector<16x32xbf16>, vector<16x16xf32> -> vector<16x16xf32>
    %cst_93 = arith.constant 0.176776692 : f32
    %273 = vector.broadcast %cst_93 : f32 to vector<16x16xf32>
    %274 = arith.mulf %272, %273 : vector<16x16xf32>
    %275 = arith.addf %274, %30 : vector<16x16xf32>
    %cst_94 = arith.constant dense<0xFF800000> : vector<16xf32>
    %276 = vector.multi_reduction <maximumf>, %275, %cst_94 [1] : vector<16x16xf32> to vector<16xf32>
    %277 = vector.shape_cast %276 : vector<16xf32> to vector<16x1xf32>
    %278 = vector.broadcast %277 : vector<16x1xf32> to vector<16x16xf32>
    %279 = arith.subf %275, %278 : vector<16x16xf32>
    %280 = math.exp %279 : vector<16x16xf32>
    %cst_95 = arith.constant dense<0.000000e+00> : vector<16xf32>
    %281 = vector.multi_reduction <add>, %280, %cst_95 [1] : vector<16x16xf32> to vector<16xf32>
    %282 = vector.shape_cast %281 : vector<16xf32> to vector<16x1xf32>
    %283 = tpu.reciprocal %282 {approx = true} : vector<16x1xf32> -> vector<16x1xf32>
    %284 = vector.broadcast %283 : vector<16x1xf32> to vector<16x16xf32>
    %285 = arith.mulf %280, %284 : vector<16x16xf32>
    %286 = arith.truncf %285 : vector<16x16xf32> to vector<16x16xbf16>
    %cst_96 = arith.constant dense<0.000000e+00> : vector<16x32xf32>
    %287 = tpu.matmul %286, %271, %cst_96 {dimension_numbers = #tpu.dot_dimension_numbers<[1], [0], [0], [1], [0, 0, 1, 1], [], []>} : vector<16x16xbf16>, vector<16x32xbf16>, vector<16x32xf32> -> vector<16x32xf32>
    %288 = vector.extract_strided_slice %230 {offsets = [0, 96], sizes = [16, 32], strides = [1, 1]} : vector<16x384xbf16> to vector<16x32xbf16>
    %289 = vector.extract_strided_slice %230 {offsets = [0, 224], sizes = [16, 32], strides = [1, 1]} : vector<16x384xbf16> to vector<16x32xbf16>
    %290 = vector.extract_strided_slice %230 {offsets = [0, 352], sizes = [16, 32], strides = [1, 1]} : vector<16x384xbf16> to vector<16x32xbf16>
    %cst_97 = arith.constant dense<0.000000e+00> : vector<16x16xf32>
    %291 = tpu.matmul %288, %289, %cst_97 {dimension_numbers = #tpu.dot_dimension_numbers<[1], [1], [0], [0], [0, 0, 1, 0], [], []>} : vector<16x32xbf16>, vector<16x32xbf16>, vector<16x16xf32> -> vector<16x16xf32>
    %cst_98 = arith.constant 0.176776692 : f32
    %292 = vector.broadcast %cst_98 : f32 to vector<16x16xf32>
    %293 = arith.mulf %291, %292 : vector<16x16xf32>
    %294 = arith.addf %293, %30 : vector<16x16xf32>
    %cst_99 = arith.constant dense<0xFF800000> : vector<16xf32>
    %295 = vector.multi_reduction <maximumf>, %294, %cst_99 [1] : vector<16x16xf32> to vector<16xf32>
    %296 = vector.shape_cast %295 : vector<16xf32> to vector<16x1xf32>
    %297 = vector.broadcast %296 : vector<16x1xf32> to vector<16x16xf32>
    %298 = arith.subf %294, %297 : vector<16x16xf32>
    %299 = math.exp %298 : vector<16x16xf32>
    %cst_100 = arith.constant dense<0.000000e+00> : vector<16xf32>
    %300 = vector.multi_reduction <add>, %299, %cst_100 [1] : vector<16x16xf32> to vector<16xf32>
    %301 = vector.shape_cast %300 : vector<16xf32> to vector<16x1xf32>
    %302 = tpu.reciprocal %301 {approx = true} : vector<16x1xf32> -> vector<16x1xf32>
    %303 = vector.broadcast %302 : vector<16x1xf32> to vector<16x16xf32>
    %304 = arith.mulf %299, %303 : vector<16x16xf32>
    %305 = arith.truncf %304 : vector<16x16xf32> to vector<16x16xbf16>
    %cst_101 = arith.constant dense<0.000000e+00> : vector<16x32xf32>
    %306 = tpu.matmul %305, %290, %cst_101 {dimension_numbers = #tpu.dot_dimension_numbers<[1], [0], [0], [1], [0, 0, 1, 1], [], []>} : vector<16x16xbf16>, vector<16x32xbf16>, vector<16x32xf32> -> vector<16x32xf32>
    %307 = tpu.concatenate %249, %268, %287, %306 in 1 : vector<16x32xf32>, vector<16x32xf32>, vector<16x32xf32>, vector<16x32xf32> -> vector<16x128xf32>
    %308 = arith.truncf %307 : vector<16x128xf32> to vector<16x128xbf16>
    %309 = arith.index_cast %c1_i32 : i32 to index
    %c0_102 = arith.constant 0 : index
    %c0_103 = arith.constant 0 : index
    %310 = vector.load %arg8[%309, %c0_102, %c0_103] : memref<2x128x128xbf16, #tpu.memory_space<vmem>>, vector<1x128x128xbf16>
    %311 = vector.shape_cast %310 : vector<1x128x128xbf16> to vector<128x128xbf16>
    %cst_104 = arith.constant dense<0.000000e+00> : vector<16x128xf32>
    %312 = tpu.matmul %308, %311, %cst_104 {dimension_numbers = #tpu.dot_dimension_numbers<[1], [0], [0], [1], [0, 0, 1, 1], [], []>} : vector<16x128xbf16>, vector<128x128xbf16>, vector<16x128xf32> -> vector<16x128xf32>
    %313 = arith.index_cast %c1_i32 : i32 to index
    %c0_105 = arith.constant 0 : index
    %c0_106 = arith.constant 0 : index
    %314 = vector.load %arg9[%313, %c0_105, %c0_106] : memref<2x1x128xf32, #tpu.memory_space<vmem>>, vector<1x1x128xf32>
    %315 = vector.shape_cast %314 : vector<1x1x128xf32> to vector<1x128xf32>
    %316 = vector.broadcast %315 : vector<1x128xf32> to vector<16x128xf32>
    %317 = arith.addf %312, %316 : vector<16x128xf32>
    %318 = arith.addf %219, %317 : vector<16x128xf32>
    %319 = arith.index_cast %c1_i32 : i32 to index
    %c0_107 = arith.constant 0 : index
    %c0_108 = arith.constant 0 : index
    %320 = vector.load %arg10[%319, %c0_107, %c0_108] : memref<2x1x128xf32, #tpu.memory_space<vmem>>, vector<1x1x128xf32>
    %321 = vector.shape_cast %320 : vector<1x1x128xf32> to vector<1x128xf32>
    %322 = arith.index_cast %c1_i32 : i32 to index
    %c0_109 = arith.constant 0 : index
    %c0_110 = arith.constant 0 : index
    %323 = vector.load %arg11[%322, %c0_109, %c0_110] : memref<2x1x128xf32, #tpu.memory_space<vmem>>, vector<1x1x128xf32>
    %324 = vector.shape_cast %323 : vector<1x1x128xf32> to vector<1x128xf32>
    %cst_111 = arith.constant dense<0.000000e+00> : vector<16xf32>
    %325 = vector.multi_reduction <add>, %318, %cst_111 [1] : vector<16x128xf32> to vector<16xf32>
    %326 = vector.shape_cast %325 : vector<16xf32> to vector<16x1xf32>
    %cst_112 = arith.constant 1.280000e+02 : f32
    %327 = vector.broadcast %cst_112 : f32 to vector<16x1xf32>
    %328 = arith.divf %326, %327 : vector<16x1xf32>
    %329 = vector.broadcast %328 : vector<16x1xf32> to vector<16x128xf32>
    %330 = arith.subf %318, %329 : vector<16x128xf32>
    %331 = arith.mulf %330, %330 : vector<16x128xf32>
    %cst_113 = arith.constant dense<0.000000e+00> : vector<16xf32>
    %332 = vector.multi_reduction <add>, %331, %cst_113 [1] : vector<16x128xf32> to vector<16xf32>
    %333 = vector.shape_cast %332 : vector<16xf32> to vector<16x1xf32>
    %cst_114 = arith.constant 1.280000e+02 : f32
    %334 = vector.broadcast %cst_114 : f32 to vector<16x1xf32>
    %335 = arith.divf %333, %334 : vector<16x1xf32>
    %336 = vector.broadcast %328 : vector<16x1xf32> to vector<16x128xf32>
    %337 = arith.subf %318, %336 : vector<16x128xf32>
    %cst_115 = arith.constant 9.99999996E-13 : f32
    %338 = vector.broadcast %cst_115 : f32 to vector<16x1xf32>
    %339 = arith.addf %335, %338 : vector<16x1xf32>
    %340 = math.rsqrt %339 : vector<16x1xf32>
    %341 = vector.broadcast %340 : vector<16x1xf32> to vector<16x128xf32>
    %342 = arith.mulf %337, %341 : vector<16x128xf32>
    %343 = vector.broadcast %321 : vector<1x128xf32> to vector<16x128xf32>
    %344 = arith.mulf %342, %343 : vector<16x128xf32>
    %345 = vector.broadcast %324 : vector<1x128xf32> to vector<16x128xf32>
    %346 = arith.addf %344, %345 : vector<16x128xf32>
    %347 = arith.truncf %346 : vector<16x128xf32> to vector<16x128xbf16>
    %348 = arith.index_cast %c1_i32 : i32 to index
    %c0_116 = arith.constant 0 : index
    %c0_117 = arith.constant 0 : index
    %349 = vector.load %arg12[%348, %c0_116, %c0_117] : memref<2x128x256xbf16, #tpu.memory_space<vmem>>, vector<1x128x256xbf16>
    %350 = vector.shape_cast %349 : vector<1x128x256xbf16> to vector<128x256xbf16>
    %cst_118 = arith.constant dense<0.000000e+00> : vector<16x256xf32>
    %351 = tpu.matmul %347, %350, %cst_118 {dimension_numbers = #tpu.dot_dimension_numbers<[1], [0], [0], [1], [0, 0, 1, 1], [], []>} : vector<16x128xbf16>, vector<128x256xbf16>, vector<16x256xf32> -> vector<16x256xf32>
    %352 = arith.index_cast %c1_i32 : i32 to index
    %c0_119 = arith.constant 0 : index
    %c0_120 = arith.constant 0 : index
    %353 = vector.load %arg13[%352, %c0_119, %c0_120] : memref<2x1x256xf32, #tpu.memory_space<vmem>>, vector<1x1x256xf32>
    %354 = vector.shape_cast %353 : vector<1x1x256xf32> to vector<1x256xf32>
    %355 = vector.broadcast %354 : vector<1x256xf32> to vector<16x256xf32>
    %356 = arith.addf %351, %355 : vector<16x256xf32>
    %357 = arith.mulf %356, %356 : vector<16x256xf32>
    %358 = arith.mulf %356, %357 : vector<16x256xf32>
    %cst_121 = arith.constant 4.471500e-02 : f32
    %359 = vector.broadcast %cst_121 : f32 to vector<16x256xf32>
    %360 = arith.mulf %359, %358 : vector<16x256xf32>
    %361 = arith.addf %356, %360 : vector<16x256xf32>
    %cst_122 = arith.constant 0.797884583 : f32
    %362 = vector.broadcast %cst_122 : f32 to vector<16x256xf32>
    %363 = arith.mulf %362, %361 : vector<16x256xf32>
    %364 = math.tanh %363 : vector<16x256xf32>
    %cst_123 = arith.constant 1.000000e+00 : f32
    %365 = vector.broadcast %cst_123 : f32 to vector<16x256xf32>
    %366 = arith.addf %365, %364 : vector<16x256xf32>
    %cst_124 = arith.constant 5.000000e-01 : f32
    %367 = vector.broadcast %cst_124 : f32 to vector<16x256xf32>
    %368 = arith.mulf %367, %366 : vector<16x256xf32>
    %369 = arith.mulf %356, %368 : vector<16x256xf32>
    %370 = arith.truncf %369 : vector<16x256xf32> to vector<16x256xbf16>
    %371 = arith.index_cast %c1_i32 : i32 to index
    %c0_125 = arith.constant 0 : index
    %c0_126 = arith.constant 0 : index
    %372 = vector.load %arg14[%371, %c0_125, %c0_126] : memref<2x256x128xbf16, #tpu.memory_space<vmem>>, vector<1x256x128xbf16>
    %373 = vector.shape_cast %372 : vector<1x256x128xbf16> to vector<256x128xbf16>
    %cst_127 = arith.constant dense<0.000000e+00> : vector<16x128xf32>
    %374 = tpu.matmul %370, %373, %cst_127 {dimension_numbers = #tpu.dot_dimension_numbers<[1], [0], [0], [1], [0, 0, 1, 1], [], []>} : vector<16x256xbf16>, vector<256x128xbf16>, vector<16x128xf32> -> vector<16x128xf32>
    %375 = arith.index_cast %c1_i32 : i32 to index
    %c0_128 = arith.constant 0 : index
    %c0_129 = arith.constant 0 : index
    %376 = vector.load %arg15[%375, %c0_128, %c0_129] : memref<2x1x128xf32, #tpu.memory_space<vmem>>, vector<1x1x128xf32>
    %377 = vector.shape_cast %376 : vector<1x1x128xf32> to vector<1x128xf32>
    %378 = vector.broadcast %377 : vector<1x128xf32> to vector<16x128xf32>
    %379 = arith.addf %374, %378 : vector<16x128xf32>
    %380 = arith.addf %346, %379 : vector<16x128xf32>
    %381 = arith.index_cast %c1_i32 : i32 to index
    %c0_130 = arith.constant 0 : index
    %c0_131 = arith.constant 0 : index
    %382 = vector.load %arg16[%381, %c0_130, %c0_131] : memref<2x1x128xf32, #tpu.memory_space<vmem>>, vector<1x1x128xf32>
    %383 = vector.shape_cast %382 : vector<1x1x128xf32> to vector<1x128xf32>
    %384 = arith.index_cast %c1_i32 : i32 to index
    %c0_132 = arith.constant 0 : index
    %c0_133 = arith.constant 0 : index
    %385 = vector.load %arg17[%384, %c0_132, %c0_133] : memref<2x1x128xf32, #tpu.memory_space<vmem>>, vector<1x1x128xf32>
    %386 = vector.shape_cast %385 : vector<1x1x128xf32> to vector<1x128xf32>
    %cst_134 = arith.constant dense<0.000000e+00> : vector<16xf32>
    %387 = vector.multi_reduction <add>, %380, %cst_134 [1] : vector<16x128xf32> to vector<16xf32>
    %388 = vector.shape_cast %387 : vector<16xf32> to vector<16x1xf32>
    %cst_135 = arith.constant 1.280000e+02 : f32
    %389 = vector.broadcast %cst_135 : f32 to vector<16x1xf32>
    %390 = arith.divf %388, %389 : vector<16x1xf32>
    %391 = vector.broadcast %390 : vector<16x1xf32> to vector<16x128xf32>
    %392 = arith.subf %380, %391 : vector<16x128xf32>
    %393 = arith.mulf %392, %392 : vector<16x128xf32>
    %cst_136 = arith.constant dense<0.000000e+00> : vector<16xf32>
    %394 = vector.multi_reduction <add>, %393, %cst_136 [1] : vector<16x128xf32> to vector<16xf32>
    %395 = vector.shape_cast %394 : vector<16xf32> to vector<16x1xf32>
    %cst_137 = arith.constant 1.280000e+02 : f32
    %396 = vector.broadcast %cst_137 : f32 to vector<16x1xf32>
    %397 = arith.divf %395, %396 : vector<16x1xf32>
    %398 = vector.broadcast %390 : vector<16x1xf32> to vector<16x128xf32>
    %399 = arith.subf %380, %398 : vector<16x128xf32>
    %cst_138 = arith.constant 9.99999996E-13 : f32
    %400 = vector.broadcast %cst_138 : f32 to vector<16x1xf32>
    %401 = arith.addf %397, %400 : vector<16x1xf32>
    %402 = math.rsqrt %401 : vector<16x1xf32>
    %403 = vector.broadcast %402 : vector<16x1xf32> to vector<16x128xf32>
    %404 = arith.mulf %399, %403 : vector<16x128xf32>
    %405 = vector.broadcast %383 : vector<1x128xf32> to vector<16x128xf32>
    %406 = arith.mulf %404, %405 : vector<16x128xf32>
    %407 = vector.broadcast %386 : vector<1x128xf32> to vector<16x128xf32>
    %408 = arith.addf %406, %407 : vector<16x128xf32>
    %c2_i32 = arith.constant 2 : i32
    %409 = vector.extract_strided_slice %408 {offsets = [0, 0], sizes = [1, 128], strides = [1, 1]} : vector<16x128xf32> to vector<1x128xf32>
    %410 = vector.extract_strided_slice %408 {offsets = [8, 0], sizes = [1, 128], strides = [1, 1]} : vector<16x128xf32> to vector<1x128xf32>
    %411 = tpu.concatenate %409, %410 in 0 : vector<1x128xf32>, vector<1x128xf32> -> vector<2x128xf32>
    %c0_139 = arith.constant 0 : index
    %c0_140 = arith.constant 0 : index
    %412 = vector.load %arg20[%c0_139, %c0_140] : memref<2x128xf32, #tpu.memory_space<vmem>>, vector<2x128xf32>
    tpu.vector_store %arg20[%c0_139, %c0_140], %411 {strides = array<i32>} : memref<2x128xf32, #tpu.memory_space<vmem>>, vector<2x128xf32>,
    %c0_141 = arith.constant 0 : index
    %c0_142 = arith.constant 0 : index
    %413 = vector.load %arg18[%c0_141, %c0_142] : memref<128x128xf32, #tpu.memory_space<vmem>>, vector<128x128xf32>
    %cst_143 = arith.constant dense<0.000000e+00> : vector<2x128xf32>
    %414 = tpu.matmul %411, %413, %cst_143 {dimension_numbers = #tpu.dot_dimension_numbers<[1], [0], [0], [1], [0, 0, 1, 1], [], []>} : vector<2x128xf32>, vector<128x128xf32>, vector<2x128xf32> -> vector<2x128xf32>
    %c0_144 = arith.constant 0 : index
    %c0_145 = arith.constant 0 : index
    %415 = vector.load %arg19[%c0_144, %c0_145] : memref<1x128xf32, #tpu.memory_space<vmem>>, vector<1x128xf32>
    %416 = vector.broadcast %415 : vector<1x128xf32> to vector<2x128xf32>
    %417 = arith.addf %414, %416 : vector<2x128xf32>
    %c0_146 = arith.constant 0 : index
    %c0_147 = arith.constant 0 : index
    %418 = vector.load %arg21[%c0_146, %c0_147] : memref<2x128xf32, #tpu.memory_space<vmem>>, vector<2x128xf32>
    tpu.vector_store %arg21[%c0_146, %c0_147], %417 {strides = array<i32>} : memref<2x128xf32, #tpu.memory_space<vmem>>, vector<2x128xf32>,
    return
  }
}

</mosaic_0001>

<bundles_post_ra>
// kernel: mul.8
= control target key start
LH: loop header
LB: loop body
LE: loop exit
PB: predicated region body
PF: predicated region fallthrough
CT: control target
= control target key end

     0   :  { %vm7_vm0 = vcmask 64512   ;;  %vm13_vm1 = vcmask 130112   ;;  %s39_s0 = inlined_call_operand.vmem [shape: f32[2,8], index: 0, kind: input, shape index: {}]   ;;  %s40_s1 = inlined_call_operand.vmem [shape: f32[16], index: 1, kind: output, shape index: {}]  }
   0x1   :  { %v4_v0 = vld [vmem:[%s39_s0] sm:$0x3]  ;;  %s22_s0 = smov 8  }
   0x2   :  { %5 = vst [vmem:[#allocation1] sm:$0x3] %v4_v0 }
   0x9   :  { %v10_v1 = vld [vmem:[#allocation1 + $0x1] sm:$0x1]   ;;  %v6_v2 = vld [vmem:[#allocation1] sm:$0x1]  }
   0xa   :  { %11 = vrot.lane.b32.xlu0 %v10_v1, %s22_s0  ;;  %8 = vst.msk [vmem:[#allocation0] sm:$0x1] %vm7_vm0, %v6_v2  }
  0x7c   :  { %v12_v3 = vpop.permute.xlu0 %11  }
  0x7d   :  { %14 = vst.msk [vmem:[#allocation0] sm:$0x1] %vm13_vm1, %v12_v3  }
  0x84   :  { %v17_v4 = vld [vmem:[#allocation0] sm:$0x1] }
  0x85   :  { %20 = vst [vmem:[%s40_s1] sm:$0x1] %v17_v4 }

// kernel: sentiment_bert_predict.1
= control target key start
LH: loop header
LB: loop body
LE: loop exit
PB: predicated region body
PF: predicated region fallthrough
CT: control target
= control target key end

     0   :  { %s3926_s0 = inlined_call_operand.vmem [shape: f32[16,128], index: 0, kind: input, shape index: {}]   ;;  %s3927_s1 = inlined_call_operand.vmem [shape: f32[16,128], index: 1, kind: input, shape index: {}]   ;;  %s3928_s2 = inlined_call_operand.vmem [shape: f32[1,128], index: 2, kind: input, shape index: {}]   ;;  %s3929_s3 = inlined_call_operand.vmem [shape: f32[16,16], index: 3, kind: input, shape index: {}]   ;;  %s3930_s4 = inlined_call_operand.vmem [shape: f32[1,128], index: 4, kind: input, shape index: {}]   ;;  %s3931_s5 = inlined_call_operand.vmem [shape: f32[1,128], index: 5, kind: input, shape index: {}]   ;;  %s3932_s6 = inlined_call_operand.hbm [shape: bf16[2,128,384], index: 6, kind: input, shape index: {}]   ;;  %s3933_s7 = inlined_call_operand.vmem [shape: f32[2,1,384], index: 7, kind: input, shape index: {}]   ;;  %s3934_s8 = inlined_call_operand.vmem [shape: bf16[2,128,128], index: 8, kind: input, shape index: {}]   ;;  %s3935_s9 = inlined_call_operand.vmem [shape: f32[2,1,128], index: 9, kind: input, shape index: {}]   ;;  %s3936_s10 = inlined_call_operand.vmem [shape: f32[2,1,128], index: 10, kind: input, shape index: {}]   ;;  %s3937_s11 = inlined_call_operand.vmem [shape: f32[2,1,128], index: 11, kind: input, shape index: {}]   ;;  %s3938_s12 = inlined_call_operand.hbm [shape: bf16[2,128,256], index: 12, kind: input, shape index: {}]   ;;  %s3939_s13 = inlined_call_operand.vmem [shape: f32[2,1,256], index: 13, kind: input, shape index: {}]   ;;  %s3940_s14 = inlined_call_operand.hbm [shape: bf16[2,256,128], index: 14, kind: input, shape index: {}]   ;;  %s3941_s15 = inlined_call_operand.vmem [shape: f32[2,1,128], index: 15, kind: input, shape index: {}]   ;;  %s3942_s16 = inlined_call_operand.vmem [shape: f32[2,1,128], index: 16, kind: input, shape index: {}]   ;;  %s3943_s17 = inlined_call_operand.vmem [shape: f32[2,1,128], index: 17, kind: input, shape index: {}]   ;;  %s3944_s18 = inlined_call_operand.hbm [shape: f32[128,128], index: 18, kind: input, shape index: {}]   ;;  %s3945_s19 = inlined_call_operand.vmem [shape: f32[1,128], index: 19, kind: input, shape index: {}]   ;;  %s3946_s20 = inlined_call_operand.hbm [shape: f32[2,128], index: 20, kind: output, shape index: {0}]   ;;  %s3947_s21 = inlined_call_operand.hbm [shape: f32[2,128], index: 21, kind: output, shape index: {1}]  }
   0x1   :  { %3951 = sst [smem:[#allocation18_spill]] %s3926_s0 }
   0x2   :  { %3952 = sst [smem:[#allocation19_spill]] %s3927_s1 }
   0x3   :  { %3953 = sst [smem:[#allocation20_spill]] %s3928_s2 }
   0x4   :  { %3954 = sst [smem:[#allocation21_spill]] %s3929_s3 }
   0x5   :  { %3955 = sst [smem:[#allocation22_spill]] %s3930_s4 }
   0x6   :  { %3956 = sst [smem:[#allocation23_spill]] %s3931_s5 }
   0x7   :  { %27 = vsyncpa [#allocation3], 0 }
   0x8   :  { %28 = vsyncpa [#allocation6], 0 }
   0x9   :  { %29 = vsyncpa [#allocation9], 0 }
   0xa   :  { %30 = vsyncpa [#allocation4], 0  ;;  %s71_s26 = sshll.u32 %s3938_s12, 4  ;;  %s72_s26 = int_to_ptr.hbm [resolvable:$true] %s71_s26 }
   0xb   :  { %31 = vsyncpa [#allocation12], 0  ;;  %s3415_s27 = smov [#allocation5]   ;;  %s48_s0 = sshll.u32 %s3932_s6, 4  ;;  %s49_s0 = int_to_ptr.hbm [resolvable:$true] %s48_s0 }
   0xc   :  { %s73_s3 = sshll.u32 %s3415_s27, 4  ;;  %s3416_s4 = smov 128   ;;  %s74_s3 = int_to_ptr.vmem [resolvable:$true] %s73_s3 }
   0xd   :  { %s3417_s30 = smov 8   ;;  %s3418_s5 = smov [#allocation2]  }
   0xe   :  { %79 = dma.hbm_to_vmem [thread:$0]  %s72_s26, 4096, %s74_s3, [#allocation6], %s3416_s4, %s3416_s4, %s3417_s30  }
   0xf   :  { %s50_s22 = sshll.u32 %s3418_s5, 4  ;;  %s3419_s23 = smov 192   ;;  %s51_s22 = int_to_ptr.vmem [resolvable:$true] %s50_s22 }
  0x10   :  { %s3420_s1 = smov 12   ;;  %s86_s2 = sshll.u32 %s3940_s14, 4  ;;  %s87_s2 = int_to_ptr.hbm [resolvable:$true] %s86_s2 }
  0x11   :  { %56 = dma.hbm_to_vmem [thread:$0]  %s49_s0, 6144, %s51_s22, [#allocation3], %s3419_s23, %s3419_s23, %s3420_s1  }
  0x12   :  { %s3421_s25 = smov [#allocation7]   ;;  %s105_s29 = sshll.u32 %s3944_s18, 4  ;;  %s106_s29 = int_to_ptr.hbm [resolvable:$true] %s105_s29 }
  0x13   :  { %s88_s27 = sshll.u32 %s3421_s25, 4  ;;  %s3422_s26 = smov 64   ;;  %s89_s27 = int_to_ptr.vmem [resolvable:$true] %s88_s27 }
  0x14   :  { %s3423_s3 = smov 4   ;;  %s3424_s5 = smov [#allocation8]  }
  0x15   :  { %94 = dma.hbm_to_vmem [thread:$0]  %s87_s2, 4096, %s89_s27, [#allocation6], %s3422_s26, %s3422_s26, %s3423_s3  }
  0x16   :  { %s107_s0 = sshll.u32 %s3424_s5, 4  ;;  %s108_s0 = int_to_ptr.vmem [resolvable:$true] %s107_s0 }
  0x17   :  { %113 = dma.hbm_to_vmem [thread:$0]  %s106_s29, 2048, %s108_s0, [#allocation9], %s3416_s4, %s3416_s4, %s3417_s30  }
  0x18   :  { %3405 = dma.done.wait [#allocation3], 6144  }
  0x19   :  { %3406 = vsyncadd [#allocation3], 4294961152 }
  0x1a   :  { %3407 = dma.done.wait [#allocation6], 8192  }
  0x1b   :  { %3408 = vsyncadd [#allocation6], 4294959104 }
  0x1c   :  { %3409 = dma.done.wait [#allocation9], 2048  }
  0x1d   :  { %3410 = vsyncadd [#allocation9], 4294965248  ;;  %s3957_s23 = sld [smem:[#allocation18_spill]]  ;;  %v3425_v9 = vmov 128.0   ;;  %v2502_v24 = vld [vmem:[#allocation2 + $0xa8] sm:$0xf] }
  0x1e   :  { %s3958_s12 = sld [smem:[#allocation19_spill]]  ;;  %3157 = vrcp.f32 %v3425_v9  ;;  %v2990_v25 = vld [vmem:[#allocation2 + $0xb0] sm:$0xf0]  ;;  %v2989_v26 = vld [vmem:[#allocation2 + $0xac] sm:$0xf]  ;;  %vm429_vm7 = vcmask 261120  }
  0x1f   :  { %s3959_s25 = sld [smem:[#allocation20_spill]]  ;;  %v2503_v27 = vor.u32 %v2990_v25, %v2502_v24  ;;  %v2504_v28 = vld [vmem:[#allocation2 + $0xb4] sm:$0xf0]  ;;  %v2510_v29 = vld [vmem:[#allocation2 + $0xb0] sm:$0xf]  ;;  %vm454_vm8 = vcmask 130048  }
  0x20   :  { %v2991_v30 = vld [vmem:[#allocation2 + $0xb8] sm:$0xf0]  ;;  %v2507_v31 = vor.u32 %v2989_v26, %v2504_v28  ;;  %v2490_v33 = vld [vmem:[#allocation2 + $0x90] sm:$0xf]  ;;  %v2986_v35 = vld [vmem:[#allocation2 + $0x94] sm:$0xf] }
  0x21   :  { %v2511_v32 = vor.u32 %v2991_v30, %v2510_v29  ;;  %375 = vmatpush.bf16.msra.mxu0 %v2503_v27  ;;  %v2987_v34 = vld [vmem:[#allocation2 + $0x98] sm:$0xf0]  ;;  %v2492_v37 = vld [vmem:[#allocation2 + $0x9c] sm:$0xf0]  ;;  %v2498_v38 = vld [vmem:[#allocation2 + $0x98] sm:$0xf] }
  0x22   :  { %389 = vmatpush.bf16.msra.mxu1 %v2507_v31  ;;  %v2491_v36 = vor.u32 %v2987_v34, %v2490_v33  ;;  %v2988_v39 = vld [vmem:[#allocation2 + $0xa0] sm:$0xf0]  ;;  %v2495_v40 = vor.u32 %v2986_v35, %v2492_v37  ;;  %v2478_v42 = vld [vmem:[#allocation2 + $0x78] sm:$0xf]  ;;  %v2983_v44 = vld [vmem:[#allocation2 + $0x7c] sm:$0xf] }
  0x23   :  { %v133_v0 = vld [vmem:[%s3957_s23] sm:$0xff]  ;;  %v134_v4 = vld [vmem:[%s3957_s23 + $0x8] sm:$0xff]  ;;  %403 = vmatpush.bf16.msra.mxu2 %v2511_v32  ;;  %v2499_v41 = vor.u32 %v2988_v39, %v2498_v38  ;;  %v2468_v55 = vld [vmem:[#allocation2 + $0x6c] sm:$0xf0]  ;;  %s3960_s3 = sld [smem:[#allocation22_spill]]  ;;  %s3427_s4 = smov 32  }
  0x24   :  { %v135_v1 = vld [vmem:[%s3958_s12] sm:$0xff]  ;;  %v136_v5 = vld [vmem:[%s3958_s12 + $0x8] sm:$0xff]  ;;  %v3158_v10 = vpop.eup %3157  ;;  %v2982_v57 = vld [vmem:[#allocation2 + $0x70] sm:$0xf0]  ;;  %s3961_s14 = sld [smem:[#allocation23_spill]]  ;;  %vm740_vm9 = vcmask 523264  }
  0x25   :  { %v137_v2 = vadd.f32 %v135_v1, %v133_v0  ;;  %v3141_v3 = vld [vmem:[%s3959_s25] ss:$0 sm:$0xff]  ;;  %v138_v7 = vadd.f32 %v136_v5, %v134_v4  ;;  %v152_v11 = vmul.f32 128.0, %v3158_v10  ;;  %vm156_vm0 = vweird.f32 %v3158_v10  ;;  %376 = vmatpush.bf16.msra.mxu0 %v2491_v36  ;;  %v2984_v43 = vld [vmem:[#allocation2 + $0x80] sm:$0xf0]  ;;  %s3962_s12 = sld [smem:[#allocation21_spill]] }
  0x26   :  { %390 = vmatpush.bf16.msra.mxu1 %v2495_v40  ;;  %v2479_v45 = vor.u32 %v2984_v43, %v2478_v42  ;;  %v2480_v46 = vld [vmem:[#allocation2 + $0x84] sm:$0xf0]  ;;  %v2486_v47 = vld [vmem:[#allocation2 + $0x80] sm:$0xf]  ;;  %v2985_v48 = vld [vmem:[#allocation2 + $0x88] sm:$0xf0] }
  0x27   :  { %v143_v6 = vadd.f32 %v3141_v3, %v137_v2  ;;  %v144_v8 = vadd.f32 %v3141_v3, %v138_v7  ;;  %v153_v12 = vsub.f32 1.0, %v152_v11  ;;  %404 = vmatpush.bf16.msra.mxu2 %v2499_v41  ;;  %v2483_v49 = vor.u32 %v2983_v44, %v2480_v46  ;;  %v2466_v51 = vld [vmem:[#allocation2 + $0x60] sm:$0xf]  ;;  %v2981_v52 = vld [vmem:[#allocation2 + $0x68] sm:$0xf0]  ;;  %s3426_s25 = smov 96  }
  0x28   :  { %v2487_v50 = vor.u32 %v2985_v48, %v2486_v47  ;;  %v2980_v53 = vld [vmem:[#allocation2 + $0x64] sm:$0xf]  ;;  %v2467_v54 = vor.u32 %v2981_v52, %v2466_v51  ;;  %v2474_v56 = vld [vmem:[#allocation2 + $0x68] sm:$0xf]  ;;  %v2978_v61 = vld [vmem:[#allocation2 + $0x50] sm:$0xf0] }
  0x29   :  { %147 = vadd.xlane.f32.xlu0 %v143_v6  ;;  %v154_v13 = vmul.f32 %v3158_v10, %v153_v12  ;;  %377 = vmatpush.bf16.msra.mxu0 %v2479_v45  ;;  %v2471_v58 = vor.u32 %v2980_v53, %v2468_v55  ;;  %v2475_v59 = vor.u32 %v2982_v57, %v2474_v56  ;;  %v2454_v60 = vld [vmem:[#allocation2 + $0x48] sm:$0xf]  ;;  %v2977_v62 = vld [vmem:[#allocation2 + $0x4c] sm:$0xf]  ;;  %v2456_v0 = vld [vmem:[#allocation2 + $0x54] sm:$0xf0] }
  0x2a   :  { %391 = vmatpush.bf16.msra.mxu1 %v2483_v49  ;;  %v2455_v63 = vor.u32 %v2978_v61, %v2454_v60  ;;  %v2462_v1 = vld [vmem:[#allocation2 + $0x50] sm:$0xf]  ;;  %v2979_v2 = vld [vmem:[#allocation2 + $0x58] sm:$0xf0]  ;;  %v2459_v3 = vor.u32 %v2977_v62, %v2456_v0  ;;  %v2974_v7 = vld [vmem:[#allocation2 + $0x34] sm:$0xf] }
  0x2b   :  { %v155_v14 = vadd.f32 %v3158_v10, %v154_v13  ;;  %405 = vmatpush.bf16.msra.mxu2 %v2487_v50  ;;  %v2463_v4 = vor.u32 %v2979_v2, %v2462_v1  ;;  %v2442_v5 = vld [vmem:[#allocation2 + $0x30] sm:$0xf]  ;;  %v2444_v9 = vld [vmem:[#allocation2 + $0x3c] sm:$0xf0]  ;;  %v2976_v11 = vld [vmem:[#allocation2 + $0x40] sm:$0xf0] }
  0x2c   :  { %v2447_v12 = vor.u32 %v2974_v7, %v2444_v9  ;;  %v2418_v26 = vld [vmem:[#allocation2] sm:$0xf]  ;;  %v2969_v27 = vld [vmem:[#allocation2 + $0x8] sm:$0xf0]  ;;  %v2968_v28 = vld [vmem:[#allocation2 + $0x4] sm:$0xf] }
  0x2d   :  { %v3569_v15 = vsel %vm156_vm0, %v3158_v10, %v155_v14  ;;  %378 = vmatpush.bf16.msra.mxu0 %v2467_v54  ;;  %v2450_v10 = vld [vmem:[#allocation2 + $0x38] sm:$0xf]  ;;  %v2419_v30 = vor.u32 %v2969_v27, %v2418_v26  ;;  %v2420_v31 = vld [vmem:[#allocation2 + $0xc] sm:$0xf0]  ;;  %v2426_v32 = vld [vmem:[#allocation2 + $0x8] sm:$0xf] }
  0x2e   :  { %392 = vmatpush.bf16.msra.mxu1 %v2471_v58  ;;  %v2451_v13 = vor.u32 %v2976_v11, %v2450_v10  ;;  %v2430_v14 = vld [vmem:[#allocation2 + $0x18] sm:$0xf]  ;;  %v2970_v33 = vld [vmem:[#allocation2 + $0x10] sm:$0xf0]  ;;  %v2423_v35 = vor.u32 %v2968_v28, %v2420_v31  ;;  %v3142_v54 = vld [vmem:[%s3960_s3] ss:$0 sm:$0xff] }
  0x2f   :  { %406 = vmatpush.bf16.msra.mxu2 %v2475_v59  ;;  %v2427_v36 = vor.u32 %v2970_v33, %v2426_v32  ;;  %v3143_v59 = vld [vmem:[%s3961_s14] ss:$0 sm:$0xff]  ;;  %vm743_vm10 = vcmask 785408   ;;  %s3428_s14 = smov [#allocation10]   ;;  %s2388_s23 = sshll.u32 %s3946_s20, 4  ;;  %s2389_s23 = int_to_ptr.hbm [resolvable:$true] %s2388_s23 }
  0x30   :  { %v3608_v32 = vld [vmem:[%s3962_s12] sm:$0xff]  ;;  %s2386_s22 = sshll.u32 %s3428_s14, 4  ;;  %s2399_s2 = sshll.u32 %s3947_s21, 4  ;;  %s2387_s22 = int_to_ptr.vmem [resolvable:$true] %s2386_s22  ;;  %s2400_s2 = int_to_ptr.hbm [resolvable:$true] %s2399_s2 }
  0x31   :  { %149 = vadd.xlane.f32.xlu0 %v144_v8  ;;  %379 = vmatpush.bf16.msra.mxu0 %v2455_v63 }
  0x32   :  { %393 = vmatpush.bf16.msra.mxu1 %v2459_v3 }
  0x33   :  { %407 = vmatpush.bf16.msra.mxu2 %v2463_v4 }
  0x36   :  { %394 = vmatpush.bf16.msra.mxu1 %v2447_v12 }
  0x37   :  { %408 = vmatpush.bf16.msra.mxu2 %v2451_v13 }
  0x9c   :  { %v148_v16 = vpop.xlane.xlu0 %147 }
  0x9d   :  { %v158_v17 = vmul.f32 %v3569_v15, %v148_v16  ;;  %v2972_v16 = vld [vmem:[#allocation2 + $0x20] sm:$0xf0] }
  0x9f   :  { %v3572_v18 = vsub.f32 %v143_v6, %v158_v17  ;;  %v2975_v6 = vld [vmem:[#allocation2 + $0x38] sm:$0xf0] }
  0xa0   :  { %v2971_v17 = vld [vmem:[#allocation2 + $0x1c] sm:$0xf] }
  0xa1   :  { %v162_v19 = vmul.f32 %v3572_v18, %v3572_v18 }
  0xa3   :  { %164 = vadd.xlane.f32.xlu1 %v162_v19  ;;  %v2431_v19 = vor.u32 %v2972_v16, %v2430_v14 }
  0xa4   :  { %v150_v20 = vpop.xlane.xlu0 %149 }
  0xa5   :  { %v159_v21 = vmul.f32 %v3569_v15, %v150_v20  ;;  %v2432_v20 = vld [vmem:[#allocation2 + $0x24] sm:$0xf0] }
  0xa6   :  { %v2435_v24 = vor.u32 %v2971_v17, %v2432_v20 }
  0xa7   :  { %v3577_v22 = vsub.f32 %v144_v8, %v159_v21  ;;  %v2443_v8 = vor.u32 %v2975_v6, %v2442_v5  ;;  %v2438_v21 = vld [vmem:[#allocation2 + $0x20] sm:$0xf] }
  0xa8   :  { %395 = vmatpush.bf16.msra.mxu1 %v2435_v24 }
  0xa9   :  { %v163_v23 = vmul.f32 %v3577_v22, %v3577_v22  ;;  %380 = vmatpush.bf16.msra.mxu0 %v2443_v8 }
  0xab   :  { %166 = vadd.xlane.f32.xlu1 %v163_v23  ;;  %v2973_v23 = vld [vmem:[#allocation2 + $0x28] sm:$0xf0] }
  0xac   :  { %v2439_v25 = vor.u32 %v2973_v23, %v2438_v21  ;;  %396 = vmatpush.bf16.msra.mxu1 %v2423_v35 }
  0xad   :  { %381 = vmatpush.bf16.msra.mxu0 %v2431_v19 }
  0xae   :  { %409 = vmatpush.bf16.msra.mxu2 %v2439_v25 }
  0xb1   :  { %382 = vmatpush.bf16.msra.mxu0 %v2419_v30 }
  0xb2   :  { %410 = vmatpush.bf16.msra.mxu2 %v2427_v36 }
 0x116   :  { %v165_v29 = vpop.xlane.xlu1 %164 }
 0x117   :  { %v168_v34 = vmul.f32 %v165_v29, %v3569_v15 }
 0x119   :  { %v170_v37 = vadd.f32 1e-12, %v168_v34 }
 0x11b   :  { %3159 = vrsqrt.f32 %v170_v37  ;;  %vm178_vm2 = vweird.f32 %v170_v37 }
 0x11e   :  { %v167_v38 = vpop.xlane.xlu1 %166 }
 0x11f   :  { %v169_v39 = vmul.f32 %v167_v38, %v3569_v15 }
 0x121   :  { %v3160_v40 = vpop.eup %3159  ;;  %v171_v41 = vadd.f32 1e-12, %v169_v39 }
 0x122   :  { %v173_v42 = vmul.f32 %v3160_v40, %v170_v37  ;;  %vm179_vm1 = vweird.f32 %v3160_v40  ;;  %v3615_v37 = vld [vmem:[%s3962_s12 + $0x8] sm:$0xff] }
 0x123   :  { %3161 = vrsqrt.f32 %v171_v41  ;;  %vm180_vm3 = vmor %vm178_vm2, %vm179_vm1  ;;  %vm188_vm5 = vweird.f32 %v171_v41 }
 0x124   :  { %v174_v43 = vmul.f32 %v3160_v40, %v173_v42 }
 0x126   :  { %v175_v44 = vmul.f32 0.5, %v174_v43 }
 0x128   :  { %v176_v45 = vsub.f32 1.5, %v175_v44 }
 0x129   :  { %v3162_v46 = vpop.eup %3161 }
 0x12a   :  { %v177_v47 = vmul.f32 %v3160_v40, %v176_v45  ;;  %v183_v48 = vmul.f32 %v3162_v46, %v171_v41  ;;  %vm189_vm4 = vweird.f32 %v3162_v46 }
 0x12b   :  { %vm190_vm6 = vmor %vm188_vm5, %vm189_vm4 }
 0x12c   :  { %v184_v49 = vmul.f32 %v3162_v46, %v183_v48  ;;  %v181_v50 = vsel %vm180_vm3, %v3160_v40, %v177_v47 }
 0x12d   :  { %v192_v53 = vmul.f32 %v181_v50, %v3572_v18 }
 0x12e   :  { %v185_v51 = vmul.f32 0.5, %v184_v49 }
 0x12f   :  { %v197_v58 = vmul.f32 %v3142_v54, %v192_v53 }
 0x130   :  { %v186_v52 = vsub.f32 1.5, %v185_v51 }
 0x131   :  { %v3591_v61 = vadd.f32 %v3143_v59, %v197_v58 }
 0x132   :  { %v187_v55 = vmul.f32 %v3162_v46, %v186_v52 }
 0x134   :  { %v191_v56 = vsel %vm190_vm6, %v3162_v46, %v187_v55 }
 0x135   :  { %v193_v57 = vmul.f32 %v191_v56, %v3577_v22  ;;  %v239_v22 = vld [vmem:[%s3933_s7] sm:$0x7] }
 0x136   :  { %v241_v1 = vperm.slane %v239_v22, 0  ;;  %v242_v2 = vperm.slane %v239_v22, 1  ;;  %v243_v6 = vperm.slane %v239_v22, 2 }
 0x137   :  { %v198_v60 = vmul.f32 %v3142_v54, %v193_v57 }
 0x139   :  { %v3593_v62 = vadd.f32 %v3143_v59, %v198_v60 }
 0x13b   :  { %v206_v18 = vpack.c.bf16 %v3593_v62, %v3591_v61 }
 0x13d   :  { %383 = vmatmul.bf16.vlgmr.msra.gmra.mxu0 %v206_v18  ;;  %397 = vmatmul.bf16.vlgmr.msra.gmra.mxu1 %v206_v18 }
 0x13e   :  { %411 = vmatmul.bf16.vlgmr.msra.gmra.mxu2 %v206_v18 }
 0x1ba   :  { %v384_v63 = vpop.f32.mrf.mxu0  ;;  %v398_v0 = vpop.f32.mrf.mxu1 }
 0x1bb   :  { %v385_v3 = vadd.f32 %v384_v63, %v241_v1  ;;  %v399_v4 = vadd.f32 %v398_v0, %v242_v2 }
 0x1bd   :  { %v417_v9 = vpack.c.bf16 %v399_v4, %v385_v3 }
 0x1bf   :  { %v426_v14 = vunpack.c.h.b16 %v417_v9  ;;  %v423_v28 = vunpack.c.l.b16 %v417_v9 }
 0x1c1   :  { %v412_v5 = vpop.f32.mrf.mxu2 }
 0x1c2   :  { %v386_v7 = vpop.f32.mrf.mxu0  ;;  %v400_v8 = vpop.f32.mrf.mxu1  ;;  %v413_v13 = vadd.f32 %v412_v5, %v243_v6 }
 0x1c3   :  { %v387_v10 = vadd.f32 %v386_v7, %v241_v1  ;;  %v401_v11 = vadd.f32 %v400_v8, %v242_v2 }
 0x1c4   :  { %v418_v20 = vpack.c.bf16 %v413_v13, %v413_v13 }
 0x1c5   :  { %v419_v12 = vpack.c.bf16 %v401_v11, %v387_v10 }
 0x1c6   :  { %v480_v26 = vunpack.c.l.b16 %v418_v20 }
 0x1c7   :  { %v427_v16 = vunpack.c.h.b16 %v419_v12  ;;  %v424_v25 = vunpack.c.l.b16 %v419_v12 }
 0x1c9   :  { %v428_v17 = vpack.c.b16 %v427_v16, %v426_v14  ;;  %v414_v19 = vpop.f32.mrf.mxu2  ;;  %v425_v30 = vpack.c.b16 %v424_v25, %v423_v28 }
 0x1ca   :  { %v415_v21 = vadd.f32 %v414_v19, %v243_v6 }
 0x1cb   :  { %v434_v23 = vsel %vm429_vm7, %v428_v17, 0 }
 0x1cc   :  { %v420_v24 = vpack.c.bf16 %v415_v21, %v415_v21  ;;  %443 = vmatpush.bf16.xpose.msra.mxu3 %v434_v23 }
 0x1ce   :  { %v481_v27 = vunpack.c.l.b16 %v420_v24 }
 0x1d0   :  { %v3601_v29 = vpack.c.b16 %v481_v27, %v480_v26 }
 0x1d3   :  { %2512 = vmatmul.msk.bf16.vlgmr.msra.gmra.mxu3 %vm429_vm7, %v425_v30 }
 0x1d4   :  { %494 = vmatpush.bf16.msrb.mxu3 %v3601_v29 }
 0x256   :  { %v445_v31 = vpop.f32.mrf.mxu3 }
 0x257   :  { %v450_v33 = vmul.f32 0.17677669, %v445_v31 }
 0x259   :  { %v452_v34 = vadd.f32 %v450_v33, %v3608_v32 }
 0x25b   :  { %v455_v35 = vsel %vm454_vm8, %v452_v34, -inf }
 0x25c   :  { %456 = vmax.xlane.f32.xlu2 %v455_v35 }
 0x25e   :  { %v447_v36 = vpop.f32.mrf.mxu3 }
 0x25f   :  { %v451_v38 = vmul.f32 0.17677669, %v447_v36 }
 0x261   :  { %v453_v39 = vadd.f32 %v451_v38, %v3615_v37 }
 0x263   :  { %v458_v40 = vsel %vm454_vm8, %v453_v39, -inf }
 0x264   :  { %459 = vmax.xlane.f32.xlu2 %v458_v40 }
 0x27c   :  { %503 = vrot.lane.b32.xlu2 %v428_v17, %s3426_s25 }
 0x284   :  { %572 = vrot.lane.b32.xlu2 %v425_v30, %s3422_s26 }
 0x28c   :  { %643 = vrot.lane.b32.xlu2 %v425_v30, %s3427_s4 }
 0x2cf   :  { %v457_v41 = vpop.xlane.xlu2 %456 }
 0x2d0   :  { %v461_v42 = vsub.f32 %v452_v34, %v457_v41 }
 0x2d2   :  { %v463_v43 = vmul.f32 1.442695, %v461_v42 }
 0x2d4   :  { %3163 = vpow2.f32 %v463_v43 }
 0x2d7   :  { %v460_v44 = vpop.xlane.xlu2 %459 }
 0x2d8   :  { %v462_v45 = vsub.f32 %v453_v39, %v460_v44 }
 0x2da   :  { %v3164_v46 = vpop.eup %3163  ;;  %v465_v47 = vmul.f32 1.442695, %v462_v45 }
 0x2db   :  { %v467_v48 = vsel %vm454_vm8, %v3164_v46, 0.0 }
 0x2dc   :  { %3165 = vpow2.f32 %v465_v47  ;;  %468 = vadd.xlane.f32.xlu0 %v467_v48 }
 0x2df   :  { %v504_v49 = vpop.permute.xlu2 %503 }
 0x2e0   :  { %v509_v50 = vsel %vm429_vm7, %v504_v49, 0 }
 0x2e1   :  { %518 = vmatpush.bf16.xpose.msra.mxu3 %v509_v50 }
 0x2e2   :  { %v3166_v51 = vpop.eup %3165 }
 0x2e3   :  { %v470_v52 = vsel %vm454_vm8, %v3166_v51, 0.0 }
 0x2e4   :  { %471 = vadd.xlane.f32.xlu1 %v470_v52 }
 0x2e7   :  { %v573_v1 = vpop.permute.xlu2 %572 }
 0x2ef   :  { %v644_v2 = vpop.permute.xlu2 %643 }
 0x2f0   :  { %501 = vrot.lane.b32.xlu0 %v425_v30, %s3426_s25 }
 0x2f8   :  { %645 = vrot.lane.b32.xlu0 %v428_v17, %s3427_s4 }
 0x2fd   :  { %574 = vrot.lane.b32.xlu1 %v428_v17, %s3422_s26 }
 0x34f   :  { %v469_v53 = vpop.xlane.xlu0 %468 }
 0x350   :  { %3167 = vrcp.f32 %v469_v53 }
 0x356   :  { %v3168_v55 = vpop.eup %3167 }
 0x357   :  { %v472_v54 = vpop.xlane.xlu1 %471  ;;  %v475_v57 = vmul.f32 %v3168_v55, %v3164_v46 }
 0x358   :  { %3169 = vrcp.f32 %v472_v54 }
 0x35e   :  { %v3170_v56 = vpop.eup %3169 }
 0x35f   :  { %v476_v58 = vmul.f32 %v3170_v56, %v3166_v51 }
 0x361   :  { %v477_v59 = vpack.c.bf16 %v476_v58, %v475_v57 }
 0x362   :  { %v502_v60 = vpop.permute.xlu0 %501 }
 0x363   :  { %2513 = vmatmul.msk.bf16.vlgmr.msrb.gmra.mxu3 %vm454_vm8, %v477_v59 }
 0x36a   :  { %v646_v22 = vpop.permute.xlu0 %645 }
 0x36b   :  { %v651_v0 = vsel %vm429_vm7, %v646_v22, 0 }
 0x36f   :  { %v575_v18 = vpop.permute.xlu1 %574 }
 0x370   :  { %v580_v63 = vsel %vm429_vm7, %v575_v18, 0 }
 0x371   :  { %589 = vmatpush.bf16.xpose.msrb.mxu3 %v580_v63 }
 0x373   :  { %2514 = vmatmul.msk.bf16.vlgmr.msra.gmra.mxu3 %vm429_vm7, %v502_v60 }
 0x379   :  { %660 = vmatpush.bf16.xpose.msra.mxu3 %v651_v0 }
 0x383   :  { %2516 = vmatmul.msk.bf16.vlgmr.msrb.gmra.mxu3 %vm429_vm7, %v573_v1 }
 0x393   :  { %2518 = vmatmul.msk.bf16.vlgmr.msra.gmra.mxu3 %vm429_vm7, %v644_v2 }
 0x3e6   :  { %v3634_v3 = vpop.f32.mrf.mxu3 }
 0x3ee   :  { %v3636_v4 = vpop.f32.mrf.mxu3 }
 0x3f6   :  { %v520_v5 = vpop.f32.mrf.mxu3 }
 0x3f7   :  { %v525_v6 = vmul.f32 0.17677669, %v520_v5 }
 0x3f9   :  { %v527_v7 = vadd.f32 %v525_v6, %v3608_v32 }
 0x3fb   :  { %v529_v8 = vsel %vm454_vm8, %v527_v7, -inf }
 0x3fc   :  { %530 = vmax.xlane.f32.xlu1 %v529_v8 }
 0x3fe   :  { %v522_v9 = vpop.f32.mrf.mxu3 }
 0x3ff   :  { %v526_v10 = vmul.f32 0.17677669, %v522_v9 }
 0x401   :  { %v528_v11 = vadd.f32 %v526_v10, %v3615_v37 }
 0x403   :  { %v532_v12 = vsel %vm454_vm8, %v528_v11, -inf }
 0x404   :  { %533 = vmax.xlane.f32.xlu0 %v532_v12 }
 0x406   :  { %v591_v13 = vpop.f32.mrf.mxu3 }
 0x407   :  { %v596_v14 = vmul.f32 0.17677669, %v591_v13 }
 0x409   :  { %v598_v16 = vadd.f32 %v596_v14, %v3608_v32 }
 0x40b   :  { %v600_v17 = vsel %vm454_vm8, %v598_v16, -inf }
 0x40c   :  { %601 = vmax.xlane.f32.xlu2 %v600_v17 }
 0x40e   :  { %v593_v19 = vpop.f32.mrf.mxu3 }
 0x40f   :  { %v597_v20 = vmul.f32 0.17677669, %v593_v19 }
 0x411   :  { %v599_v21 = vadd.f32 %v597_v20, %v3615_v37 }
 0x413   :  { %v603_v23 = vsel %vm454_vm8, %v599_v21, -inf }
 0x414   :  { %604 = vmax.xlane.f32.xlu1 %v603_v23 }
 0x416   :  { %v662_v24 = vpop.f32.mrf.mxu3 }
 0x417   :  { %v667_v25 = vmul.f32 0.17677669, %v662_v24 }
 0x419   :  { %v669_v26 = vadd.f32 %v667_v25, %v3608_v32 }
 0x41b   :  { %v671_v27 = vsel %vm454_vm8, %v669_v26, -inf }
 0x41c   :  { %672 = vmax.xlane.f32.xlu0 %v671_v27 }
 0x41e   :  { %v664_v28 = vpop.f32.mrf.mxu3 }
 0x41f   :  { %v668_v30 = vmul.f32 0.17677669, %v664_v28 }
 0x421   :  { %v670_v31 = vadd.f32 %v668_v30, %v3615_v37 }
 0x423   :  { %v674_v33 = vsel %vm454_vm8, %v670_v31, -inf }
 0x424   :  { %675 = vmax.xlane.f32.xlu2 %v674_v33 }
 0x43c   :  { %552 = vrot.lane.b32.xlu2 %v3601_v29, %s3426_s25 }
 0x46f   :  { %v531_v34 = vpop.xlane.xlu1 %530 }
 0x470   :  { %v535_v35 = vsub.f32 %v527_v7, %v531_v34 }
 0x472   :  { %v537_v36 = vmul.f32 1.442695, %v535_v35 }
 0x474   :  { %3171 = vpow2.f32 %v537_v36 }
 0x477   :  { %v534_v38 = vpop.xlane.xlu0 %533 }
 0x478   :  { %v536_v39 = vsub.f32 %v528_v11, %v534_v38 }
 0x47a   :  { %v3172_v32 = vpop.eup %3171  ;;  %v539_v40 = vmul.f32 1.442695, %v536_v39  ;;  %v2999_v39 = vld [vmem:[%s3934_s8 + $0x38] sm:$0xff] }
 0x47b   :  { %v541_v41 = vsel %vm454_vm8, %v3172_v32, 0.0  ;;  %815 = vmatpush.bf16.msrb.mxu1 %v2999_v39  ;;  %v2578_v39 = vld [vmem:[#allocation5 + $0x30] sm:$0xf] }
 0x47c   :  { %3173 = vpow2.f32 %v539_v40  ;;  %542 = vadd.xlane.f32.xlu1 %v541_v41  ;;  %v2997_v40 = vld [vmem:[%s3934_s8 + $0x28] sm:$0xff]  ;;  %v2996_v41 = vld [vmem:[%s3934_s8 + $0x20] sm:$0xff] }
 0x47f   :  { %v602_v42 = vpop.xlane.xlu2 %601 }
 0x480   :  { %v606_v37 = vsub.f32 %v598_v16, %v602_v42  ;;  %v2995_v42 = vld [vmem:[%s3934_s8 + $0x18] sm:$0xff] }
 0x482   :  { %v3174_v43 = vpop.eup %3173  ;;  %v608_v44 = vmul.f32 1.442695, %v606_v37  ;;  %v2994_v37 = vld [vmem:[%s3934_s8 + $0x10] sm:$0xff] }
 0x483   :  { %v544_v45 = vsel %vm454_vm8, %v3174_v43, 0.0 }
 0x484   :  { %3175 = vpow2.f32 %v608_v44  ;;  %545 = vadd.xlane.f32.xlu0 %v544_v45  ;;  %v2992_v44 = vld [vmem:[%s3934_s8] sm:$0xff] }
 0x487   :  { %v605_v46 = vpop.xlane.xlu1 %604 }
 0x488   :  { %v607_v47 = vsub.f32 %v599_v21, %v605_v46 }
 0x48a   :  { %v3176_v48 = vpop.eup %3175  ;;  %v610_v49 = vmul.f32 1.442695, %v607_v47 }
 0x48b   :  { %v612_v50 = vsel %vm454_vm8, %v3176_v48, 0.0 }
 0x48c   :  { %3177 = vpow2.f32 %v610_v49  ;;  %613 = vadd.xlane.f32.xlu1 %v612_v50 }
 0x48f   :  { %v673_v51 = vpop.xlane.xlu0 %672 }
 0x490   :  { %v677_v52 = vsub.f32 %v669_v26, %v673_v51 }
 0x492   :  { %v3178_v53 = vpop.eup %3177  ;;  %v679_v54 = vmul.f32 1.442695, %v677_v52 }
 0x493   :  { %v615_v55 = vsel %vm454_vm8, %v3178_v53, 0.0 }
 0x494   :  { %3179 = vpow2.f32 %v679_v54  ;;  %616 = vadd.xlane.f32.xlu0 %v615_v55 }
 0x497   :  { %v676_v56 = vpop.xlane.xlu2 %675 }
 0x498   :  { %v678_v57 = vsub.f32 %v670_v31, %v676_v56 }
 0x49a   :  { %v3180_v58 = vpop.eup %3179  ;;  %v681_v59 = vmul.f32 1.442695, %v678_v57 }
 0x49b   :  { %v683_v60 = vsel %vm454_vm8, %v3180_v58, 0.0 }
 0x49c   :  { %3181 = vpow2.f32 %v681_v59  ;;  %684 = vadd.xlane.f32.xlu1 %v683_v60 }
 0x49f   :  { %v553_v18 = vpop.permute.xlu2 %552 }
 0x4a0   :  { %565 = vmatpush.bf16.msrb.mxu0 %v553_v18  ;;  %v3144_v18 = vld [vmem:[%s3935_s9] ss:$0 sm:$0xff] }
 0x4a2   :  { %v3182_v22 = vpop.eup %3181 }
 0x4a3   :  { %v686_v63 = vsel %vm454_vm8, %v3182_v22, 0.0 }
 0x4a4   :  { %687 = vadd.xlane.f32.xlu0 %v686_v63 }
 0x4b5   :  { %623 = vrot.lane.b32.xlu1 %v3601_v29, %s3422_s26 }
 0x4b8   :  { %694 = vrot.lane.b32.xlu0 %v3601_v29, %s3427_s4 }
 0x4ef   :  { %v543_v0 = vpop.xlane.xlu1 %542 }
 0x4f0   :  { %3183 = vrcp.f32 %v543_v0 }
 0x4f6   :  { %v3184_v2 = vpop.eup %3183 }
 0x4f7   :  { %v546_v1 = vpop.xlane.xlu0 %545  ;;  %v549_v6 = vmul.f32 %v3184_v2, %v3172_v32  ;;  %v2998_v32 = vld [vmem:[%s3934_s8 + $0x30] sm:$0xff] }
 0x4f8   :  { %3185 = vrcp.f32 %v546_v1  ;;  %816 = vmatpush.bf16.msrb.mxu1 %v2998_v32  ;;  %v3007_v32 = vld [vmem:[#allocation5 + $0x34] sm:$0xf0] }
 0x4fc   :  { %817 = vmatpush.bf16.msrb.mxu1 %v2997_v40  ;;  %v3006_v40 = vld [vmem:[#allocation5 + $0x34] sm:$0xf] }
 0x4fe   :  { %v3186_v5 = vpop.eup %3185 }
 0x4ff   :  { %v550_v7 = vmul.f32 %v3186_v5, %v3174_v43  ;;  %v614_v10 = vpop.xlane.xlu1 %613  ;;  %v2993_v43 = vld [vmem:[%s3934_s8 + $0x8] sm:$0xff] }
 0x500   :  { %818 = vmatpush.bf16.msrb.mxu1 %v2996_v41  ;;  %v2579_v41 = vor.u32 %v3007_v32, %v2578_v39  ;;  %v3018_v39 = vld [vmem:[#allocation7 + $0x10] sm:$0xff] }
 0x501   :  { %v551_v8 = vpack.c.bf16 %v550_v7, %v549_v6  ;;  %v3026_v32 = vld [vmem:[#allocation7 + $0x50] sm:$0xff] }
 0x503   :  { %2515 = vmatmul.msk.bf16.vlgmr.msrb.gmra.mxu0 %vm454_vm8, %v551_v8 }
 0x504   :  { %819 = vmatpush.bf16.msrb.mxu1 %v2995_v42  ;;  %v2580_v42 = vld [vmem:[#allocation5 + $0x38] sm:$0xf0] }
 0x507   :  { %v617_v9 = vpop.xlane.xlu0 %616 }
 0x508   :  { %3187 = vrcp.f32 %v617_v9  ;;  %820 = vmatpush.bf16.msrb.mxu1 %v2994_v37  ;;  %v2583_v37 = vor.u32 %v3006_v40, %v2580_v42  ;;  %v900_v40 = vld [vmem:[%s3939_s13] sm:$0x3]  ;;  %v3025_v42 = vld [vmem:[#allocation7 + $0x48] sm:$0xff] }
 0x509   :  { %3189 = vrcp.f32 %v614_v10 }
 0x50c   :  { %821 = vmatpush.bf16.msrb.mxu1 %v2993_v43  ;;  %v2570_v43 = vld [vmem:[#allocation5 + $0x20] sm:$0xf] }
 0x50e   :  { %v3188_v29 = vpop.eup %3187 }
 0x50f   :  { %v685_v12 = vpop.xlane.xlu1 %684  ;;  %v3190_v13 = vpop.eup %3189  ;;  %v621_v16 = vmul.f32 %v3188_v29, %v3178_v53 }
 0x510   :  { %v620_v19 = vmul.f32 %v3190_v13, %v3176_v48  ;;  %822 = vmatpush.bf16.msrb.mxu1 %v2992_v44  ;;  %v2612_v13 = vld [vmem:[#allocation5 + $0x78] sm:$0xf0]  ;;  %v3005_v44 = vld [vmem:[#allocation5 + $0x24] sm:$0xf0] }
 0x512   :  { %v622_v23 = vpack.c.bf16 %v621_v16, %v620_v19  ;;  %v2602_v16 = vld [vmem:[#allocation5 + $0x60] sm:$0xf]  ;;  %v3012_v19 = vld [vmem:[#allocation5 + $0x64] sm:$0xf] }
 0x517   :  { %v688_v11 = vpop.xlane.xlu0 %687 }
 0x518   :  { %3191 = vrcp.f32 %v688_v11  ;;  %v3015_v11 = vld [vmem:[#allocation5 + $0x74] sm:$0xf0] }
 0x519   :  { %3193 = vrcp.f32 %v685_v12  ;;  %v3014_v12 = vld [vmem:[#allocation5 + $0x74] sm:$0xf] }
 0x51e   :  { %v3192_v14 = vpop.eup %3191 }
 0x51f   :  { %v3194_v17 = vpop.eup %3193  ;;  %v692_v21 = vmul.f32 %v3192_v14, %v3182_v22  ;;  %v2615_v14 = vor.u32 %v3014_v12, %v2612_v13 }
 0x520   :  { %v691_v24 = vmul.f32 %v3194_v17, %v3180_v58  ;;  %v3013_v17 = vld [vmem:[#allocation5 + $0x64] sm:$0xf0] }
 0x521   :  { %1000 = vmatpush.bf16.msrb.mxu3 %v2615_v14 }
 0x522   :  { %v693_v26 = vpack.c.bf16 %v692_v21, %v691_v24  ;;  %v2604_v21 = vld [vmem:[#allocation5 + $0x68] sm:$0xf0]  ;;  %v2594_v24 = vld [vmem:[#allocation5 + $0x50] sm:$0xf] }
 0x527   :  { %v624_v20 = vpop.permute.xlu1 %623 }
 0x528   :  { %636 = vmatpush.bf16.msrb.mxu2 %v624_v20  ;;  %v2603_v20 = vor.u32 %v3013_v17, %v2602_v16  ;;  %v3145_v16 = vld [vmem:[%s3936_s10] ss:$0 sm:$0xff] }
 0x52a   :  { %v695_v25 = vpop.permute.xlu0 %694 }
 0x52b   :  { %2517 = vmatmul.msk.bf16.vlgmr.msrb.gmra.mxu2 %vm454_vm8, %v622_v23  ;;  %707 = vmatpush.bf16.msra.mxu0 %v695_v25  ;;  %v2607_v23 = vor.u32 %v3012_v19, %v2604_v21  ;;  %v3011_v25 = vld [vmem:[#allocation5 + $0x54] sm:$0xf0] }
 0x52d   :  { %1001 = vmatpush.bf16.msrb.mxu3 %v2607_v23  ;;  %v3146_v23 = vld [vmem:[%s3937_s11] ss:$0 sm:$0xff] }
 0x52e   :  { %2519 = vmatmul.msk.bf16.vlgmr.msra.gmra.mxu0 %vm454_vm8, %v693_v26  ;;  %v3010_v26 = vld [vmem:[#allocation5 + $0x54] sm:$0xf] }
 0x580   :  { %v567_v27 = vpop.f32.mrf.mxu0 }
 0x588   :  { %v569_v28 = vpop.f32.mrf.mxu0 }
 0x589   :  { %v3111_v30 = vpack.i.bf16 %v569_v28, %v567_v27  ;;  %v2595_v27 = vor.u32 %v3011_v25, %v2594_v24  ;;  %v2596_v28 = vld [vmem:[#allocation5 + $0x58] sm:$0xf0] }
 0x58b   :  { %3112 = vrot.lane.b32.xlu2 %v3111_v30, %s3427_s4  ;;  %v2599_v30 = vor.u32 %v3010_v26, %v2596_v28  ;;  %v3031_v28 = vld [vmem:[#allocation7 + $0x78] sm:$0xff] }
 0x58c   :  { %1198 = vmatpush.bf16.msra.mxu1 %v3031_v28 }
 0x58d   :  { %1002 = vmatpush.bf16.msrb.mxu3 %v2599_v30  ;;  %v3030_v30 = vld [vmem:[#allocation7 + $0x70] sm:$0xff] }
 0x590   :  { %1199 = vmatpush.bf16.msra.mxu1 %v3030_v30 }
 0x5ab   :  { %v709_v33 = vpop.f32.mrf.mxu0 }
 0x5ae   :  { %v638_v31 = vpop.f32.mrf.mxu2 }
 0x5b3   :  { %v711_v36 = vpop.f32.mrf.mxu0 }
 0x5b4   :  { %v3121_v38 = vpack.i.bf16 %v711_v36, %v709_v33  ;;  %v3009_v33 = vld [vmem:[#allocation5 + $0x44] sm:$0xf0]  ;;  %v2588_v36 = vld [vmem:[#allocation5 + $0x48] sm:$0xf0] }
 0x5b6   :  { %v640_v34 = vpop.f32.mrf.mxu2 }
 0x5b7   :  { %v3116_v35 = vpack.i.bf16 %v640_v34, %v638_v31  ;;  %v2586_v31 = vld [vmem:[#allocation5 + $0x40] sm:$0xf]  ;;  %v3008_v34 = vld [vmem:[#allocation5 + $0x44] sm:$0xf] }
 0x5b9   :  { %3117 = vrot.lane.b32.xlu2 %v3116_v35, %s3422_s26  ;;  %v2587_v35 = vor.u32 %v3009_v33, %v2586_v31  ;;  %v3021_v31 = vld [vmem:[#allocation7 + $0x28] sm:$0xff] }
 0x5ba   :  { %v3029_v33 = vld [vmem:[#allocation7 + $0x68] sm:$0xff] }
 0x5bb   :  { %1200 = vmatpush.bf16.msra.mxu1 %v3029_v33 }
 0x5c1   :  { %3122 = vrot.lane.b32.xlu2 %v3121_v38, %s3426_s25  ;;  %v2591_v38 = vor.u32 %v3008_v34, %v2588_v36  ;;  %v3020_v34 = vld [vmem:[#allocation7 + $0x20] sm:$0xff]  ;;  %v3019_v36 = vld [vmem:[#allocation7 + $0x18] sm:$0xff] }
 0x5c3   :  { %1003 = vmatpush.bf16.msrb.mxu3 %v2591_v38  ;;  %v3027_v38 = vld [vmem:[#allocation7 + $0x58] sm:$0xff] }
 0x5c7   :  { %1004 = vmatpush.bf16.msrb.mxu3 %v2583_v37  ;;  %v902_v37 = vperm.slane %v900_v40, 0 }
 0x5e5   :  { %v3113_v45 = vpop.permute.xlu2 %3112 }
 0x5e6   :  { %v3115_v47 = vunpack.i.h.bf16 %v3113_v45  ;;  %v3114_v48 = vunpack.i.l.bf16 %v3113_v45  ;;  %v3004_v45 = vld [vmem:[#allocation5 + $0x24] sm:$0xf] }
 0x5e8   :  { %v739_v52 = vsel %vm429_vm7, %v3636_v4, %v3115_v47  ;;  %v738_v53 = vsel %vm429_vm7, %v3634_v3, %v3114_v48  ;;  %v2572_v47 = vld [vmem:[#allocation5 + $0x28] sm:$0xf0] }
 0x5e9   :  { %v2575_v48 = vor.u32 %v3004_v45, %v2572_v47  ;;  %v3024_v47 = vld [vmem:[#allocation7 + $0x40] sm:$0xff] }
 0x5eb   :  { %1005 = vmatpush.bf16.msrb.mxu3 %v2575_v48 }
 0x613   :  { %v3118_v46 = vpop.permute.xlu2 %3117 }
 0x614   :  { %v3120_v49 = vunpack.i.h.bf16 %v3118_v46  ;;  %v3119_v50 = vunpack.i.l.bf16 %v3118_v46  ;;  %v2571_v46 = vor.u32 %v3005_v44, %v2570_v43  ;;  %v903_v43 = vperm.slane %v900_v40, 1 }
 0x616   :  { %v741_v56 = vsel %vm740_vm9, %v738_v53, %v3119_v50  ;;  %v742_v57 = vsel %vm740_vm9, %v739_v52, %v3120_v49  ;;  %v2562_v49 = vld [vmem:[#allocation5 + $0x10] sm:$0xf]  ;;  %v3003_v50 = vld [vmem:[#allocation5 + $0x14] sm:$0xf0]  ;;  %v2564_v53 = vld [vmem:[#allocation5 + $0x18] sm:$0xf0] }
 0x617   :  { %v2563_v52 = vor.u32 %v3003_v50, %v2562_v49 }
 0x61b   :  { %v3123_v51 = vpop.permute.xlu2 %3122 }
 0x61c   :  { %v3125_v54 = vunpack.i.h.bf16 %v3123_v51  ;;  %v3124_v55 = vunpack.i.l.bf16 %v3123_v51  ;;  %v3002_v51 = vld [vmem:[#allocation5 + $0x14] sm:$0xf] }
 0x61e   :  { %v744_v58 = vsel %vm743_vm10, %v741_v56, %v3124_v55  ;;  %v745_v59 = vsel %vm743_vm10, %v742_v57, %v3125_v54  ;;  %v2554_v54 = vld [vmem:[#allocation5] sm:$0xf]  ;;  %v3001_v55 = vld [vmem:[#allocation5 + $0x4] sm:$0xf0]  ;;  %v2567_v57 = vor.u32 %v3002_v51, %v2564_v53 }
 0x61f   :  { %v746_v60 = vpack.c.bf16 %v745_v59, %v744_v58  ;;  %v3000_v58 = vld [vmem:[#allocation5 + $0x4] sm:$0xf]  ;;  %v2556_v59 = vld [vmem:[#allocation5 + $0x8] sm:$0xf0] }
 0x620   :  { %1006 = vmatpush.bf16.msrb.mxu3 %v2567_v57 }
 0x621   :  { %823 = vmatmul.bf16.vlgmr.msrb.gmra.mxu1 %v746_v60 }
 0x69e   :  { %v824_v4 = vpop.f32.mrf.mxu1 }
 0x69f   :  { %v825_v22 = vadd.f32 %v3144_v18, %v824_v4  ;;  %v2559_v4 = vor.u32 %v3000_v58, %v2556_v59 }
 0x6a1   :  { %v829_v3 = vadd.f32 %v825_v22, %v3591_v61  ;;  %1007 = vmatpush.bf16.msrb.mxu3 %v2559_v4 }
 0x6a3   :  { %833 = vadd.xlane.f32.xlu0 %v829_v3 }
 0x6a6   :  { %v826_v63 = vpop.f32.mrf.mxu1 }
 0x6a7   :  { %v827_v0 = vadd.f32 %v3144_v18, %v826_v63  ;;  %v2555_v18 = vor.u32 %v3001_v55, %v2554_v54 }
 0x6a9   :  { %v830_v1 = vadd.f32 %v827_v0, %v3593_v62  ;;  %v2610_v62 = vld [vmem:[#allocation5 + $0x70] sm:$0xf] }
 0x6aa   :  { %v2611_v29 = vor.u32 %v3015_v11, %v2610_v62 }
 0x6ab   :  { %835 = vadd.xlane.f32.xlu1 %v830_v1 }
 0x6ac   :  { %986 = vmatpush.bf16.msra.mxu2 %v2611_v29 }
 0x6b0   :  { %987 = vmatpush.bf16.msra.mxu2 %v2603_v20 }
 0x6b4   :  { %988 = vmatpush.bf16.msra.mxu2 %v2595_v27  ;;  %v3023_v27 = vld [vmem:[#allocation7 + $0x38] sm:$0xff] }
 0x6b5   :  { %1184 = vmatpush.bf16.msrb.mxu0 %v3023_v27 }
 0x6b8   :  { %989 = vmatpush.bf16.msra.mxu2 %v2587_v35  ;;  %v3028_v35 = vld [vmem:[#allocation7 + $0x60] sm:$0xff] }
 0x6b9   :  { %1201 = vmatpush.bf16.msra.mxu1 %v3028_v35 }
 0x6bc   :  { %990 = vmatpush.bf16.msra.mxu2 %v2579_v41  ;;  %v3017_v41 = vld [vmem:[#allocation7 + $0x8] sm:$0xff] }
 0x6bd   :  { %1202 = vmatpush.bf16.msra.mxu1 %v3027_v38 }
 0x6c0   :  { %991 = vmatpush.bf16.msra.mxu2 %v2571_v46  ;;  %v3016_v46 = vld [vmem:[#allocation7] sm:$0xff] }
 0x6c1   :  { %1203 = vmatpush.bf16.msra.mxu1 %v3026_v32 }
 0x6c4   :  { %992 = vmatpush.bf16.msra.mxu2 %v2563_v52 }
 0x6c5   :  { %1204 = vmatpush.bf16.msra.mxu1 %v3025_v42 }
 0x6c8   :  { %993 = vmatpush.bf16.msra.mxu2 %v2555_v18 }
 0x6c9   :  { %1205 = vmatpush.bf16.msra.mxu1 %v3024_v47 }
 0x716   :  { %v834_v2 = vpop.xlane.xlu0 %833 }
 0x717   :  { %v837_v5 = vmul.f32 %v834_v2, %v3569_v15 }
 0x719   :  { %v3706_v6 = vsub.f32 %v829_v3, %v837_v5 }
 0x71b   :  { %v841_v7 = vmul.f32 %v3706_v6, %v3706_v6 }
 0x71d   :  { %843 = vadd.xlane.f32.xlu2 %v841_v7 }
 0x71e   :  { %v836_v8 = vpop.xlane.xlu1 %835 }
 0x71f   :  { %v838_v9 = vmul.f32 %v836_v8, %v3569_v15 }
 0x721   :  { %v3711_v10 = vsub.f32 %v830_v1, %v838_v9 }
 0x723   :  { %v842_v61 = vmul.f32 %v3711_v10, %v3711_v10 }
 0x725   :  { %845 = vadd.xlane.f32.xlu0 %v842_v61 }
 0x790   :  { %v844_v56 = vpop.xlane.xlu2 %843 }
 0x791   :  { %v847_v60 = vmul.f32 %v844_v56, %v3569_v15 }
 0x793   :  { %v849_v22 = vadd.f32 1e-12, %v847_v60 }
 0x795   :  { %3195 = vrsqrt.f32 %v849_v22  ;;  %vm857_vm12 = vweird.f32 %v849_v22 }
 0x798   :  { %v846_v3 = vpop.xlane.xlu0 %845 }
 0x799   :  { %v848_v63 = vmul.f32 %v846_v3, %v3569_v15 }
 0x79b   :  { %v3196_v0 = vpop.eup %3195  ;;  %v850_v1 = vadd.f32 1e-12, %v848_v63 }
 0x79c   :  { %v852_v2 = vmul.f32 %v3196_v0, %v849_v22  ;;  %vm858_vm11 = vweird.f32 %v3196_v0 }
 0x79d   :  { %3197 = vrsqrt.f32 %v850_v1  ;;  %vm859_vm13 = vmor %vm857_vm12, %vm858_vm11  ;;  %vm867_vm15 = vweird.f32 %v850_v1 }
 0x79e   :  { %v853_v5 = vmul.f32 %v3196_v0, %v852_v2 }
 0x7a0   :  { %v854_v7 = vmul.f32 0.5, %v853_v5 }
 0x7a2   :  { %v855_v8 = vsub.f32 1.5, %v854_v7 }
 0x7a3   :  { %v3198_v9 = vpop.eup %3197 }
 0x7a4   :  { %v856_v61 = vmul.f32 %v3196_v0, %v855_v8  ;;  %v862_v62 = vmul.f32 %v3198_v9, %v850_v1  ;;  %vm868_vm14 = vweird.f32 %v3198_v9 }
 0x7a5   :  { %vm869_vm0 = vmor %vm867_vm15, %vm868_vm14 }
 0x7a6   :  { %v863_v11 = vmul.f32 %v3198_v9, %v862_v62  ;;  %v860_v12 = vsel %vm859_vm13, %v3196_v0, %v856_v61 }
 0x7a7   :  { %v871_v14 = vmul.f32 %v860_v12, %v3706_v6 }
 0x7a8   :  { %v864_v29 = vmul.f32 0.5, %v863_v11 }
 0x7a9   :  { %v876_v21 = vmul.f32 %v3145_v16, %v871_v14 }
 0x7aa   :  { %v865_v13 = vsub.f32 1.5, %v864_v29 }
 0x7ab   :  { %v3725_v25 = vadd.f32 %v3146_v23, %v876_v21 }
 0x7ac   :  { %v866_v17 = vmul.f32 %v3198_v9, %v865_v13 }
 0x7ae   :  { %v870_v19 = vsel %vm869_vm0, %v3198_v9, %v866_v17 }
 0x7af   :  { %v872_v20 = vmul.f32 %v870_v19, %v3711_v10  ;;  %v3022_v10 = vld [vmem:[#allocation7 + $0x30] sm:$0xff] }
 0x7b0   :  { %1185 = vmatpush.bf16.msrb.mxu0 %v3022_v10 }
 0x7b1   :  { %v877_v24 = vmul.f32 %v3145_v16, %v872_v20 }
 0x7b3   :  { %v3727_v26 = vadd.f32 %v3146_v23, %v877_v24 }
 0x7b4   :  { %1186 = vmatpush.bf16.msrb.mxu0 %v3021_v31  ;;  %v3147_v31 = vld [vmem:[%s3941_s15] ss:$0 sm:$0xff] }
 0x7b5   :  { %v883_v6 = vpack.c.bf16 %v3727_v26, %v3725_v25 }
 0x7b7   :  { %994 = vmatmul.bf16.vlgmr.msra.gmra.mxu2 %v883_v6  ;;  %1008 = vmatmul.bf16.vlgmr.msrb.gmra.mxu3 %v883_v6 }
 0x7b8   :  { %1187 = vmatpush.bf16.msrb.mxu0 %v3020_v34 }
 0x7bc   :  { %1188 = vmatpush.bf16.msrb.mxu0 %v3019_v36 }
 0x7c0   :  { %1189 = vmatpush.bf16.msrb.mxu0 %v3018_v39 }
 0x7c4   :  { %1190 = vmatpush.bf16.msrb.mxu0 %v3017_v41 }
 0x7c8   :  { %1191 = vmatpush.bf16.msrb.mxu0 %v3016_v46 }
 0x83a   :  { %v995_v44 = vpop.f32.mrf.mxu2  ;;  %v1009_v45 = vpop.f32.mrf.mxu3 }
 0x83b   :  { %v996_v48 = vadd.f32 %v995_v44, %v902_v37  ;;  %v1010_v49 = vadd.f32 %v1009_v45, %v903_v43 }
 0x83d   :  { %v1014_v50 = vmul.f32 %v996_v48, %v996_v48  ;;  %v1015_v51 = vmul.f32 %v1010_v49, %v1010_v49 }
 0x83f   :  { %v1018_v52 = vmul.f32 %v1014_v50, %v996_v48  ;;  %v1019_v53 = vmul.f32 %v1015_v51, %v1010_v49  ;;  %v3053_v50 = vld [vmem:[#allocation2 + $0x16c] sm:$0xf] }
 0x841   :  { %v1022_v54 = vmul.f32 0.044715, %v1018_v52  ;;  %v1023_v55 = vmul.f32 0.044715, %v1019_v53  ;;  %v2769_v52 = vld [vmem:[#allocation2 + $0x174] sm:$0xf0] }
 0x842   :  { %v997_v56 = vpop.f32.mrf.mxu2  ;;  %v1011_v57 = vpop.f32.mrf.mxu3  ;;  %v2775_v53 = vld [vmem:[#allocation2 + $0x170] sm:$0xf] }
 0x843   :  { %v1026_v58 = vadd.f32 %v1022_v54, %v996_v48  ;;  %v1027_v59 = vadd.f32 %v1023_v55, %v1010_v49  ;;  %v998_v60 = vadd.f32 %v997_v56, %v902_v37  ;;  %v1012_v18 = vadd.f32 %v1011_v57, %v903_v43  ;;  %v3055_v54 = vld [vmem:[#allocation2 + $0x178] sm:$0xf0]  ;;  %v2755_v57 = vld [vmem:[#allocation2 + $0x150] sm:$0xf] }
 0x844   :  { %v2772_v55 = vor.u32 %v3053_v50, %v2769_v52  ;;  %v2776_v56 = vor.u32 %v3055_v54, %v2775_v53  ;;  %v3033_v52 = vld [vmem:[#allocation2 + $0xc8] sm:$0xf0]  ;;  %v3032_v53 = vld [vmem:[#allocation2 + $0xc4] sm:$0xf] }
 0x845   :  { %v1030_v4 = vmul.f32 0.7978846, %v1026_v58  ;;  %v1016_v22 = vmul.f32 %v998_v60, %v998_v60  ;;  %v1017_v3 = vmul.f32 %v1012_v18, %v1012_v18  ;;  %v1031_v63 = vmul.f32 0.7978846, %v1027_v59  ;;  %v3051_v58 = vld [vmem:[#allocation2 + $0x158] sm:$0xf0] }
 0x846   :  { %1451 = vmatpush.bf16.msra.mxu3 %v2772_v55  ;;  %1465 = vmatpush.bf16.msra.mxu0 %v2776_v56  ;;  %v3050_v59 = vld [vmem:[#allocation2 + $0x154] sm:$0xf]  ;;  %v2685_v56 = vld [vmem:[#allocation2 + $0xcc] sm:$0xf0] }
 0x847   :  { %v1020_v0 = vmul.f32 %v1016_v22, %v998_v60  ;;  %v1021_v1 = vmul.f32 %v1017_v3, %v1012_v18  ;;  %3199 = vtanh.f32 %v1030_v4  ;;  %v2763_v4 = vld [vmem:[#allocation2 + $0x158] sm:$0xf]  ;;  %v3052_v22 = vld [vmem:[#allocation2 + $0x160] sm:$0xf0] }
 0x848   :  { %3201 = vtanh.f32 %v1031_v63  ;;  %v2764_v63 = vor.u32 %v3052_v22, %v2763_v4 }
 0x849   :  { %v1024_v2 = vmul.f32 0.044715, %v1020_v0  ;;  %v1025_v5 = vmul.f32 0.044715, %v1021_v1  ;;  %v2743_v0 = vld [vmem:[#allocation2 + $0x138] sm:$0xf] }
 0x84a   :  { %1466 = vmatpush.bf16.msra.mxu0 %v2764_v63  ;;  %v3048_v1 = vld [vmem:[#allocation2 + $0x140] sm:$0xf0] }
 0x84b   :  { %v1028_v7 = vadd.f32 %v1024_v2, %v998_v60  ;;  %v1029_v8 = vadd.f32 %v1025_v5, %v1012_v18  ;;  %v3047_v2 = vld [vmem:[#allocation2 + $0x13c] sm:$0xf]  ;;  %v2744_v5 = vor.u32 %v3048_v1, %v2743_v0 }
 0x84d   :  { %v1032_v9 = vmul.f32 0.7978846, %v1028_v7  ;;  %v1033_v61 = vmul.f32 0.7978846, %v1029_v8  ;;  %v3200_v62 = vpop.eup %3199  ;;  %v2745_v7 = vld [vmem:[#allocation2 + $0x144] sm:$0xf0] }
 0x84e   :  { %v3202_v11 = vpop.eup %3201  ;;  %v1038_v12 = vadd.f32 1.0, %v3200_v62  ;;  %v2751_v8 = vld [vmem:[#allocation2 + $0x140] sm:$0xf] }
 0x84f   :  { %3203 = vtanh.f32 %v1032_v9  ;;  %v1039_v29 = vadd.f32 1.0, %v3202_v11  ;;  %v3049_v9 = vld [vmem:[#allocation2 + $0x148] sm:$0xf0]  ;;  %v2731_v11 = vld [vmem:[#allocation2 + $0x120] sm:$0xf] }
 0x850   :  { %3205 = vtanh.f32 %v1033_v61  ;;  %v1042_v16 = vmul.f32 0.5, %v1038_v12  ;;  %v2748_v61 = vor.u32 %v3047_v2, %v2745_v7  ;;  %v2752_v62 = vor.u32 %v3049_v9, %v2751_v8  ;;  %v3045_v12 = vld [vmem:[#allocation2 + $0x128] sm:$0xf0] }
 0x851   :  { %v1043_v19 = vmul.f32 0.5, %v1039_v29  ;;  %v3044_v29 = vld [vmem:[#allocation2 + $0x124] sm:$0xf] }
 0x852   :  { %v1046_v24 = vmul.f32 %v1042_v16, %v996_v48  ;;  %1467 = vmatpush.bf16.msra.mxu0 %v2752_v62  ;;  %v2739_v16 = vld [vmem:[#allocation2 + $0x128] sm:$0xf] }
 0x853   :  { %v1047_v27 = vmul.f32 %v1043_v19, %v1010_v49  ;;  %v3054_v49 = vld [vmem:[#allocation2 + $0x170] sm:$0xf0] }
 0x855   :  { %v3204_v13 = vpop.eup %3203 }
 0x856   :  { %v3206_v14 = vpop.eup %3205  ;;  %v1040_v17 = vadd.f32 1.0, %v3204_v13  ;;  %v2732_v13 = vor.u32 %v3045_v12, %v2731_v11 }
 0x857   :  { %v1041_v20 = vadd.f32 1.0, %v3206_v14  ;;  %v2733_v14 = vld [vmem:[#allocation2 + $0x12c] sm:$0xf0] }
 0x858   :  { %v1044_v21 = vmul.f32 0.5, %v1040_v17  ;;  %v3046_v17 = vld [vmem:[#allocation2 + $0x130] sm:$0xf0]  ;;  %v2736_v19 = vor.u32 %v3044_v29, %v2733_v14 }
 0x859   :  { %v1045_v23 = vmul.f32 0.5, %v1041_v20  ;;  %v2740_v20 = vor.u32 %v3046_v17, %v2739_v16 }
 0x85a   :  { %v1048_v6 = vmul.f32 %v1044_v21, %v998_v60  ;;  %v2756_v60 = vor.u32 %v3051_v58, %v2755_v57  ;;  %v2719_v21 = vld [vmem:[#allocation2 + $0x108] sm:$0xf]  ;;  %v3034_v58 = vld [vmem:[#allocation2 + $0xd0] sm:$0xf0] }
 0x85b   :  { %v1049_v28 = vmul.f32 %v1045_v23, %v1012_v18  ;;  %v2757_v18 = vld [vmem:[#allocation2 + $0x15c] sm:$0xf0]  ;;  %1468 = vmatpush.bf16.msra.mxu0 %v2740_v20  ;;  %v3042_v23 = vld [vmem:[#allocation2 + $0x110] sm:$0xf0]  ;;  %v2691_v57 = vld [vmem:[#allocation2 + $0xc8] sm:$0xf] }
 0x85c   :  { %v1050_v10 = vpack.c.bf16 %v1048_v6, %v1046_v24  ;;  %v2760_v3 = vor.u32 %v3050_v59, %v2757_v18  ;;  %v3041_v24 = vld [vmem:[#allocation2 + $0x10c] sm:$0xf]  ;;  %v2720_v6 = vor.u32 %v3042_v23, %v2719_v21  ;;  %v2688_v59 = vor.u32 %v3032_v53, %v2685_v56  ;;  %v3149_v20 = vld [vmem:[%s3943_s17] ss:$0 sm:$0xff] }
 0x85d   :  { %v1051_v30 = vpack.c.bf16 %v1049_v28, %v1047_v27  ;;  %v2721_v27 = vld [vmem:[#allocation2 + $0x114] sm:$0xf0]  ;;  %v2727_v28 = vld [vmem:[#allocation2 + $0x110] sm:$0xf] }
 0x85e   :  { %1192 = vmatmul.bf16.vlgmr.msrb.gmra.mxu0 %v1050_v10  ;;  %1452 = vmatpush.bf16.msra.mxu3 %v2760_v3  ;;  %v3043_v10 = vld [vmem:[#allocation2 + $0x118] sm:$0xf0] }
 0x85f   :  { %1206 = vmatmul.bf16.vlgmr.msra.gmra.mxu1 %v1051_v30  ;;  %v2724_v30 = vor.u32 %v3041_v24, %v2721_v27 }
 0x862   :  { %1453 = vmatpush.bf16.msra.mxu3 %v2748_v61 }
 0x866   :  { %1454 = vmatpush.bf16.msra.mxu3 %v2736_v19 }
 0x86a   :  { %1455 = vmatpush.bf16.msra.mxu3 %v2724_v30 }
 0x8db   :  { %v1193_v33 = vpop.f32.mrf.mxu0 }
 0x8dc   :  { %v1194_v34 = vadd.f32 %v3147_v31, %v1193_v33  ;;  %v1207_v35 = vpop.f32.mrf.mxu1  ;;  %v2707_v33 = vld [vmem:[#allocation2 + $0xf0] sm:$0xf] }
 0x8de   :  { %v1208_v36 = vadd.f32 %v1207_v35, %v1194_v34  ;;  %v3039_v34 = vld [vmem:[#allocation2 + $0xf8] sm:$0xf0]  ;;  %v3038_v35 = vld [vmem:[#allocation2 + $0xf4] sm:$0xf] }
 0x8e0   :  { %v1212_v38 = vadd.f32 %v1208_v36, %v3725_v25  ;;  %v2708_v36 = vor.u32 %v3039_v34, %v2707_v33 }
 0x8e2   :  { %1216 = vadd.xlane.f32.xlu1 %v1212_v38 }
 0x8e3   :  { %v1195_v39 = vpop.f32.mrf.mxu0 }
 0x8e4   :  { %v1196_v32 = vadd.f32 %v3147_v31, %v1195_v39  ;;  %v1209_v40 = vpop.f32.mrf.mxu1  ;;  %v2728_v31 = vor.u32 %v3043_v10, %v2727_v28  ;;  %v2715_v39 = vld [vmem:[#allocation2 + $0xf8] sm:$0xf] }
 0x8e6   :  { %v1210_v41 = vadd.f32 %v1209_v40, %v1196_v32  ;;  %1469 = vmatpush.bf16.msra.mxu0 %v2728_v31  ;;  %v3040_v32 = vld [vmem:[#allocation2 + $0x100] sm:$0xf0] }
 0x8e8   :  { %v1213_v42 = vadd.f32 %v1210_v41, %v3727_v26  ;;  %v2767_v26 = vld [vmem:[#allocation2 + $0x168] sm:$0xf]  ;;  %v2716_v41 = vor.u32 %v3040_v32, %v2715_v39 }
 0x8e9   :  { %v2768_v51 = vor.u32 %v3054_v49, %v2767_v26 }
 0x8ea   :  { %1218 = vadd.xlane.f32.xlu2 %v1213_v42  ;;  %1470 = vmatpush.bf16.msra.mxu0 %v2716_v41 }
 0x8eb   :  { %1437 = vmatpush.bf16.msrb.mxu2 %v2768_v51  ;;  %v2683_v51 = vld [vmem:[#allocation2 + $0xc0] sm:$0xf] }
 0x8ec   :  { %v2684_v55 = vor.u32 %v3033_v52, %v2683_v51 }
 0x8ef   :  { %1438 = vmatpush.bf16.msrb.mxu2 %v2756_v60  ;;  %v2692_v60 = vor.u32 %v3034_v58, %v2691_v57 }
 0x8f3   :  { %1439 = vmatpush.bf16.msrb.mxu2 %v2744_v5 }
 0x8f7   :  { %1440 = vmatpush.bf16.msrb.mxu2 %v2732_v13  ;;  %v3148_v13 = vld [vmem:[%s3942_s16] ss:$0 sm:$0xff] }
 0x8fb   :  { %1441 = vmatpush.bf16.msrb.mxu2 %v2720_v6 }
 0x8ff   :  { %1442 = vmatpush.bf16.msrb.mxu2 %v2708_v36 }
 0x955   :  { %v1217_v37 = vpop.xlane.xlu1 %1216 }
 0x956   :  { %v1220_v43 = vmul.f32 %v1217_v37, %v3569_v15  ;;  %v3036_v37 = vld [vmem:[#allocation2 + $0xe0] sm:$0xf0] }
 0x958   :  { %v3740_v44 = vsub.f32 %v1212_v38, %v1220_v43  ;;  %v2709_v38 = vld [vmem:[#allocation2 + $0xfc] sm:$0xf0]  ;;  %v3035_v43 = vld [vmem:[#allocation2 + $0xdc] sm:$0xf] }
 0x959   :  { %v2712_v40 = vor.u32 %v3038_v35, %v2709_v38 }
 0x95a   :  { %v1224_v45 = vmul.f32 %v3740_v44, %v3740_v44 }
 0x95b   :  { %1456 = vmatpush.bf16.msra.mxu3 %v2712_v40 }
 0x95c   :  { %1226 = vadd.xlane.f32.xlu0 %v1224_v45 }
 0x95d   :  { %v1219_v46 = vpop.xlane.xlu2 %1218 }
 0x95e   :  { %v1221_v25 = vmul.f32 %v1219_v46, %v3569_v15  ;;  %v2697_v46 = vld [vmem:[#allocation2 + $0xe4] sm:$0xf0] }
 0x95f   :  { %v2700_v49 = vor.u32 %v3035_v43, %v2697_v46 }
 0x960   :  { %v3745_v47 = vsub.f32 %v1213_v42, %v1221_v25  ;;  %v2695_v42 = vld [vmem:[#allocation2 + $0xd8] sm:$0xf]  ;;  %v2703_v25 = vld [vmem:[#allocation2 + $0xe0] sm:$0xf] }
 0x961   :  { %v2696_v45 = vor.u32 %v3036_v37, %v2695_v42  ;;  %1457 = vmatpush.bf16.msra.mxu3 %v2700_v49 }
 0x962   :  { %v1225_v48 = vmul.f32 %v3745_v47, %v3745_v47 }
 0x963   :  { %1443 = vmatpush.bf16.msrb.mxu2 %v2696_v45 }
 0x964   :  { %1228 = vadd.xlane.f32.xlu1 %v1225_v48  ;;  %v3037_v48 = vld [vmem:[#allocation2 + $0xe8] sm:$0xf0] }
 0x965   :  { %v2704_v50 = vor.u32 %v3037_v48, %v2703_v25  ;;  %1458 = vmatpush.bf16.msra.mxu3 %v2688_v59 }
 0x967   :  { %1471 = vmatpush.bf16.msra.mxu0 %v2704_v50  ;;  %1444 = vmatpush.bf16.msrb.mxu2 %v2684_v55 }
 0x96b   :  { %1472 = vmatpush.bf16.msra.mxu0 %v2692_v60 }
 0x9cf   :  { %v1227_v26 = vpop.xlane.xlu0 %1226 }
 0x9d0   :  { %v1230_v54 = vmul.f32 %v1227_v26, %v3569_v15 }
 0x9d2   :  { %v1232_v18 = vadd.f32 1e-12, %v1230_v54 }
 0x9d4   :  { %3207 = vrsqrt.f32 %v1232_v18  ;;  %vm1240_vm2 = vweird.f32 %v1232_v18 }
 0x9d7   :  { %v1229_v4 = vpop.xlane.xlu1 %1228 }
 0x9d8   :  { %v1231_v22 = vmul.f32 %v1229_v4, %v3569_v15 }
 0x9da   :  { %v3208_v3 = vpop.eup %3207  ;;  %v1233_v63 = vadd.f32 1e-12, %v1231_v22 }
 0x9db   :  { %v1235_v0 = vmul.f32 %v3208_v3, %v1232_v18  ;;  %vm1241_vm1 = vweird.f32 %v3208_v3 }
 0x9dc   :  { %3209 = vrsqrt.f32 %v1233_v63  ;;  %vm1242_vm3 = vmor %vm1240_vm2, %vm1241_vm1  ;;  %vm1250_vm5 = vweird.f32 %v1233_v63 }
 0x9dd   :  { %v1236_v1 = vmul.f32 %v3208_v3, %v1235_v0  ;;  %v3259_v0 = vld [vmem:[%s3962_s12] sm:$0xff] }
 0x9df   :  { %v1237_v2 = vmul.f32 0.5, %v1236_v1 }
 0x9e1   :  { %v1238_v5 = vsub.f32 1.5, %v1237_v2 }
 0x9e2   :  { %v3210_v7 = vpop.eup %3209 }
 0x9e3   :  { %v1239_v8 = vmul.f32 %v3208_v3, %v1238_v5  ;;  %v1245_v9 = vmul.f32 %v3210_v7, %v1233_v63  ;;  %vm1251_vm4 = vweird.f32 %v3210_v7 }
 0x9e4   :  { %vm1252_vm6 = vmor %vm1250_vm5, %vm1251_vm4 }
 0x9e5   :  { %v1246_v61 = vmul.f32 %v3210_v7, %v1245_v9  ;;  %v1243_v62 = vsel %vm1242_vm3, %v3208_v3, %v1239_v8  ;;  %v3260_v8 = vld [vmem:[%s3962_s12 + $0x8] sm:$0xff]  ;;  %vm2337_vm3 = vcmask 1040384  }
 0x9e6   :  { %v1254_v29 = vmul.f32 %v1243_v62, %v3740_v44 }
 0x9e7   :  { %v1247_v11 = vmul.f32 0.5, %v1246_v61 }
 0x9e8   :  { %v1259_v19 = vmul.f32 %v3148_v13, %v1254_v29 }
 0x9e9   :  { %v1248_v12 = vsub.f32 1.5, %v1247_v11 }
 0x9ea   :  { %v3759_v23 = vadd.f32 %v3149_v20, %v1259_v19 }
 0x9eb   :  { %v1249_v14 = vmul.f32 %v3210_v7, %v1248_v12 }
 0x9ed   :  { %v1253_v16 = vsel %vm1252_vm6, %v3210_v7, %v1249_v14 }
 0x9ee   :  { %v1255_v17 = vmul.f32 %v1253_v16, %v3745_v47  ;;  %v2680_v47 = vld [vmem:[%s3933_s7 + $0x3] sm:$0x7] }
 0x9ef   :  { %v1305_v27 = vperm.slane %v2680_v47, 2  ;;  %v1303_v31 = vperm.slane %v2680_v47, 0  ;;  %v1304_v33 = vperm.slane %v2680_v47, 1 }
 0x9f0   :  { %v1260_v21 = vmul.f32 %v3148_v13, %v1255_v17 }
 0x9f2   :  { %v3761_v24 = vadd.f32 %v3149_v20, %v1260_v21 }
 0x9f4   :  { %v1266_v44 = vpack.c.bf16 %v3761_v24, %v3759_v23 }
 0x9f6   :  { %1445 = vmatmul.bf16.vlgmr.msrb.gmra.mxu2 %v1266_v44  ;;  %1459 = vmatmul.bf16.vlgmr.msra.gmra.mxu3 %v1266_v44 }
 0x9f7   :  { %1473 = vmatmul.bf16.vlgmr.msra.gmra.mxu0 %v1266_v44 }
 0xa74   :  { %v1474_v6 = vpop.f32.mrf.mxu0 }
 0xa75   :  { %v1475_v28 = vadd.f32 %v1474_v6, %v1305_v27 }
 0xa77   :  { %v1480_v35 = vpack.c.bf16 %v1475_v28, %v1475_v28 }
 0xa79   :  { %v1446_v10 = vpop.f32.mrf.mxu2  ;;  %v1460_v30 = vpop.f32.mrf.mxu3  ;;  %v1540_v40 = vunpack.c.l.b16 %v1480_v35 }
 0xa7a   :  { %v1447_v38 = vadd.f32 %v1446_v10, %v1303_v31  ;;  %v1461_v39 = vadd.f32 %v1460_v30, %v1304_v33 }
 0xa7c   :  { %v1476_v34 = vpop.f32.mrf.mxu0  ;;  %v1479_v43 = vpack.c.bf16 %v1461_v39, %v1447_v38 }
 0xa7d   :  { %v1477_v36 = vadd.f32 %v1476_v34, %v1305_v27 }
 0xa7e   :  { %v1485_v26 = vunpack.c.l.b16 %v1479_v43  ;;  %v1488_v49 = vunpack.c.h.b16 %v1479_v43 }
 0xa7f   :  { %v1482_v32 = vpack.c.bf16 %v1477_v36, %v1477_v36 }
 0xa81   :  { %v1541_v41 = vunpack.c.l.b16 %v1482_v32  ;;  %v1448_v42 = vpop.f32.mrf.mxu2  ;;  %v1462_v37 = vpop.f32.mrf.mxu3 }
 0xa82   :  { %v1449_v45 = vadd.f32 %v1448_v42, %v1303_v31  ;;  %v1463_v46 = vadd.f32 %v1462_v37, %v1304_v33 }
 0xa83   :  { %v3768_v25 = vpack.c.b16 %v1541_v41, %v1540_v40 }
 0xa84   :  { %v1481_v48 = vpack.c.bf16 %v1463_v46, %v1449_v45 }
 0xa85   :  { %1554 = vmatpush.bf16.msra.mxu2 %v3768_v25 }
 0xa86   :  { %v1486_v50 = vunpack.c.l.b16 %v1481_v48  ;;  %v1489_v51 = vunpack.c.h.b16 %v1481_v48 }
 0xa88   :  { %v1487_v52 = vpack.c.b16 %v1486_v50, %v1485_v26  ;;  %v1490_v53 = vpack.c.b16 %v1489_v51, %v1488_v49 }
 0xa8a   :  { %1634 = vrot.lane.b32.xlu1 %v1490_v53, %s3422_s26  ;;  %1563 = vrot.lane.b32.xlu2 %v1490_v53, %s3426_s25  ;;  %v1495_v54 = vsel %vm429_vm7, %v1490_v53, 0 }
 0xa8b   :  { %1561 = vrot.lane.b32.xlu0 %v1487_v52, %s3426_s25  ;;  %1504 = vmatpush.bf16.xpose.msrb.mxu1 %v1495_v54 }
 0xa92   :  { %1703 = vrot.lane.b32.xlu1 %v1487_v52, %s3427_s4  ;;  %1632 = vrot.lane.b32.xlu2 %v1487_v52, %s3422_s26 }
 0xa93   :  { %1705 = vrot.lane.b32.xlu0 %v1490_v53, %s3427_s4  ;;  %2777 = vmatmul.msk.bf16.vlgmr.msrb.gmra.mxu1 %vm429_vm7, %v1487_v52 }
 0xae4   :  { %v1564_v55 = vpop.permute.xlu2 %1563 }
 0xae5   :  { %v1569_v56 = vsel %vm429_vm7, %v1564_v55, 0 }
 0xae6   :  { %1578 = vmatpush.bf16.xpose.msrb.mxu3 %v1569_v56 }
 0xaec   :  { %v1633_v60 = vpop.permute.xlu2 %1632 }
 0xafc   :  { %v1635_v57 = vpop.permute.xlu1 %1634 }
 0xafd   :  { %v1640_v58 = vsel %vm429_vm7, %v1635_v57, 0  ;;  %v1562_v59 = vpop.permute.xlu0 %1561 }
 0xafe   :  { %2779 = vmatmul.msk.bf16.vlgmr.msrb.gmra.mxu3 %vm429_vm7, %v1562_v59  ;;  %1649 = vmatpush.bf16.xpose.msra.mxu1 %v1640_v58 }
 0xb04   :  { %v1704_v22 = vpop.permute.xlu1 %1703 }
 0xb05   :  { %v1706_v18 = vpop.permute.xlu0 %1705  ;;  %2781 = vmatmul.msk.bf16.vlgmr.msra.gmra.mxu1 %vm429_vm7, %v1633_v60 }
 0xb06   :  { %v1711_v4 = vsel %vm429_vm7, %v1706_v18, 0 }
 0xb07   :  { %1720 = vmatpush.bf16.xpose.msra.mxu3 %v1711_v4 }
 0xb0e   :  { %2783 = vmatmul.msk.bf16.vlgmr.msra.gmra.mxu3 %vm429_vm7, %v1704_v22 }
 0xb10   :  { %v1506_v3 = vpop.f32.mrf.mxu1 }
 0xb11   :  { %v1511_v63 = vmul.f32 0.17677669, %v1506_v3 }
 0xb13   :  { %v1513_v1 = vadd.f32 %v3259_v0, %v1511_v63 }
 0xb15   :  { %v1515_v2 = vsel %vm454_vm8, %v1513_v1, -inf }
 0xb16   :  { %1516 = vmax.xlane.f32.xlu0 %v1515_v2 }
 0xb18   :  { %v1508_v5 = vpop.f32.mrf.mxu1 }
 0xb19   :  { %v1512_v7 = vmul.f32 0.17677669, %v1508_v5 }
 0xb1b   :  { %v1514_v9 = vadd.f32 %v3260_v8, %v1512_v7 }
 0xb1d   :  { %v1518_v61 = vsel %vm454_vm8, %v1514_v9, -inf }
 0xb1e   :  { %1519 = vmax.xlane.f32.xlu2 %v1518_v61 }
 0xb81   :  { %v1580_v62 = vpop.f32.mrf.mxu3 }
 0xb82   :  { %v1585_v11 = vmul.f32 0.17677669, %v1580_v62  ;;  %v1651_v12 = vpop.f32.mrf.mxu1 }
 0xb83   :  { %v1656_v29 = vmul.f32 0.17677669, %v1651_v12 }
 0xb84   :  { %v1587_v13 = vadd.f32 %v3259_v0, %v1585_v11 }
 0xb85   :  { %v1658_v14 = vadd.f32 %v3259_v0, %v1656_v29 }
 0xb86   :  { %v1589_v16 = vsel %vm454_vm8, %v1587_v13, -inf }
 0xb87   :  { %1590 = vmax.xlane.f32.xlu1 %v1589_v16  ;;  %v1660_v17 = vsel %vm454_vm8, %v1658_v14, -inf }
 0xb88   :  { %1661 = vmax.xlane.f32.xlu2 %v1660_v17 }
 0xb89   :  { %v1582_v19 = vpop.f32.mrf.mxu3  ;;  %v1517_v20 = vpop.xlane.xlu0 %1516 }
 0xb8a   :  { %v1586_v21 = vmul.f32 0.17677669, %v1582_v19  ;;  %v1521_v44 = vsub.f32 %v1513_v1, %v1517_v20  ;;  %v1653_v47 = vpop.f32.mrf.mxu1 }
 0xb8b   :  { %v1657_v6 = vmul.f32 0.17677669, %v1653_v47 }
 0xb8c   :  { %v1523_v27 = vmul.f32 1.442695, %v1521_v44  ;;  %v1588_v28 = vadd.f32 %v3260_v8, %v1586_v21 }
 0xb8d   :  { %v1659_v10 = vadd.f32 %v3260_v8, %v1657_v6 }
 0xb8e   :  { %3211 = vpow2.f32 %v1523_v27  ;;  %v1592_v30 = vsel %vm454_vm8, %v1588_v28, -inf }
 0xb8f   :  { %1593 = vmax.xlane.f32.xlu0 %v1592_v30  ;;  %v1663_v31 = vsel %vm454_vm8, %v1659_v10, -inf }
 0xb90   :  { %1664 = vmax.xlane.f32.xlu1 %v1663_v31 }
 0xb91   :  { %v1722_v33 = vpop.f32.mrf.mxu3  ;;  %v1520_v34 = vpop.xlane.xlu2 %1519 }
 0xb92   :  { %v1727_v35 = vmul.f32 0.17677669, %v1722_v33  ;;  %v1522_v36 = vsub.f32 %v1514_v9, %v1520_v34 }
 0xb94   :  { %v3797_v38 = vpop.eup %3211  ;;  %v1525_v39 = vmul.f32 1.442695, %v1522_v36  ;;  %v1729_v32 = vadd.f32 %v3259_v0, %v1727_v35 }
 0xb95   :  { %v1527_v41 = vsel %vm454_vm8, %v3797_v38, 0.0 }
 0xb96   :  { %3213 = vpow2.f32 %v1525_v39  ;;  %v1731_v40 = vsel %vm454_vm8, %v1729_v32, -inf }
 0xb97   :  { %1732 = vmax.xlane.f32.xlu0 %v1731_v40 }
 0xb98   :  { %1528 = vadd.xlane.f32.xlu1 %v1527_v41 }
 0xb99   :  { %v1724_v42 = vpop.f32.mrf.mxu3 }
 0xb9a   :  { %v1728_v37 = vmul.f32 0.17677669, %v1724_v42 }
 0xb9c   :  { %v3214_v43 = vpop.eup %3213  ;;  %v1730_v45 = vadd.f32 %v3260_v8, %v1728_v37 }
 0xb9d   :  { %v1530_v46 = vsel %vm454_vm8, %v3214_v43, 0.0 }
 0xb9e   :  { %v1734_v48 = vsel %vm454_vm8, %v1730_v45, -inf }
 0xb9f   :  { %1735 = vmax.xlane.f32.xlu2 %v1734_v48  ;;  %1531 = vadd.xlane.f32.xlu0 %v1530_v46 }
 0xbb3   :  { %1612 = vrot.lane.b32.xlu0 %v3768_v25, %s3426_s25 }
 0xbbb   :  { %1754 = vrot.lane.b32.xlu0 %v3768_v25, %s3427_s4 }
 0xbfa   :  { %v1591_v26 = vpop.xlane.xlu1 %1590 }
 0xbfb   :  { %v1662_v49 = vpop.xlane.xlu2 %1661  ;;  %v1595_v51 = vsub.f32 %v1587_v13, %v1591_v26 }
 0xbfc   :  { %v1666_v50 = vsub.f32 %v1658_v14, %v1662_v49 }
 0xbfd   :  { %v1597_v53 = vmul.f32 1.442695, %v1595_v51 }
 0xbfe   :  { %v1668_v52 = vmul.f32 1.442695, %v1666_v50  ;;  %v3063_v50 = vld [vmem:[%s3934_s8 + $0x78] sm:$0xff] }
 0xbff   :  { %1875 = vmatpush.bf16.msrb.mxu1 %v3063_v50 }
 0xc00   :  { %3215 = vpow2.f32 %v1668_v52 }
 0xc01   :  { %3217 = vpow2.f32 %v1597_v53 }
 0xc02   :  { %v1594_v54 = vpop.xlane.xlu0 %1593 }
 0xc03   :  { %v1596_v55 = vsub.f32 %v1588_v28, %v1594_v54  ;;  %v1665_v56 = vpop.xlane.xlu1 %1664 }
 0xc04   :  { %v1667_v58 = vsub.f32 %v1659_v10, %v1665_v56 }
 0xc05   :  { %v1599_v57 = vmul.f32 1.442695, %v1596_v55 }
 0xc06   :  { %v3808_v59 = vpop.eup %3215  ;;  %v1670_v18 = vmul.f32 1.442695, %v1667_v58 }
 0xc07   :  { %3219 = vpow2.f32 %v1599_v57  ;;  %v1672_v60 = vsel %vm454_vm8, %v3808_v59, 0.0  ;;  %v3218_v3 = vpop.eup %3217 }
 0xc08   :  { %1673 = vadd.xlane.f32.xlu2 %v1672_v60  ;;  %3221 = vpow2.f32 %v1670_v18  ;;  %v1601_v5 = vsel %vm454_vm8, %v3218_v3, 0.0  ;;  %v3062_v60 = vld [vmem:[%s3934_s8 + $0x70] sm:$0xff]  ;;  %v3061_v18 = vld [vmem:[%s3934_s8 + $0x68] sm:$0xff] }
 0xc09   :  { %1876 = vmatpush.bf16.msrb.mxu1 %v3062_v60  ;;  %v3071_v60 = vld [vmem:[#allocation5 + $0xb4] sm:$0xf0] }
 0xc0a   :  { %v1733_v4 = vpop.xlane.xlu0 %1732 }
 0xc0b   :  { %v1737_v22 = vsub.f32 %v1729_v32, %v1733_v4  ;;  %v1529_v1 = vpop.xlane.xlu1 %1528  ;;  %v3060_v4 = vld [vmem:[%s3934_s8 + $0x60] sm:$0xff] }
 0xc0d   :  { %v3220_v63 = vpop.eup %3219  ;;  %v1739_v0 = vmul.f32 1.442695, %v1737_v22  ;;  %1877 = vmatpush.bf16.msrb.mxu1 %v3061_v18  ;;  %v3059_v22 = vld [vmem:[%s3934_s8 + $0x58] sm:$0xff]  ;;  %v3070_v18 = vld [vmem:[#allocation5 + $0xb4] sm:$0xf] }
 0xc0e   :  { %v1604_v2 = vsel %vm454_vm8, %v3220_v63, 0.0  ;;  %v3222_v9 = vpop.eup %3221 }
 0xc0f   :  { %3223 = vpow2.f32 %v1739_v0  ;;  %1605 = vadd.xlane.f32.xlu1 %v1604_v2  ;;  %v1675_v12 = vsel %vm454_vm8, %v3222_v9, 0.0  ;;  %v3056_v0 = vld [vmem:[%s3934_s8 + $0x40] sm:$0xff] }
 0xc10   :  { %1602 = vadd.xlane.f32.xlu2 %v1601_v5  ;;  %3225 = vrcp.f32 %v1529_v1 }
 0xc11   :  { %1878 = vmatpush.bf16.msrb.mxu1 %v3060_v4 }
 0xc12   :  { %v1532_v7 = vpop.xlane.xlu0 %1531  ;;  %v1736_v8 = vpop.xlane.xlu2 %1735 }
 0xc13   :  { %3227 = vrcp.f32 %v1532_v7  ;;  %v1738_v61 = vsub.f32 %v1730_v45, %v1736_v8 }
 0xc15   :  { %v3224_v62 = vpop.eup %3223  ;;  %v1741_v11 = vmul.f32 1.442695, %v1738_v61  ;;  %1879 = vmatpush.bf16.msrb.mxu1 %v3059_v22  ;;  %v2865_v22 = vld [vmem:[#allocation5 + $0xb8] sm:$0xf0] }
 0xc16   :  { %v3226_v29 = vpop.eup %3225  ;;  %v1743_v13 = vsel %vm454_vm8, %v3224_v62, 0.0 }
 0xc17   :  { %3229 = vpow2.f32 %v1741_v11  ;;  %1676 = vadd.xlane.f32.xlu1 %v1675_v12  ;;  %v1535_v16 = vmul.f32 %v3226_v29, %v3797_v38 }
 0xc18   :  { %1744 = vadd.xlane.f32.xlu2 %v1743_v13 }
 0xc19   :  { %v3228_v14 = vpop.eup %3227 }
 0xc1a   :  { %v1536_v17 = vmul.f32 %v3228_v14, %v3214_v43 }
 0xc1c   :  { %v1537_v19 = vpack.c.bf16 %v1536_v17, %v1535_v16 }
 0xc1d   :  { %v3230_v20 = vpop.eup %3229 }
 0xc1e   :  { %2778 = vmatmul.msk.bf16.vlgmr.msra.gmra.mxu2 %vm454_vm8, %v1537_v19  ;;  %v1746_v21 = vsel %vm454_vm8, %v3230_v20, 0.0 }
 0xc1f   :  { %1747 = vadd.xlane.f32.xlu1 %v1746_v21 }
 0xc25   :  { %v1613_v44 = vpop.permute.xlu0 %1612 }
 0xc26   :  { %1625 = vmatpush.bf16.msrb.mxu0 %v1613_v44 }
 0xc2d   :  { %v1755_v47 = vpop.permute.xlu0 %1754 }
 0xc2e   :  { %1767 = vmatpush.bf16.msra.mxu0 %v1755_v47 }
 0xc30   :  { %1683 = vrot.lane.b32.xlu2 %v3768_v25, %s3422_s26 }
 0xc7b   :  { %v1674_v6 = vpop.xlane.xlu2 %1673 }
 0xc82   :  { %v1606_v27 = vpop.xlane.xlu1 %1605 }
 0xc83   :  { %3231 = vrcp.f32 %v1606_v27  ;;  %v1603_v28 = vpop.xlane.xlu2 %1602 }
 0xc84   :  { %3233 = vrcp.f32 %v1603_v28 }
 0xc85   :  { %3235 = vrcp.f32 %v1674_v6 }
 0xc89   :  { %v3232_v10 = vpop.eup %3231 }
 0xc8a   :  { %v3234_v30 = vpop.eup %3233  ;;  %v1677_v31 = vpop.xlane.xlu1 %1676  ;;  %v1610_v33 = vmul.f32 %v3232_v10, %v3220_v63  ;;  %v3057_v63 = vld [vmem:[%s3934_s8 + $0x48] sm:$0xff] }
 0xc8b   :  { %v1609_v34 = vmul.f32 %v3234_v30, %v3218_v3  ;;  %3237 = vrcp.f32 %v1677_v31  ;;  %v1745_v35 = vpop.xlane.xlu2 %1744  ;;  %v3236_v38 = vpop.eup %3235  ;;  %v3058_v3 = vld [vmem:[%s3934_s8 + $0x50] sm:$0xff] }
 0xc8c   :  { %3239 = vrcp.f32 %v1745_v35  ;;  %v1680_v40 = vmul.f32 %v3236_v38, %v3808_v59  ;;  %1880 = vmatpush.bf16.msrb.mxu1 %v3058_v3  ;;  %v3079_v38 = vld [vmem:[#allocation5 + $0xf4] sm:$0xf0]  ;;  %v2868_v3 = vor.u32 %v3070_v18, %v2865_v22  ;;  %v2836_v18 = vld [vmem:[%s3939_s13 + $0x2] sm:$0x3]  ;;  %v3089_v22 = vld [vmem:[#allocation7 + $0xc8] sm:$0xff] }
 0xc8d   :  { %v1611_v36 = vpack.c.bf16 %v1610_v33, %v1609_v34 }
 0xc8f   :  { %2780 = vmatmul.msk.bf16.vlgmr.msrb.gmra.mxu0 %vm454_vm8, %v1611_v36 }
 0xc90   :  { %1881 = vmatpush.bf16.msrb.mxu1 %v3057_v63  ;;  %v2855_v63 = vld [vmem:[#allocation5 + $0xa0] sm:$0xf] }
 0xc91   :  { %v3238_v39 = vpop.eup %3237 }
 0xc92   :  { %v1681_v32 = vmul.f32 %v3238_v39, %v3222_v9  ;;  %v1748_v25 = vpop.xlane.xlu1 %1747  ;;  %v3240_v37 = vpop.eup %3239  ;;  %v3078_v39 = vld [vmem:[#allocation5 + $0xf4] sm:$0xf] }
 0xc93   :  { %3241 = vrcp.f32 %v1748_v25  ;;  %v1684_v41 = vpop.permute.xlu2 %1683  ;;  %v1751_v46 = vmul.f32 %v3240_v37, %v3224_v62  ;;  %v2897_v25 = vld [vmem:[#allocation5 + $0xf8] sm:$0xf0]  ;;  %v3076_v37 = vld [vmem:[#allocation5 + $0xe4] sm:$0xf] }
 0xc94   :  { %1696 = vmatpush.bf16.msrb.mxu2 %v1684_v41  ;;  %v1682_v42 = vpack.c.bf16 %v1681_v32, %v1680_v40  ;;  %1882 = vmatpush.bf16.msrb.mxu1 %v3056_v0  ;;  %v2900_v40 = vor.u32 %v3078_v39, %v2897_v25  ;;  %v2887_v41 = vld [vmem:[#allocation5 + $0xe0] sm:$0xf]  ;;  %v3069_v0 = vld [vmem:[#allocation5 + $0xa4] sm:$0xf0] }
 0xc96   :  { %2064 = vmatpush.bf16.msrb.mxu3 %v2900_v40 }
 0xc97   :  { %2782 = vmatmul.msk.bf16.vlgmr.msrb.gmra.mxu2 %vm454_vm8, %v1682_v42  ;;  %v3077_v42 = vld [vmem:[#allocation5 + $0xe4] sm:$0xf0] }
 0xc99   :  { %v3242_v43 = vpop.eup %3241 }
 0xc9a   :  { %v1752_v45 = vmul.f32 %v3242_v43, %v3230_v20  ;;  %v3150_v20 = vld [vmem:[%s3935_s9 + $0x1] ss:$0 sm:$0xff]  ;;  %v2888_v43 = vor.u32 %v3077_v42, %v2887_v41 }
 0xc9b   :  { %v3151_v41 = vld [vmem:[%s3936_s10 + $0x1] ss:$0 sm:$0xff] }
 0xc9c   :  { %v1753_v48 = vpack.c.bf16 %v1752_v45, %v1751_v46  ;;  %v2889_v45 = vld [vmem:[#allocation5 + $0xe8] sm:$0xf0] }
 0xc9d   :  { %v2892_v46 = vor.u32 %v3076_v37, %v2889_v45 }
 0xc9f   :  { %2784 = vmatmul.msk.bf16.vlgmr.msra.gmra.mxu0 %vm454_vm8, %v1753_v48  ;;  %2065 = vmatpush.bf16.msrb.mxu3 %v2892_v46  ;;  %v2879_v48 = vld [vmem:[#allocation5 + $0xd0] sm:$0xf]  ;;  %v3152_v46 = vld [vmem:[%s3937_s11 + $0x1] ss:$0 sm:$0xff] }
 0xca1   :  { %v1556_v26 = vpop.f32.mrf.mxu2 }
 0xca9   :  { %v1558_v51 = vpop.f32.mrf.mxu2 }
 0xd0c   :  { %v1627_v49 = vpop.f32.mrf.mxu0 }
 0xd14   :  { %v1629_v52 = vpop.f32.mrf.mxu0 }
 0xd15   :  { %v3126_v53 = vpack.i.bf16 %v1629_v52, %v1627_v49  ;;  %v3074_v49 = vld [vmem:[#allocation5 + $0xd4] sm:$0xf] }
 0xd17   :  { %3127 = vrot.lane.b32.xlu1 %v3126_v53, %s3427_s4  ;;  %v2871_v53 = vld [vmem:[#allocation5 + $0xc0] sm:$0xf] }
 0xd1a   :  { %v1698_v54 = vpop.f32.mrf.mxu2 }
 0xd1c   :  { %v1769_v55 = vpop.f32.mrf.mxu0 }
 0xd22   :  { %v1700_v56 = vpop.f32.mrf.mxu2 }
 0xd23   :  { %v3131_v57 = vpack.i.bf16 %v1700_v56, %v1698_v54  ;;  %v3073_v54 = vld [vmem:[#allocation5 + $0xc4] sm:$0xf0] }
 0xd24   :  { %v1771_v58 = vpop.f32.mrf.mxu0  ;;  %v2872_v56 = vor.u32 %v3073_v54, %v2871_v53  ;;  %v3085_v53 = vld [vmem:[#allocation7 + $0xa8] sm:$0xff] }
 0xd25   :  { %3132 = vrot.lane.b32.xlu0 %v3131_v57, %s3422_s26  ;;  %v3136_v59 = vpack.i.bf16 %v1771_v58, %v1769_v55  ;;  %v3072_v55 = vld [vmem:[#allocation5 + $0xc4] sm:$0xf]  ;;  %v2873_v57 = vld [vmem:[#allocation5 + $0xc8] sm:$0xf0] }
 0xd26   :  { %v2876_v58 = vor.u32 %v3072_v55, %v2873_v57  ;;  %v3093_v54 = vld [vmem:[#allocation7 + $0xe8] sm:$0xff]  ;;  %v3084_v55 = vld [vmem:[#allocation7 + $0xa0] sm:$0xff]  ;;  %v3083_v57 = vld [vmem:[#allocation7 + $0x98] sm:$0xff] }
 0xd2d   :  { %3137 = vrot.lane.b32.xlu0 %v3136_v59, %s3426_s25  ;;  %v2863_v59 = vld [vmem:[#allocation5 + $0xb0] sm:$0xf] }
 0xd2e   :  { %v2864_v4 = vor.u32 %v3071_v60, %v2863_v59  ;;  %v3082_v59 = vld [vmem:[#allocation7 + $0x90] sm:$0xff] }
 0xd2f   :  { %v3090_v60 = vld [vmem:[#allocation7 + $0xd0] sm:$0xff] }
 0xd89   :  { %v3128_v2 = vpop.permute.xlu1 %3127 }
 0xd8a   :  { %v3130_v5 = vunpack.i.h.bf16 %v3128_v2  ;;  %v3129_v7 = vunpack.i.l.bf16 %v3128_v2  ;;  %v2856_v2 = vor.u32 %v3069_v0, %v2855_v63  ;;  %v1967_v63 = vperm.slane %v2836_v18, 1 }
 0xd8c   :  { %v1799_v62 = vsel %vm429_vm7, %v1558_v51, %v3130_v5  ;;  %v1798_v11 = vsel %vm429_vm7, %v1556_v26, %v3129_v7  ;;  %v3075_v26 = vld [vmem:[#allocation5 + $0xd4] sm:$0xf0]  ;;  %v2881_v51 = vld [vmem:[#allocation5 + $0xd8] sm:$0xf0]  ;;  %v2857_v5 = vld [vmem:[#allocation5 + $0xa8] sm:$0xf0] }
 0xd8d   :  { %v2880_v50 = vor.u32 %v3075_v26, %v2879_v48  ;;  %v2884_v52 = vor.u32 %v3074_v49, %v2881_v51  ;;  %v3095_v51 = vld [vmem:[#allocation7 + $0xf8] sm:$0xff] }
 0xd8e   :  { %2264 = vmatpush.bf16.msra.mxu1 %v3095_v51 }
 0xd8f   :  { %2066 = vmatpush.bf16.msrb.mxu3 %v2884_v52  ;;  %v3094_v52 = vld [vmem:[#allocation7 + $0xf0] sm:$0xff] }
 0xd92   :  { %2265 = vmatpush.bf16.msra.mxu1 %v3094_v52 }
 0xd93   :  { %2067 = vmatpush.bf16.msrb.mxu3 %v2876_v58  ;;  %v3091_v58 = vld [vmem:[#allocation7 + $0xd8] sm:$0xff] }
 0xd96   :  { %2266 = vmatpush.bf16.msra.mxu1 %v3093_v54 }
 0xd97   :  { %v3133_v1 = vpop.permute.xlu0 %3132  ;;  %2068 = vmatpush.bf16.msrb.mxu3 %v2868_v3  ;;  %v1966_v3 = vperm.slane %v2836_v18, 0 }
 0xd98   :  { %v3135_v8 = vunpack.i.h.bf16 %v3133_v1  ;;  %v3134_v9 = vunpack.i.l.bf16 %v3133_v1  ;;  %v3068_v1 = vld [vmem:[#allocation5 + $0xa4] sm:$0xf] }
 0xd99   :  { %v2860_v7 = vor.u32 %v3068_v1, %v2857_v5  ;;  %v3088_v5 = vld [vmem:[#allocation7 + $0xc0] sm:$0xff] }
 0xd9a   :  { %v1801_v13 = vsel %vm740_vm9, %v1799_v62, %v3135_v8  ;;  %v1800_v14 = vsel %vm740_vm9, %v1798_v11, %v3134_v9  ;;  %v2847_v8 = vld [vmem:[#allocation5 + $0x90] sm:$0xf]  ;;  %v3067_v9 = vld [vmem:[#allocation5 + $0x94] sm:$0xf0]  ;;  %v2849_v11 = vld [vmem:[#allocation5 + $0x98] sm:$0xf0] }
 0xd9b   :  { %2069 = vmatpush.bf16.msrb.mxu3 %v2860_v7  ;;  %v2848_v62 = vor.u32 %v3067_v9, %v2847_v8 }
 0xd9f   :  { %v3138_v61 = vpop.permute.xlu0 %3137 }
 0xda0   :  { %v3140_v12 = vunpack.i.h.bf16 %v3138_v61  ;;  %v3139_v29 = vunpack.i.l.bf16 %v3138_v61  ;;  %v3066_v61 = vld [vmem:[#allocation5 + $0x94] sm:$0xf] }
 0xda2   :  { %v1802_v16 = vsel %vm743_vm10, %v1800_v14, %v3139_v29  ;;  %v1803_v17 = vsel %vm743_vm10, %v1801_v13, %v3140_v12  ;;  %v2839_v12 = vld [vmem:[#allocation5 + $0x80] sm:$0xf]  ;;  %v3065_v29 = vld [vmem:[#allocation5 + $0x84] sm:$0xf0]  ;;  %v2852_v14 = vor.u32 %v3066_v61, %v2849_v11 }
 0xda3   :  { %v1804_v19 = vpack.c.bf16 %v1803_v17, %v1802_v16  ;;  %v3064_v16 = vld [vmem:[#allocation5 + $0x84] sm:$0xf]  ;;  %v2841_v17 = vld [vmem:[#allocation5 + $0x88] sm:$0xf0] }
 0xda4   :  { %2070 = vmatpush.bf16.msrb.mxu3 %v2852_v14 }
 0xda5   :  { %1883 = vmatmul.bf16.vlgmr.msrb.gmra.mxu1 %v1804_v19 }
 0xe22   :  { %v1884_v21 = vpop.f32.mrf.mxu1 }
 0xe23   :  { %v1885_v44 = vadd.f32 %v3150_v20, %v1884_v21  ;;  %v2844_v21 = vor.u32 %v3064_v16, %v2841_v17 }
 0xe25   :  { %v1889_v47 = vadd.f32 %v1885_v44, %v3759_v23  ;;  %2071 = vmatpush.bf16.msrb.mxu3 %v2844_v21 }
 0xe27   :  { %1895 = vadd.xlane.f32.xlu2 %v1889_v47 }
 0xe2a   :  { %v1886_v6 = vpop.f32.mrf.mxu1 }
 0xe2b   :  { %v1887_v27 = vadd.f32 %v3150_v20, %v1886_v6  ;;  %v2840_v20 = vor.u32 %v3065_v29, %v2839_v12 }
 0xe2d   :  { %v1890_v28 = vadd.f32 %v1887_v27, %v3761_v24  ;;  %v2895_v24 = vld [vmem:[#allocation5 + $0xf0] sm:$0xf] }
 0xe2e   :  { %v2896_v32 = vor.u32 %v3079_v38, %v2895_v24 }
 0xe2f   :  { %1897 = vadd.xlane.f32.xlu0 %v1890_v28 }
 0xe30   :  { %2050 = vmatpush.bf16.msra.mxu2 %v2896_v32 }
 0xe34   :  { %2051 = vmatpush.bf16.msra.mxu2 %v2888_v43 }
 0xe38   :  { %2052 = vmatpush.bf16.msra.mxu2 %v2880_v50  ;;  %v3087_v50 = vld [vmem:[#allocation7 + $0xb8] sm:$0xff] }
 0xe39   :  { %2250 = vmatpush.bf16.msrb.mxu0 %v3087_v50 }
 0xe3c   :  { %2053 = vmatpush.bf16.msra.mxu2 %v2872_v56  ;;  %v3092_v56 = vld [vmem:[#allocation7 + $0xe0] sm:$0xff] }
 0xe3d   :  { %2267 = vmatpush.bf16.msra.mxu1 %v3092_v56 }
 0xe40   :  { %2054 = vmatpush.bf16.msra.mxu2 %v2864_v4  ;;  %v3081_v4 = vld [vmem:[#allocation7 + $0x88] sm:$0xff] }
 0xe41   :  { %2268 = vmatpush.bf16.msra.mxu1 %v3091_v58 }
 0xe44   :  { %2055 = vmatpush.bf16.msra.mxu2 %v2856_v2  ;;  %v3080_v2 = vld [vmem:[#allocation7 + $0x80] sm:$0xff] }
 0xe45   :  { %2269 = vmatpush.bf16.msra.mxu1 %v3090_v60 }
 0xe48   :  { %2056 = vmatpush.bf16.msra.mxu2 %v2848_v62 }
 0xe49   :  { %2270 = vmatpush.bf16.msra.mxu1 %v3089_v22 }
 0xe4c   :  { %2057 = vmatpush.bf16.msra.mxu2 %v2840_v20 }
 0xe4d   :  { %2271 = vmatpush.bf16.msra.mxu1 %v3088_v5 }
 0xe9a   :  { %v1896_v10 = vpop.xlane.xlu2 %1895 }
 0xe9b   :  { %v1899_v30 = vmul.f32 %v1896_v10, %v3569_v15 }
 0xe9d   :  { %v3864_v31 = vsub.f32 %v1889_v47, %v1899_v30 }
 0xe9f   :  { %v1903_v33 = vmul.f32 %v3864_v31, %v3864_v31 }
 0xea1   :  { %1905 = vadd.xlane.f32.xlu1 %v1903_v33 }
 0xea2   :  { %v1898_v34 = vpop.xlane.xlu0 %1897 }
 0xea3   :  { %v1900_v35 = vmul.f32 %v1898_v34, %v3569_v15 }
 0xea5   :  { %v3869_v36 = vsub.f32 %v1890_v28, %v1900_v35 }
 0xea7   :  { %v1904_v23 = vmul.f32 %v3869_v36, %v3869_v36 }
 0xea9   :  { %1907 = vadd.xlane.f32.xlu2 %v1904_v23 }
 0xf14   :  { %v1906_v13 = vpop.xlane.xlu1 %1905 }
 0xf15   :  { %v1909_v19 = vmul.f32 %v1906_v13, %v3569_v15 }
 0xf17   :  { %v1911_v44 = vadd.f32 1e-12, %v1909_v19 }
 0xf19   :  { %3243 = vrsqrt.f32 %v1911_v44  ;;  %vm1919_vm8 = vweird.f32 %v1911_v44 }
 0xf1c   :  { %v1908_v47 = vpop.xlane.xlu2 %1907 }
 0xf1d   :  { %v1910_v6 = vmul.f32 %v1908_v47, %v3569_v15 }
 0xf1f   :  { %v3244_v27 = vpop.eup %3243  ;;  %v1912_v28 = vadd.f32 1e-12, %v1910_v6 }
 0xf20   :  { %v1914_v10 = vmul.f32 %v3244_v27, %v1911_v44  ;;  %vm1920_vm7 = vweird.f32 %v3244_v27 }
 0xf21   :  { %3245 = vrsqrt.f32 %v1912_v28  ;;  %vm1921_vm9 = vmor %vm1919_vm8, %vm1920_vm7  ;;  %vm1929_vm11 = vweird.f32 %v1912_v28 }
 0xf22   :  { %v1915_v30 = vmul.f32 %v3244_v27, %v1914_v10 }
 0xf24   :  { %v1916_v33 = vmul.f32 0.5, %v1915_v30 }
 0xf26   :  { %v1917_v34 = vsub.f32 1.5, %v1916_v33 }
 0xf27   :  { %v3246_v35 = vpop.eup %3245 }
 0xf28   :  { %v1918_v23 = vmul.f32 %v3244_v27, %v1917_v34  ;;  %v1924_v24 = vmul.f32 %v3246_v35, %v1912_v28  ;;  %vm1930_vm10 = vweird.f32 %v3246_v35 }
 0xf29   :  { %vm1931_vm12 = vmor %vm1929_vm11, %vm1930_vm10 }
 0xf2a   :  { %v1925_v38 = vmul.f32 %v3246_v35, %v1924_v24  ;;  %v1922_v39 = vsel %vm1921_vm9, %v3244_v27, %v1918_v23 }
 0xf2b   :  { %v1933_v40 = vmul.f32 %v1922_v39, %v3864_v31 }
 0xf2c   :  { %v1926_v32 = vmul.f32 0.5, %v1925_v38 }
 0xf2d   :  { %v1938_v45 = vmul.f32 %v3151_v41, %v1933_v40 }
 0xf2e   :  { %v1927_v25 = vsub.f32 1.5, %v1926_v32 }
 0xf2f   :  { %v3883_v26 = vadd.f32 %v3152_v46, %v1938_v45 }
 0xf30   :  { %v1928_v42 = vmul.f32 %v3246_v35, %v1927_v25 }
 0xf32   :  { %v1932_v37 = vsel %vm1931_vm12, %v3246_v35, %v1928_v42 }
 0xf33   :  { %v1934_v43 = vmul.f32 %v1932_v37, %v3869_v36  ;;  %v3086_v36 = vld [vmem:[#allocation7 + $0xb0] sm:$0xff] }
 0xf34   :  { %2251 = vmatpush.bf16.msrb.mxu0 %v3086_v36 }
 0xf35   :  { %v1939_v48 = vmul.f32 %v3151_v41, %v1934_v43 }
 0xf37   :  { %v3885_v49 = vadd.f32 %v3152_v46, %v1939_v48 }
 0xf38   :  { %2252 = vmatpush.bf16.msrb.mxu0 %v3085_v53  ;;  %v3153_v53 = vld [vmem:[%s3941_s15 + $0x1] ss:$0 sm:$0xff] }
 0xf39   :  { %v1945_v31 = vpack.c.bf16 %v3885_v49, %v3883_v26 }
 0xf3b   :  { %2058 = vmatmul.bf16.vlgmr.msra.gmra.mxu2 %v1945_v31  ;;  %2072 = vmatmul.bf16.vlgmr.msrb.gmra.mxu3 %v1945_v31 }
 0xf3c   :  { %2253 = vmatpush.bf16.msrb.mxu0 %v3084_v55 }
 0xf40   :  { %2254 = vmatpush.bf16.msrb.mxu0 %v3083_v57 }
 0xf44   :  { %2255 = vmatpush.bf16.msrb.mxu0 %v3082_v59 }
 0xf48   :  { %2256 = vmatpush.bf16.msrb.mxu0 %v3081_v4 }
 0xf4c   :  { %2257 = vmatpush.bf16.msrb.mxu0 %v3080_v2 }
 0xfbe   :  { %v2059_v0 = vpop.f32.mrf.mxu2  ;;  %v2073_v1 = vpop.f32.mrf.mxu3 }
 0xfbf   :  { %v2060_v7 = vadd.f32 %v2059_v0, %v1966_v3  ;;  %v2074_v8 = vadd.f32 %v2073_v1, %v1967_v63 }
 0xfc1   :  { %v2078_v9 = vmul.f32 %v2060_v7, %v2060_v7  ;;  %v2079_v61 = vmul.f32 %v2074_v8, %v2074_v8 }
 0xfc3   :  { %v2082_v62 = vmul.f32 %v2078_v9, %v2060_v7  ;;  %v2083_v11 = vmul.f32 %v2079_v61, %v2074_v8  ;;  %v2353_v9 = vld [vmem:[#allocation8 + $0x68] sm:$0xff]  ;;  %v2352_v61 = vld [vmem:[#allocation8 + $0x60] sm:$0xff] }
 0xfc5   :  { %v2086_v12 = vmul.f32 0.044715, %v2082_v62  ;;  %v2087_v29 = vmul.f32 0.044715, %v2083_v11  ;;  %v2351_v62 = vld [vmem:[#allocation8 + $0x58] sm:$0xff]  ;;  %v2350_v11 = vld [vmem:[#allocation8 + $0x50] sm:$0xff] }
 0xfc6   :  { %v2061_v13 = vpop.f32.mrf.mxu2  ;;  %v2075_v14 = vpop.f32.mrf.mxu3 }
 0xfc7   :  { %v2090_v16 = vadd.f32 %v2086_v12, %v2060_v7  ;;  %v2091_v17 = vadd.f32 %v2087_v29, %v2074_v8  ;;  %v2062_v19 = vadd.f32 %v2061_v13, %v1966_v3  ;;  %v2076_v20 = vadd.f32 %v2075_v14, %v1967_v63  ;;  %v2349_v12 = vld [vmem:[#allocation8 + $0x48] sm:$0xff]  ;;  %v2348_v29 = vld [vmem:[#allocation8 + $0x40] sm:$0xff]  ;;  %v2347_v13 = vld [vmem:[#allocation8 + $0x38] sm:$0xff] }
 0xfc8   :  { %v2346_v14 = vld [vmem:[#allocation8 + $0x30] sm:$0xff] }
 0xfc9   :  { %v2094_v21 = vmul.f32 0.7978846, %v2090_v16  ;;  %v2080_v44 = vmul.f32 %v2062_v19, %v2062_v19  ;;  %v2081_v47 = vmul.f32 %v2076_v20, %v2076_v20  ;;  %v2095_v6 = vmul.f32 0.7978846, %v2091_v17  ;;  %v2345_v16 = vld [vmem:[#allocation8 + $0x28] sm:$0xff]  ;;  %v2344_v17 = vld [vmem:[#allocation8 + $0x20] sm:$0xff] }
 0xfcb   :  { %v2084_v27 = vmul.f32 %v2080_v44, %v2062_v19  ;;  %v2085_v28 = vmul.f32 %v2081_v47, %v2076_v20  ;;  %3247 = vtanh.f32 %v2094_v21  ;;  %v2342_v44 = vld [vmem:[#allocation8 + $0x10] sm:$0xff] }
 0xfcc   :  { %3249 = vtanh.f32 %v2095_v6  ;;  %v2341_v6 = vld [vmem:[#allocation8 + $0x8] sm:$0xff] }
 0xfcd   :  { %v2088_v10 = vmul.f32 0.044715, %v2084_v27  ;;  %v2089_v30 = vmul.f32 0.044715, %v2085_v28  ;;  %v2340_v27 = vld [vmem:[#allocation8] sm:$0xff] }
 0xfcf   :  { %v2092_v33 = vadd.f32 %v2088_v10, %v2062_v19  ;;  %v2093_v34 = vadd.f32 %v2089_v30, %v2076_v20 }
 0xfd1   :  { %v2096_v35 = vmul.f32 0.7978846, %v2092_v33  ;;  %v2097_v23 = vmul.f32 0.7978846, %v2093_v34  ;;  %v3248_v24 = vpop.eup %3247 }
 0xfd2   :  { %v3250_v38 = vpop.eup %3249  ;;  %v2102_v39 = vadd.f32 1.0, %v3248_v24 }
 0xfd3   :  { %3251 = vtanh.f32 %v2096_v35  ;;  %v2103_v32 = vadd.f32 1.0, %v3250_v38 }
 0xfd4   :  { %3253 = vtanh.f32 %v2097_v23  ;;  %v2106_v41 = vmul.f32 0.5, %v2102_v39 }
 0xfd5   :  { %v2107_v37 = vmul.f32 0.5, %v2103_v32 }
 0xfd6   :  { %v2110_v48 = vmul.f32 %v2106_v41, %v2060_v7 }
 0xfd7   :  { %v2111_v50 = vmul.f32 %v2107_v37, %v2074_v8  ;;  %v2354_v8 = vld [vmem:[#allocation8 + $0x70] sm:$0xff] }
 0xfd9   :  { %v3252_v25 = vpop.eup %3251 }
 0xfda   :  { %v3254_v40 = vpop.eup %3253  ;;  %v2104_v42 = vadd.f32 1.0, %v3252_v25 }
 0xfdb   :  { %v2105_v43 = vadd.f32 1.0, %v3254_v40 }
 0xfdc   :  { %v2108_v45 = vmul.f32 0.5, %v2104_v42 }
 0xfdd   :  { %v2109_v46 = vmul.f32 0.5, %v2105_v43  ;;  %v3154_v43 = vld [vmem:[%s3942_s16 + $0x1] ss:$0 sm:$0xff] }
 0xfde   :  { %v2112_v31 = vmul.f32 %v2108_v45, %v2062_v19  ;;  %v2343_v19 = vld [vmem:[#allocation8 + $0x18] sm:$0xff] }
 0xfdf   :  { %v2113_v51 = vmul.f32 %v2109_v46, %v2076_v20 }
 0xfe0   :  { %v2114_v36 = vpack.c.bf16 %v2112_v31, %v2110_v48 }
 0xfe1   :  { %v2115_v52 = vpack.c.bf16 %v2113_v51, %v2111_v50  ;;  %v3155_v50 = vld [vmem:[%s3943_s17 + $0x1] ss:$0 sm:$0xff]  ;;  %s3429_s17 = smov [#allocation11]  }
 0xfe2   :  { %2258 = vmatmul.bf16.vlgmr.msrb.gmra.mxu0 %v2114_v36  ;;  %s2397_s25 = sshll.u32 %s3429_s17, 4  ;;  %s2398_s25 = int_to_ptr.vmem [resolvable:$true] %s2397_s25 }
 0xfe3   :  { %2272 = vmatmul.bf16.vlgmr.msra.gmra.mxu1 %v2115_v52 }
0x105f   :  { %v2259_v54 = vpop.f32.mrf.mxu0 }
0x1060   :  { %v2260_v55 = vadd.f32 %v3153_v53, %v2259_v54  ;;  %v2273_v56 = vpop.f32.mrf.mxu1  ;;  %v3156_v54 = vld [vmem:[%s3945_s19] ss:$0 sm:$0xff] }
0x1062   :  { %v2274_v57 = vadd.f32 %v2273_v56, %v2260_v55 }
0x1064   :  { %v2278_v58 = vadd.f32 %v2274_v57, %v3883_v26 }
0x1066   :  { %2284 = vadd.xlane.f32.xlu1 %v2278_v58 }
0x1067   :  { %v2261_v59 = vpop.f32.mrf.mxu0 }
0x1068   :  { %v2262_v60 = vadd.f32 %v3153_v53, %v2261_v59  ;;  %v2275_v18 = vpop.f32.mrf.mxu1 }
0x106a   :  { %v2276_v4 = vadd.f32 %v2275_v18, %v2262_v60 }
0x106c   :  { %v2279_v22 = vadd.f32 %v2276_v4, %v3885_v49  ;;  %v2355_v49 = vld [vmem:[#allocation8 + $0x78] sm:$0xff] }
0x106d   :  { %2360 = vmatpush.msrb.mxu2 %v2355_v49 }
0x106e   :  { %2286 = vadd.xlane.f32.xlu0 %v2279_v22 }
0x106f   :  { %2361 = vmatpush.msrb.mxu2 %v2354_v8 }
0x1071   :  { %2362 = vmatpush.msrb.mxu2 %v2353_v9 }
0x1073   :  { %2363 = vmatpush.msrb.mxu2 %v2352_v61 }
0x1075   :  { %2364 = vmatpush.msrb.mxu2 %v2351_v62 }
0x1077   :  { %2365 = vmatpush.msrb.mxu2 %v2350_v11 }
0x1079   :  { %2366 = vmatpush.msrb.mxu2 %v2349_v12 }
0x107b   :  { %2367 = vmatpush.msrb.mxu2 %v2348_v29 }
0x107d   :  { %2368 = vmatpush.msrb.mxu2 %v2347_v13 }
0x107f   :  { %2369 = vmatpush.msrb.mxu2 %v2346_v14 }
0x1081   :  { %2370 = vmatpush.msrb.mxu2 %v2345_v16 }
0x1083   :  { %2371 = vmatpush.msrb.mxu2 %v2344_v17 }
0x1085   :  { %2372 = vmatpush.msrb.mxu2 %v2343_v19 }
0x1087   :  { %2373 = vmatpush.msrb.mxu2 %v2342_v44 }
0x1089   :  { %2374 = vmatpush.msrb.mxu2 %v2341_v6 }
0x108b   :  { %2375 = vmatpush.msrb.mxu2 %v2340_v27 }
0x10d9   :  { %v2285_v3 = vpop.xlane.xlu1 %2284 }
0x10da   :  { %v2288_v63 = vmul.f32 %v2285_v3, %v3569_v15 }
0x10dc   :  { %v3898_v0 = vsub.f32 %v2278_v58, %v2288_v63 }
0x10de   :  { %v2292_v1 = vmul.f32 %v3898_v0, %v3898_v0 }
0x10e0   :  { %2294 = vadd.xlane.f32.xlu0 %v2292_v1 }
0x10e1   :  { %v2287_v2 = vpop.xlane.xlu0 %2286 }
0x10e2   :  { %v2289_v26 = vmul.f32 %v2287_v2, %v3569_v15 }
0x10e4   :  { %v3903_v5 = vsub.f32 %v2279_v22, %v2289_v26 }
0x10e6   :  { %v2293_v7 = vmul.f32 %v3903_v5, %v3903_v5 }
0x10e8   :  { %2296 = vadd.xlane.f32.xlu2 %v2293_v7 }
0x1153   :  { %v2295_v20 = vpop.xlane.xlu0 %2294 }
0x1154   :  { %v2298_v21 = vmul.f32 %v2295_v20, %v3569_v15 }
0x1156   :  { %v2300_v47 = vadd.f32 1e-12, %v2298_v21 }
0x1158   :  { %3255 = vrsqrt.f32 %v2300_v47  ;;  %vm2308_vm14 = vweird.f32 %v2300_v47 }
0x115b   :  { %v2297_v28 = vpop.xlane.xlu2 %2296 }
0x115c   :  { %v2299_v10 = vmul.f32 %v2297_v28, %v3569_v15 }
0x115e   :  { %v3256_v30 = vpop.eup %3255  ;;  %v2301_v33 = vadd.f32 1e-12, %v2299_v10 }
0x115f   :  { %v2303_v34 = vmul.f32 %v3256_v30, %v2300_v47  ;;  %vm2309_vm13 = vweird.f32 %v3256_v30 }
0x1160   :  { %3257 = vrsqrt.f32 %v2301_v33  ;;  %vm2310_vm15 = vmor %vm2308_vm14, %vm2309_vm13  ;;  %vm2318_vm1 = vweird.f32 %v2301_v33 }
0x1161   :  { %v2304_v35 = vmul.f32 %v3256_v30, %v2303_v34 }
0x1163   :  { %v2305_v23 = vmul.f32 0.5, %v2304_v35 }
0x1165   :  { %v2306_v24 = vsub.f32 1.5, %v2305_v23 }
0x1166   :  { %v3258_v38 = vpop.eup %3257 }
0x1167   :  { %v2313_v39 = vmul.f32 %v3258_v38, %v2301_v33  ;;  %v2307_v32 = vmul.f32 %v3256_v30, %v2306_v24  ;;  %vm2319_vm0 = vweird.f32 %v3258_v38 }
0x1168   :  { %vm2320_vm2 = vmor %vm2318_vm1, %vm2319_vm0 }
0x1169   :  { %v2314_v25 = vmul.f32 %v3258_v38, %v2313_v39  ;;  %v2311_v41 = vsel %vm2310_vm15, %v3256_v30, %v2307_v32 }
0x116a   :  { %v2322_v15 = vmul.f32 %v2311_v41, %v3898_v0 }
0x116b   :  { %v2315_v40 = vmul.f32 0.5, %v2314_v25 }
0x116c   :  { %v2327_v48 = vmul.f32 %v3154_v43, %v2322_v15 }
0x116d   :  { %v2316_v42 = vsub.f32 1.5, %v2315_v40 }
0x116e   :  { %v2332_v36 = vadd.f32 %v3155_v50, %v2327_v48 }
0x116f   :  { %v2317_v37 = vmul.f32 %v3258_v38, %v2316_v42 }
0x1171   :  { %v2321_v45 = vsel %vm2320_vm2, %v3258_v38, %v2317_v37 }
0x1172   :  { %v2323_v46 = vmul.f32 %v2321_v45, %v3903_v5 }
0x1174   :  { %v2328_v31 = vmul.f32 %v3154_v43, %v2323_v46 }
0x1176   :  { %v2333_v51 = vadd.f32 %v3155_v50, %v2328_v31 }
0x1178   :  { %v2335_v52 = vrot.slane %v2333_v51, 7 }
0x117a   :  { %v2338_v53 = vsel %vm2337_vm3, %v2332_v36, %v2335_v52 }
0x117b   :  { %2376 = vmatmul.f32.vlgmr.msrb.gmra.mxu2 %v2338_v53  ;;  %2339 = vst [vmem:[#allocation10] sm:$0x3] %v2338_v53 }
0x117c   :  { %2391 = dma.vmem_to_hbm [thread:$0]  %s2387_s22, 32, %s2389_s23, [#allocation4]  }
0x11fe   :  { %v2377_v55 = vpop.f32.mrf.mxu2 }
0x11ff   :  { %v2378_v56 = vadd.f32 %v3156_v54, %v2377_v55 }
0x1201   :  { %2380 = vst [vmem:[#allocation11] sm:$0x3] %v2378_v56 }
0x1202   :  { %2402 = dma.vmem_to_hbm [thread:$0]  %s2398_s25, 32, %s2400_s2, [#allocation12]  }
0x1203   :  { %3411 = dma.done.wait [#allocation4], 32  }
0x1204   :  { %3412 = vsyncadd [#allocation4], 4294967264 }
0x1205   :  { %3413 = dma.done.wait [#allocation12], 32  }
0x1206   :  { %3414 = vsyncadd [#allocation12], 4294967264 }
0x1207   :  { %2411 = vsyncpa [#allocation3], 1 }
0x1208   :  { %2412 = vsyncpa [#allocation6], 1 }
0x1209   :  { %2413 = vsyncpa [#allocation9], 1 }
0x120a   :  { %2414 = vsyncpa [#allocation4], 1 }
0x120b   :  { %2415 = vsyncpa [#allocation12], 1 }

</bundles_post_ra>
